<compile_context>
chip_gen: v7x
topology: tpu7x:2x2x1
jax: 0.10.0
libtpu: 0.0.40
codegen_flags: <defaults>
</compile_context>

<pallas_src>
import numpy as np

import jax
import jax.numpy as jnp
from jax import lax
from jax.experimental import pallas as pl
from jax.experimental.pallas import tpu as pltpu


# ------------------- constant 0/1 pooling-selection matrices -----------------
# pool1: conv1 activations live in a (60, 600) tile, lane index = ci*60 + j.
# The pooled value for (ci, t, u) is the shifted-max at row 3t, lane ci*60+3u
# (3u <= 57, and the +2 lane shift stays inside the 60-lane channel block, so
# no wrap-around column is ever selected).
_SELR1 = np.zeros((20, 58), np.float32)
_SELR1[np.arange(20), 3 * np.arange(20)] = 1.0
_SELC1 = np.zeros((598, 200), np.float32)
for _ci in range(10):
    for _u in range(20):
        _SELC1[_ci * 60 + 3 * _u, _ci * 20 + _u] = 1.0

# pool2: conv2 activations live in a (16, 160) tile, lane index = co*16 + j.
_SELR2 = np.zeros((5, 14), np.float32)
_SELR2[np.arange(5), 3 * np.arange(5)] = 1.0
_SELC2 = np.zeros((158, 50), np.float32)
for _ci in range(10):
    for _u in range(5):
        _SELC2[_ci * 16 + 3 * _u, _ci * 5 + _u] = 1.0


# --------------------------------- kernel ------------------------------------

def _simplenet_kernel(x_ref, w1b_ref, b1r_ref, selr1_ref, selc1_ref,
                      w2b_ref, b2r_ref, selr2_ref, selc2_ref,
                      fc1w_ref, fc1b_ref, fc2w_ref, fc2b_ref, o_ref):
    bt = x_ref.shape[0]                     # images per grid step (static)
    selr1 = selr1_ref[...]
    selc1 = selc1_ref[...]
    selr2 = selr2_ref[...]
    selc2 = selc2_ref[...]
    b1r = b1r_ref[...]
    b2r = b2r_ref[...]

    p2_tiles = []
    for b in range(bt):
        x = x_ref[b]                                            # (64, 64)

        # conv1 (1->10, k5) as 5 banded MXU matmuls; out lane = co*60 + j.
        y1 = jnp.dot(x[0:60, :], w1b_ref[0],
                     preferred_element_type=jnp.float32)
        for kh in range(1, 5):
            y1 = y1 + jnp.dot(x[kh:kh + 60, :], w1b_ref[kh],
                              preferred_element_type=jnp.float32)
        y1 = jnp.maximum(y1 + b1r, 0.0)                         # (60, 600)

        # MaxPool(3,3): 8 shifted maxima + 0/1 selection matmuls (all
        # channels at once).
        m = jnp.maximum(jnp.maximum(y1[0:58, :], y1[1:59, :]), y1[2:60, :])
        m = jnp.maximum(jnp.maximum(m[:, 0:598], m[:, 1:599]), m[:, 2:600])
        p1 = jnp.dot(selr1, m, preferred_element_type=jnp.float32)   # (20, 598)
        p1 = jnp.dot(p1, selc1, preferred_element_type=jnp.float32)  # (20, 200)

        # conv2 (10->10, k5) as 5 banded MXU matmuls on the pooled layout
        # (row t, lane ci*20 + u); out lane = co*16 + j.
        y2 = jnp.dot(p1[0:16, :], w2b_ref[0],
                     preferred_element_type=jnp.float32)
        for kh in range(1, 5):
            y2 = y2 + jnp.dot(p1[kh:kh + 16, :], w2b_ref[kh],
                              preferred_element_type=jnp.float32)
        y2 = jnp.maximum(y2 + b2r, 0.0)                         # (16, 160)

        m2 = jnp.maximum(jnp.maximum(y2[0:14, :], y2[1:15, :]), y2[2:16, :])
        m2 = jnp.maximum(jnp.maximum(m2[:, 0:158], m2[:, 1:159]), m2[:, 2:160])
        p2 = jnp.dot(selr2, m2, preferred_element_type=jnp.float32)   # (5, 158)
        p2 = jnp.dot(p2, selc2, preferred_element_type=jnp.float32)   # (5, 50)
        p2_tiles.append(p2)                 # layout [t, ci*5 + u]

    # fc1 (+ReLU) + fc2 batched over the whole tile: 5 matmuls with M = bt
    # rows, then one (bt,100)@(100,15) matmul.  No M=1 serial dot chain.
    h = fc1b_ref[...]                                           # (1, 100)
    for t in range(5):
        lhs = jnp.concatenate([p2[t:t + 1, :] for p2 in p2_tiles], axis=0)
        h = h + jnp.dot(lhs, fc1w_ref[t], preferred_element_type=jnp.float32)
    h = jnp.maximum(h, 0.0)                                     # (bt, 100)
    out = jnp.dot(h, fc2w_ref[...], preferred_element_type=jnp.float32)
    out = out + fc2b_ref[...]                                   # (bt, 15)
    o_ref[:, 0, :] = out


# ------------------------- weight pre-processing (XLA) -----------------------

def _banded_conv1_weights(w1):
    # B1[kh][r, co*60 + j] = w1[co, kh, r - j]  if 0 <= r - j <= 4 else 0.
    r = jnp.arange(64)[:, None]
    c = jnp.arange(600)[None, :]
    co = c // 60
    j = c % 60
    kw = r - j
    valid = (kw >= 0) & (kw <= 4)
    kwc = jnp.clip(kw, 0, 4)
    mats = []
    for kh in range(5):
        w1kh = w1[:, kh, :]                                     # (10, 5)
        mats.append(jnp.where(valid, w1kh[co, kwc], 0.0))
    return jnp.stack(mats, axis=0)                              # (5, 64, 600)


def _banded_conv2_weights(w2):
    # B2[kh][ci*20 + u, co*16 + j] = w2[co, ci, kh, u - j] if 0 <= u - j <= 4.
    r = jnp.arange(200)[:, None]
    c = jnp.arange(160)[None, :]
    ci = r // 20
    u = r % 20
    co = c // 16
    j = c % 16
    kw = u - j
    valid = (kw >= 0) & (kw <= 4)
    kwc = jnp.clip(kw, 0, 4)
    mats = []
    for kh in range(5):
        w2kh = w2[:, :, kh, :]                                  # (10, 10, 5)
        mats.append(jnp.where(valid, w2kh[co, ci, kwc], 0.0))
    return jnp.stack(mats, axis=0)                              # (5, 200, 160)


# --------------------------------- forward -----------------------------------

def simple_net_forward(x_nchw, params):
    n = x_nchw.shape[0]
    x = x_nchw[:, 0].astype(jnp.float32)                        # (N, 64, 64)

    w1 = params["w1"].astype(jnp.float32).reshape(10, 5, 5)     # Cin == 1
    w2 = params["w2"].astype(jnp.float32)
    w1b = _banded_conv1_weights(w1)                             # (5, 64, 600)
    w2b = _banded_conv2_weights(w2)                             # (5, 200, 160)
    b1r = jnp.repeat(params["b1"].astype(jnp.float32), 60).reshape(1, 600)
    b2r = jnp.repeat(params["b2"].astype(jnp.float32), 16).reshape(1, 160)

    # fc1 weights rearranged to [t, ci*5+u, n_out] to match the pooled layout.
    fc1w = jnp.transpose(
        params["fc1_w"].astype(jnp.float32).reshape(100, 10, 5, 5),
        (2, 1, 3, 0)).reshape(5, 50, 100)
    fc1b = params["fc1_b"].astype(jnp.float32).reshape(1, 100)
    fc2w = params["fc2_w"].astype(jnp.float32).T                # (100, 15)
    fc2b = params["fc2_b"].astype(jnp.float32).reshape(1, 15)

    # Batch tile: amortize per-step pipeline overhead while keeping at least
    # 2 grid steps so both v7x TensorCores get work.
    if n >= 8:
        bt = 4
    elif n >= 4:
        bt = 2
    else:
        bt = 1
    n_pad = (-n) % bt
    if n_pad:
        x = jnp.pad(x, ((0, n_pad), (0, 0), (0, 0)))
    n_total = n + n_pad

    out = pl.pallas_call(
        _simplenet_kernel,
        out_shape=jax.ShapeDtypeStruct((n_total, 1, 15), jnp.float32),
        grid=(n_total // bt,),
        in_specs=[
            pl.BlockSpec((bt, 64, 64), lambda i: (i, 0, 0)),        # images
            pl.BlockSpec((5, 64, 600), lambda i: (0, 0, 0)),        # conv1 banded
            pl.BlockSpec((1, 600), lambda i: (0, 0)),               # conv1 bias row
            pl.BlockSpec((20, 58), lambda i: (0, 0)),               # pool1 row sel
            pl.BlockSpec((598, 200), lambda i: (0, 0)),             # pool1 col sel
            pl.BlockSpec((5, 200, 160), lambda i: (0, 0, 0)),       # conv2 banded
            pl.BlockSpec((1, 160), lambda i: (0, 0)),               # conv2 bias row
            pl.BlockSpec((5, 14), lambda i: (0, 0)),                # pool2 row sel
            pl.BlockSpec((158, 50), lambda i: (0, 0)),              # pool2 col sel
            pl.BlockSpec((5, 50, 100), lambda i: (0, 0, 0)),        # fc1 weights
            pl.BlockSpec((1, 100), lambda i: (0, 0)),               # fc1 bias
            pl.BlockSpec((100, 15), lambda i: (0, 0)),              # fc2 weights
            pl.BlockSpec((1, 15), lambda i: (0, 0)),                # fc2 bias
        ],
        out_specs=pl.BlockSpec((bt, 1, 15), lambda i: (i, 0, 0)),
        compiler_params=pltpu.CompilerParams(
            dimension_semantics=("parallel",)),
    )(x, w1b, b1r, jnp.asarray(_SELR1), jnp.asarray(_SELC1),
      w2b, b2r, jnp.asarray(_SELR2), jnp.asarray(_SELC2),
      fc1w, fc1b, fc2w, fc2b)
    return out.reshape(n_total, 15)[:n]


# ---------------------------- reference & params ------------------------------

def _reference_forward(x_nchw, params):
    y = lax.conv_general_dilated(
        x_nchw.astype(jnp.float32), params["w1"], (1, 1), "VALID",
        dimension_numbers=("NCHW", "OIHW", "NCHW"))
    y = jnp.maximum(y + params["b1"][None, :, None, None], 0.0)
    y = lax.reduce_window(y, -jnp.inf, lax.max, (1, 1, 3, 3), (1, 1, 3, 3), "VALID")
    y = lax.conv_general_dilated(
        y, params["w2"], (1, 1), "VALID",
        dimension_numbers=("NCHW", "OIHW", "NCHW"))
    y = jnp.maximum(y + params["b2"][None, :, None, None], 0.0)
    y = lax.reduce_window(y, -jnp.inf, lax.max, (1, 1, 3, 3), (1, 1, 3, 3), "VALID")
    y = y.reshape(y.shape[0], -1)
    y = jnp.maximum(y @ params["fc1_w"].T + params["fc1_b"], 0.0)
    return y @ params["fc2_w"].T + params["fc2_b"]


def init_params(key):
    ks = jax.random.split(key, 8)

    def u(k, shape, fan_in):
        bound = 1.0 / jnp.sqrt(float(fan_in))
        return jax.random.uniform(k, shape, jnp.float32, -bound, bound)

    return {
        "w1": u(ks[0], (10, 1, 5, 5), 1 * 5 * 5),     # torch Conv2d layout
        "b1": u(ks[1], (10,), 1 * 5 * 5),
        "w2": u(ks[2], (10, 10, 5, 5), 10 * 5 * 5),
        "b2": u(ks[3], (10,), 10 * 5 * 5),
        "fc1_w": u(ks[4], (100, 250), 250),           # torch Linear layout
        "fc1_b": u(ks[5], (100,), 250),
        "fc2_w": u(ks[6], (15, 100), 100),
        "fc2_b": u(ks[7], (15,), 100),
    }


# TODO(synk): self.loss_criterion (CrossEntropyLoss) is defined but never used
# in forward(); it is intentionally not implemented here.

if __name__ == "__main__":
    key = jax.random.PRNGKey(0)
    k_x, k_p = jax.random.split(key)
    # SimpleNet's fc input of 10*5*5 implies 64x64 single-channel images.
    x = jax.random.normal(k_x, (2, 1, 64, 64), dtype=jnp.float32)
    params = init_params(k_p)

    fwd = jax.jit(simple_net_forward)
    out = fwd(x, params)
    jax.block_until_ready(out)
    assert out.shape == (2, 15) and out.dtype == jnp.float32

    ref = _reference_forward(x, params)
    np.testing.assert_allclose(np.asarray(out), np.asarray(ref),
                               rtol=2e-2, atol=2e-2)
    print("KERNEL_OK")
</pallas_src>

<mosaic_0001>
module attributes {stable_mosaic.version = 11 : i64} {
  func.func @_simplenet_kernel(%arg0: i32, %arg1: memref<1x64x64xf32, #tpu.memory_space<vmem>>, %arg2: memref<5x64x600xf32, #tpu.memory_space<vmem>>, %arg3: memref<1x600xf32, #tpu.memory_space<vmem>>, %arg4: memref<20x58xf32, #tpu.memory_space<vmem>>, %arg5: memref<598x200xf32, #tpu.memory_space<vmem>>, %arg6: memref<5x200x160xf32, #tpu.memory_space<vmem>>, %arg7: memref<1x160xf32, #tpu.memory_space<vmem>>, %arg8: memref<5x14xf32, #tpu.memory_space<vmem>>, %arg9: memref<158x50xf32, #tpu.memory_space<vmem>>, %arg10: memref<5x50x100xf32, #tpu.memory_space<vmem>>, %arg11: memref<1x100xf32, #tpu.memory_space<vmem>>, %arg12: memref<100x15xf32, #tpu.memory_space<vmem>>, %arg13: memref<1x15xf32, #tpu.memory_space<vmem>>, %arg14: memref<1x1x15xf32, #tpu.memory_space<vmem>>) attributes {dimension_semantics = [#tpu.dimension_semantics<parallel>], iteration_bounds = array<i64: 2>, scalar_prefetch = 0 : i64, scratch_operands = 0 : i64, tpu.core_type = #tpu.core_type<tc>, window_params = [{transform_indices = @transform_0, window_bounds = array<i64: 1, 64, 64>}, {pipeline_mode = #tpu.pipeline_mode<synchronous>, transform_indices = @transform_1, window_bounds = array<i64: 5, 64, 600>}, {pipeline_mode = #tpu.pipeline_mode<synchronous>, transform_indices = @transform_2, window_bounds = array<i64: 1, 600>}, {pipeline_mode = #tpu.pipeline_mode<synchronous>, transform_indices = @transform_3, window_bounds = array<i64: 20, 58>}, {pipeline_mode = #tpu.pipeline_mode<synchronous>, transform_indices = @transform_4, window_bounds = array<i64: 598, 200>}, {pipeline_mode = #tpu.pipeline_mode<synchronous>, transform_indices = @transform_5, window_bounds = array<i64: 5, 200, 160>}, {pipeline_mode = #tpu.pipeline_mode<synchronous>, transform_indices = @transform_6, window_bounds = array<i64: 1, 160>}, {pipeline_mode = #tpu.pipeline_mode<synchronous>, transform_indices = @transform_7, window_bounds = array<i64: 5, 14>}, {pipeline_mode = #tpu.pipeline_mode<synchronous>, transform_indices = @transform_8, window_bounds = array<i64: 158, 50>}, {pipeline_mode = #tpu.pipeline_mode<synchronous>, transform_indices = @transform_9, window_bounds = array<i64: 5, 50, 100>}, {pipeline_mode = #tpu.pipeline_mode<synchronous>, transform_indices = @transform_10, window_bounds = array<i64: 1, 100>}, {pipeline_mode = #tpu.pipeline_mode<synchronous>, transform_indices = @transform_11, window_bounds = array<i64: 100, 15>}, {pipeline_mode = #tpu.pipeline_mode<synchronous>, transform_indices = @transform_12, window_bounds = array<i64: 1, 15>}, {transform_indices = @transform_13, window_bounds = array<i64: 1, 1, 15>}]} {
    %c0 = arith.constant 0 : index
    %c0_0 = arith.constant 0 : index
    %0 = vector.load %arg4[%c0, %c0_0] : memref<20x58xf32, #tpu.memory_space<vmem>>, vector<20x58xf32>
    %c0_1 = arith.constant 0 : index
    %c0_2 = arith.constant 0 : index
    %1 = vector.load %arg5[%c0_1, %c0_2] : memref<598x200xf32, #tpu.memory_space<vmem>>, vector<598x200xf32>
    %c0_3 = arith.constant 0 : index
    %c0_4 = arith.constant 0 : index
    %2 = vector.load %arg8[%c0_3, %c0_4] : memref<5x14xf32, #tpu.memory_space<vmem>>, vector<5x14xf32>
    %c0_5 = arith.constant 0 : index
    %c0_6 = arith.constant 0 : index
    %3 = vector.load %arg9[%c0_5, %c0_6] : memref<158x50xf32, #tpu.memory_space<vmem>>, vector<158x50xf32>
    %c0_7 = arith.constant 0 : index
    %c0_8 = arith.constant 0 : index
    %4 = vector.load %arg3[%c0_7, %c0_8] : memref<1x600xf32, #tpu.memory_space<vmem>>, vector<1x600xf32>
    %c0_9 = arith.constant 0 : index
    %c0_10 = arith.constant 0 : index
    %5 = vector.load %arg7[%c0_9, %c0_10] : memref<1x160xf32, #tpu.memory_space<vmem>>, vector<1x160xf32>
    %c0_11 = arith.constant 0 : index
    %c0_12 = arith.constant 0 : index
    %c0_13 = arith.constant 0 : index
    %6 = vector.load %arg1[%c0_11, %c0_12, %c0_13] : memref<1x64x64xf32, #tpu.memory_space<vmem>>, vector<1x64x64xf32>
    %7 = vector.shape_cast %6 : vector<1x64x64xf32> to vector<64x64xf32>
    %8 = vector.extract_strided_slice %7 {offsets = [0, 0], sizes = [60, 64], strides = [1, 1]} : vector<64x64xf32> to vector<60x64xf32>
    %c0_14 = arith.constant 0 : index
    %c0_15 = arith.constant 0 : index
    %c0_16 = arith.constant 0 : index
    %9 = vector.load %arg2[%c0_14, %c0_15, %c0_16] : memref<5x64x600xf32, #tpu.memory_space<vmem>>, vector<1x64x600xf32>
    %10 = vector.shape_cast %9 : vector<1x64x600xf32> to vector<64x600xf32>
    %cst = arith.constant dense<0.000000e+00> : vector<60x600xf32>
    %11 = tpu.matmul %8, %10, %cst {dimension_numbers = #tpu.dot_dimension_numbers<[1], [0], [0], [1], [0, 0, 1, 1], [], []>} : vector<60x64xf32>, vector<64x600xf32>, vector<60x600xf32> -> vector<60x600xf32>
    %12 = vector.extract_strided_slice %7 {offsets = [1, 0], sizes = [60, 64], strides = [1, 1]} : vector<64x64xf32> to vector<60x64xf32>
    %c1 = arith.constant 1 : index
    %c0_17 = arith.constant 0 : index
    %c0_18 = arith.constant 0 : index
    %13 = vector.load %arg2[%c1, %c0_17, %c0_18] : memref<5x64x600xf32, #tpu.memory_space<vmem>>, vector<1x64x600xf32>
    %14 = vector.shape_cast %13 : vector<1x64x600xf32> to vector<64x600xf32>
    %cst_19 = arith.constant dense<0.000000e+00> : vector<60x600xf32>
    %15 = tpu.matmul %12, %14, %cst_19 {dimension_numbers = #tpu.dot_dimension_numbers<[1], [0], [0], [1], [0, 0, 1, 1], [], []>} : vector<60x64xf32>, vector<64x600xf32>, vector<60x600xf32> -> vector<60x600xf32>
    %16 = arith.addf %11, %15 : vector<60x600xf32>
    %17 = vector.extract_strided_slice %7 {offsets = [2, 0], sizes = [60, 64], strides = [1, 1]} : vector<64x64xf32> to vector<60x64xf32>
    %c2 = arith.constant 2 : index
    %c0_20 = arith.constant 0 : index
    %c0_21 = arith.constant 0 : index
    %18 = vector.load %arg2[%c2, %c0_20, %c0_21] : memref<5x64x600xf32, #tpu.memory_space<vmem>>, vector<1x64x600xf32>
    %19 = vector.shape_cast %18 : vector<1x64x600xf32> to vector<64x600xf32>
    %cst_22 = arith.constant dense<0.000000e+00> : vector<60x600xf32>
    %20 = tpu.matmul %17, %19, %cst_22 {dimension_numbers = #tpu.dot_dimension_numbers<[1], [0], [0], [1], [0, 0, 1, 1], [], []>} : vector<60x64xf32>, vector<64x600xf32>, vector<60x600xf32> -> vector<60x600xf32>
    %21 = arith.addf %16, %20 : vector<60x600xf32>
    %22 = vector.extract_strided_slice %7 {offsets = [3, 0], sizes = [60, 64], strides = [1, 1]} : vector<64x64xf32> to vector<60x64xf32>
    %c3 = arith.constant 3 : index
    %c0_23 = arith.constant 0 : index
    %c0_24 = arith.constant 0 : index
    %23 = vector.load %arg2[%c3, %c0_23, %c0_24] : memref<5x64x600xf32, #tpu.memory_space<vmem>>, vector<1x64x600xf32>
    %24 = vector.shape_cast %23 : vector<1x64x600xf32> to vector<64x600xf32>
    %cst_25 = arith.constant dense<0.000000e+00> : vector<60x600xf32>
    %25 = tpu.matmul %22, %24, %cst_25 {dimension_numbers = #tpu.dot_dimension_numbers<[1], [0], [0], [1], [0, 0, 1, 1], [], []>} : vector<60x64xf32>, vector<64x600xf32>, vector<60x600xf32> -> vector<60x600xf32>
    %26 = arith.addf %21, %25 : vector<60x600xf32>
    %27 = vector.extract_strided_slice %7 {offsets = [4, 0], sizes = [60, 64], strides = [1, 1]} : vector<64x64xf32> to vector<60x64xf32>
    %c4 = arith.constant 4 : index
    %c0_26 = arith.constant 0 : index
    %c0_27 = arith.constant 0 : index
    %28 = vector.load %arg2[%c4, %c0_26, %c0_27] : memref<5x64x600xf32, #tpu.memory_space<vmem>>, vector<1x64x600xf32>
    %29 = vector.shape_cast %28 : vector<1x64x600xf32> to vector<64x600xf32>
    %cst_28 = arith.constant dense<0.000000e+00> : vector<60x600xf32>
    %30 = tpu.matmul %27, %29, %cst_28 {dimension_numbers = #tpu.dot_dimension_numbers<[1], [0], [0], [1], [0, 0, 1, 1], [], []>} : vector<60x64xf32>, vector<64x600xf32>, vector<60x600xf32> -> vector<60x600xf32>
    %31 = arith.addf %26, %30 : vector<60x600xf32>
    %32 = vector.broadcast %4 : vector<1x600xf32> to vector<60x600xf32>
    %33 = arith.addf %31, %32 : vector<60x600xf32>
    %cst_29 = arith.constant 0.000000e+00 : f32
    %34 = vector.broadcast %cst_29 : f32 to vector<60x600xf32>
    %35 = arith.maximumf %33, %34 : vector<60x600xf32>
    %36 = vector.extract_strided_slice %35 {offsets = [0, 0], sizes = [58, 600], strides = [1, 1]} : vector<60x600xf32> to vector<58x600xf32>
    %37 = vector.extract_strided_slice %35 {offsets = [1, 0], sizes = [58, 600], strides = [1, 1]} : vector<60x600xf32> to vector<58x600xf32>
    %38 = arith.maximumf %36, %37 : vector<58x600xf32>
    %39 = vector.extract_strided_slice %35 {offsets = [2, 0], sizes = [58, 600], strides = [1, 1]} : vector<60x600xf32> to vector<58x600xf32>
    %40 = arith.maximumf %38, %39 : vector<58x600xf32>
    %41 = vector.extract_strided_slice %40 {offsets = [0, 0], sizes = [58, 598], strides = [1, 1]} : vector<58x600xf32> to vector<58x598xf32>
    %42 = vector.extract_strided_slice %40 {offsets = [0, 1], sizes = [58, 598], strides = [1, 1]} : vector<58x600xf32> to vector<58x598xf32>
    %43 = arith.maximumf %41, %42 : vector<58x598xf32>
    %44 = vector.extract_strided_slice %40 {offsets = [0, 2], sizes = [58, 598], strides = [1, 1]} : vector<58x600xf32> to vector<58x598xf32>
    %45 = arith.maximumf %43, %44 : vector<58x598xf32>
    %cst_30 = arith.constant dense<0.000000e+00> : vector<20x598xf32>
    %46 = tpu.matmul %0, %45, %cst_30 {dimension_numbers = #tpu.dot_dimension_numbers<[1], [0], [0], [1], [0, 0, 1, 1], [], []>} : vector<20x58xf32>, vector<58x598xf32>, vector<20x598xf32> -> vector<20x598xf32>
    %cst_31 = arith.constant dense<0.000000e+00> : vector<20x200xf32>
    %47 = tpu.matmul %46, %1, %cst_31 {dimension_numbers = #tpu.dot_dimension_numbers<[1], [0], [0], [1], [0, 0, 1, 1], [], []>} : vector<20x598xf32>, vector<598x200xf32>, vector<20x200xf32> -> vector<20x200xf32>
    %48 = vector.extract_strided_slice %47 {offsets = [0, 0], sizes = [16, 200], strides = [1, 1]} : vector<20x200xf32> to vector<16x200xf32>
    %c0_32 = arith.constant 0 : index
    %c0_33 = arith.constant 0 : index
    %c0_34 = arith.constant 0 : index
    %49 = vector.load %arg6[%c0_32, %c0_33, %c0_34] : memref<5x200x160xf32, #tpu.memory_space<vmem>>, vector<1x200x160xf32>
    %50 = vector.shape_cast %49 : vector<1x200x160xf32> to vector<200x160xf32>
    %cst_35 = arith.constant dense<0.000000e+00> : vector<16x160xf32>
    %51 = tpu.matmul %48, %50, %cst_35 {dimension_numbers = #tpu.dot_dimension_numbers<[1], [0], [0], [1], [0, 0, 1, 1], [], []>} : vector<16x200xf32>, vector<200x160xf32>, vector<16x160xf32> -> vector<16x160xf32>
    %52 = vector.extract_strided_slice %47 {offsets = [1, 0], sizes = [16, 200], strides = [1, 1]} : vector<20x200xf32> to vector<16x200xf32>
    %c1_36 = arith.constant 1 : index
    %c0_37 = arith.constant 0 : index
    %c0_38 = arith.constant 0 : index
    %53 = vector.load %arg6[%c1_36, %c0_37, %c0_38] : memref<5x200x160xf32, #tpu.memory_space<vmem>>, vector<1x200x160xf32>
    %54 = vector.shape_cast %53 : vector<1x200x160xf32> to vector<200x160xf32>
    %cst_39 = arith.constant dense<0.000000e+00> : vector<16x160xf32>
    %55 = tpu.matmul %52, %54, %cst_39 {dimension_numbers = #tpu.dot_dimension_numbers<[1], [0], [0], [1], [0, 0, 1, 1], [], []>} : vector<16x200xf32>, vector<200x160xf32>, vector<16x160xf32> -> vector<16x160xf32>
    %56 = arith.addf %51, %55 : vector<16x160xf32>
    %57 = vector.extract_strided_slice %47 {offsets = [2, 0], sizes = [16, 200], strides = [1, 1]} : vector<20x200xf32> to vector<16x200xf32>
    %c2_40 = arith.constant 2 : index
    %c0_41 = arith.constant 0 : index
    %c0_42 = arith.constant 0 : index
    %58 = vector.load %arg6[%c2_40, %c0_41, %c0_42] : memref<5x200x160xf32, #tpu.memory_space<vmem>>, vector<1x200x160xf32>
    %59 = vector.shape_cast %58 : vector<1x200x160xf32> to vector<200x160xf32>
    %cst_43 = arith.constant dense<0.000000e+00> : vector<16x160xf32>
    %60 = tpu.matmul %57, %59, %cst_43 {dimension_numbers = #tpu.dot_dimension_numbers<[1], [0], [0], [1], [0, 0, 1, 1], [], []>} : vector<16x200xf32>, vector<200x160xf32>, vector<16x160xf32> -> vector<16x160xf32>
    %61 = arith.addf %56, %60 : vector<16x160xf32>
    %62 = vector.extract_strided_slice %47 {offsets = [3, 0], sizes = [16, 200], strides = [1, 1]} : vector<20x200xf32> to vector<16x200xf32>
    %c3_44 = arith.constant 3 : index
    %c0_45 = arith.constant 0 : index
    %c0_46 = arith.constant 0 : index
    %63 = vector.load %arg6[%c3_44, %c0_45, %c0_46] : memref<5x200x160xf32, #tpu.memory_space<vmem>>, vector<1x200x160xf32>
    %64 = vector.shape_cast %63 : vector<1x200x160xf32> to vector<200x160xf32>
    %cst_47 = arith.constant dense<0.000000e+00> : vector<16x160xf32>
    %65 = tpu.matmul %62, %64, %cst_47 {dimension_numbers = #tpu.dot_dimension_numbers<[1], [0], [0], [1], [0, 0, 1, 1], [], []>} : vector<16x200xf32>, vector<200x160xf32>, vector<16x160xf32> -> vector<16x160xf32>
    %66 = arith.addf %61, %65 : vector<16x160xf32>
    %67 = vector.extract_strided_slice %47 {offsets = [4, 0], sizes = [16, 200], strides = [1, 1]} : vector<20x200xf32> to vector<16x200xf32>
    %c4_48 = arith.constant 4 : index
    %c0_49 = arith.constant 0 : index
    %c0_50 = arith.constant 0 : index
    %68 = vector.load %arg6[%c4_48, %c0_49, %c0_50] : memref<5x200x160xf32, #tpu.memory_space<vmem>>, vector<1x200x160xf32>
    %69 = vector.shape_cast %68 : vector<1x200x160xf32> to vector<200x160xf32>
    %cst_51 = arith.constant dense<0.000000e+00> : vector<16x160xf32>
    %70 = tpu.matmul %67, %69, %cst_51 {dimension_numbers = #tpu.dot_dimension_numbers<[1], [0], [0], [1], [0, 0, 1, 1], [], []>} : vector<16x200xf32>, vector<200x160xf32>, vector<16x160xf32> -> vector<16x160xf32>
    %71 = arith.addf %66, %70 : vector<16x160xf32>
    %72 = vector.broadcast %5 : vector<1x160xf32> to vector<16x160xf32>
    %73 = arith.addf %71, %72 : vector<16x160xf32>
    %cst_52 = arith.constant 0.000000e+00 : f32
    %74 = vector.broadcast %cst_52 : f32 to vector<16x160xf32>
    %75 = arith.maximumf %73, %74 : vector<16x160xf32>
    %76 = vector.extract_strided_slice %75 {offsets = [0, 0], sizes = [14, 160], strides = [1, 1]} : vector<16x160xf32> to vector<14x160xf32>
    %77 = vector.extract_strided_slice %75 {offsets = [1, 0], sizes = [14, 160], strides = [1, 1]} : vector<16x160xf32> to vector<14x160xf32>
    %78 = arith.maximumf %76, %77 : vector<14x160xf32>
    %79 = vector.extract_strided_slice %75 {offsets = [2, 0], sizes = [14, 160], strides = [1, 1]} : vector<16x160xf32> to vector<14x160xf32>
    %80 = arith.maximumf %78, %79 : vector<14x160xf32>
    %81 = vector.extract_strided_slice %80 {offsets = [0, 0], sizes = [14, 158], strides = [1, 1]} : vector<14x160xf32> to vector<14x158xf32>
    %82 = vector.extract_strided_slice %80 {offsets = [0, 1], sizes = [14, 158], strides = [1, 1]} : vector<14x160xf32> to vector<14x158xf32>
    %83 = arith.maximumf %81, %82 : vector<14x158xf32>
    %84 = vector.extract_strided_slice %80 {offsets = [0, 2], sizes = [14, 158], strides = [1, 1]} : vector<14x160xf32> to vector<14x158xf32>
    %85 = arith.maximumf %83, %84 : vector<14x158xf32>
    %cst_53 = arith.constant dense<0.000000e+00> : vector<5x158xf32>
    %86 = tpu.matmul %2, %85, %cst_53 {dimension_numbers = #tpu.dot_dimension_numbers<[1], [0], [0], [1], [0, 0, 1, 1], [], []>} : vector<5x14xf32>, vector<14x158xf32>, vector<5x158xf32> -> vector<5x158xf32>
    %cst_54 = arith.constant dense<0.000000e+00> : vector<5x50xf32>
    %87 = tpu.matmul %86, %3, %cst_54 {dimension_numbers = #tpu.dot_dimension_numbers<[1], [0], [0], [1], [0, 0, 1, 1], [], []>} : vector<5x158xf32>, vector<158x50xf32>, vector<5x50xf32> -> vector<5x50xf32>
    %c0_55 = arith.constant 0 : index
    %c0_56 = arith.constant 0 : index
    %88 = vector.load %arg11[%c0_55, %c0_56] : memref<1x100xf32, #tpu.memory_space<vmem>>, vector<1x100xf32>
    %89 = vector.extract_strided_slice %87 {offsets = [0, 0], sizes = [1, 50], strides = [1, 1]} : vector<5x50xf32> to vector<1x50xf32>
    %c0_57 = arith.constant 0 : index
    %c0_58 = arith.constant 0 : index
    %c0_59 = arith.constant 0 : index
    %90 = vector.load %arg10[%c0_57, %c0_58, %c0_59] : memref<5x50x100xf32, #tpu.memory_space<vmem>>, vector<1x50x100xf32>
    %91 = vector.shape_cast %90 : vector<1x50x100xf32> to vector<50x100xf32>
    %cst_60 = arith.constant dense<0.000000e+00> : vector<1x100xf32>
    %92 = tpu.matmul %89, %91, %cst_60 {dimension_numbers = #tpu.dot_dimension_numbers<[1], [0], [0], [1], [0, 0, 1, 1], [], []>} : vector<1x50xf32>, vector<50x100xf32>, vector<1x100xf32> -> vector<1x100xf32>
    %93 = arith.addf %88, %92 : vector<1x100xf32>
    %94 = vector.extract_strided_slice %87 {offsets = [1, 0], sizes = [1, 50], strides = [1, 1]} : vector<5x50xf32> to vector<1x50xf32>
    %c1_61 = arith.constant 1 : index
    %c0_62 = arith.constant 0 : index
    %c0_63 = arith.constant 0 : index
    %95 = vector.load %arg10[%c1_61, %c0_62, %c0_63] : memref<5x50x100xf32, #tpu.memory_space<vmem>>, vector<1x50x100xf32>
    %96 = vector.shape_cast %95 : vector<1x50x100xf32> to vector<50x100xf32>
    %cst_64 = arith.constant dense<0.000000e+00> : vector<1x100xf32>
    %97 = tpu.matmul %94, %96, %cst_64 {dimension_numbers = #tpu.dot_dimension_numbers<[1], [0], [0], [1], [0, 0, 1, 1], [], []>} : vector<1x50xf32>, vector<50x100xf32>, vector<1x100xf32> -> vector<1x100xf32>
    %98 = arith.addf %93, %97 : vector<1x100xf32>
    %99 = vector.extract_strided_slice %87 {offsets = [2, 0], sizes = [1, 50], strides = [1, 1]} : vector<5x50xf32> to vector<1x50xf32>
    %c2_65 = arith.constant 2 : index
    %c0_66 = arith.constant 0 : index
    %c0_67 = arith.constant 0 : index
    %100 = vector.load %arg10[%c2_65, %c0_66, %c0_67] : memref<5x50x100xf32, #tpu.memory_space<vmem>>, vector<1x50x100xf32>
    %101 = vector.shape_cast %100 : vector<1x50x100xf32> to vector<50x100xf32>
    %cst_68 = arith.constant dense<0.000000e+00> : vector<1x100xf32>
    %102 = tpu.matmul %99, %101, %cst_68 {dimension_numbers = #tpu.dot_dimension_numbers<[1], [0], [0], [1], [0, 0, 1, 1], [], []>} : vector<1x50xf32>, vector<50x100xf32>, vector<1x100xf32> -> vector<1x100xf32>
    %103 = arith.addf %98, %102 : vector<1x100xf32>
    %104 = vector.extract_strided_slice %87 {offsets = [3, 0], sizes = [1, 50], strides = [1, 1]} : vector<5x50xf32> to vector<1x50xf32>
    %c3_69 = arith.constant 3 : index
    %c0_70 = arith.constant 0 : index
    %c0_71 = arith.constant 0 : index
    %105 = vector.load %arg10[%c3_69, %c0_70, %c0_71] : memref<5x50x100xf32, #tpu.memory_space<vmem>>, vector<1x50x100xf32>
    %106 = vector.shape_cast %105 : vector<1x50x100xf32> to vector<50x100xf32>
    %cst_72 = arith.constant dense<0.000000e+00> : vector<1x100xf32>
    %107 = tpu.matmul %104, %106, %cst_72 {dimension_numbers = #tpu.dot_dimension_numbers<[1], [0], [0], [1], [0, 0, 1, 1], [], []>} : vector<1x50xf32>, vector<50x100xf32>, vector<1x100xf32> -> vector<1x100xf32>
    %108 = arith.addf %103, %107 : vector<1x100xf32>
    %109 = vector.extract_strided_slice %87 {offsets = [4, 0], sizes = [1, 50], strides = [1, 1]} : vector<5x50xf32> to vector<1x50xf32>
    %c4_73 = arith.constant 4 : index
    %c0_74 = arith.constant 0 : index
    %c0_75 = arith.constant 0 : index
    %110 = vector.load %arg10[%c4_73, %c0_74, %c0_75] : memref<5x50x100xf32, #tpu.memory_space<vmem>>, vector<1x50x100xf32>
    %111 = vector.shape_cast %110 : vector<1x50x100xf32> to vector<50x100xf32>
    %cst_76 = arith.constant dense<0.000000e+00> : vector<1x100xf32>
    %112 = tpu.matmul %109, %111, %cst_76 {dimension_numbers = #tpu.dot_dimension_numbers<[1], [0], [0], [1], [0, 0, 1, 1], [], []>} : vector<1x50xf32>, vector<50x100xf32>, vector<1x100xf32> -> vector<1x100xf32>
    %113 = arith.addf %108, %112 : vector<1x100xf32>
    %cst_77 = arith.constant 0.000000e+00 : f32
    %114 = vector.broadcast %cst_77 : f32 to vector<1x100xf32>
    %115 = arith.maximumf %113, %114 : vector<1x100xf32>
    %c0_78 = arith.constant 0 : index
    %c0_79 = arith.constant 0 : index
    %116 = vector.load %arg12[%c0_78, %c0_79] : memref<100x15xf32, #tpu.memory_space<vmem>>, vector<100x15xf32>
    %cst_80 = arith.constant dense<0.000000e+00> : vector<1x15xf32>
    %117 = tpu.matmul %115, %116, %cst_80 {dimension_numbers = #tpu.dot_dimension_numbers<[1], [0], [0], [1], [0, 0, 1, 1], [], []>} : vector<1x100xf32>, vector<100x15xf32>, vector<1x15xf32> -> vector<1x15xf32>
    %c0_81 = arith.constant 0 : index
    %c0_82 = arith.constant 0 : index
    %118 = vector.load %arg13[%c0_81, %c0_82] : memref<1x15xf32, #tpu.memory_space<vmem>>, vector<1x15xf32>
    %119 = arith.addf %117, %118 : vector<1x15xf32>
    %c0_83 = arith.constant 0 : index
    %c0_84 = arith.constant 0 : index
    %c0_85 = arith.constant 0 : index
    %120 = vector.load %arg14[%c0_83, %c0_84, %c0_85] : memref<1x1x15xf32, #tpu.memory_space<vmem>>, vector<1x1x15xf32>
    %121 = vector.shape_cast %120 : vector<1x1x15xf32> to vector<1x15xf32>
    %122 = vector.shape_cast %119 : vector<1x15xf32> to vector<1x1x15xf32>
    tpu.vector_store %arg14[%c0_83, %c0_84, %c0_85], %122 {strides = array<i32>} : memref<1x1x15xf32, #tpu.memory_space<vmem>>, vector<1x1x15xf32>,
    return
  }
  func.func @transform_0(%arg0: i32) -> (i32, i32, i32) {
    %c0_i32 = arith.constant 0 : i32
    %c0_i32_0 = arith.constant 0 : i32
    %c0_i32_1 = arith.constant 0 : i32
    return %arg0, %c0_i32, %c0_i32_0 : i32, i32, i32
  }
  func.func @transform_1(%arg0: i32) -> (i32, i32, i32) {
    %c0_i32 = arith.constant 0 : i32
    %c0_i32_0 = arith.constant 0 : i32
    %c0_i32_1 = arith.constant 0 : i32
    %c0_i32_2 = arith.constant 0 : i32
    return %c0_i32, %c0_i32_0, %c0_i32_1 : i32, i32, i32
  }
  func.func @transform_2(%arg0: i32) -> (i32, i32) {
    %c0_i32 = arith.constant 0 : i32
    %c0_i32_0 = arith.constant 0 : i32
    %c0_i32_1 = arith.constant 0 : i32
    return %c0_i32, %c0_i32_0 : i32, i32
  }
  func.func @transform_3(%arg0: i32) -> (i32, i32) {
    %c0_i32 = arith.constant 0 : i32
    %c0_i32_0 = arith.constant 0 : i32
    %c0_i32_1 = arith.constant 0 : i32
    return %c0_i32, %c0_i32_0 : i32, i32
  }
  func.func @transform_4(%arg0: i32) -> (i32, i32) {
    %c0_i32 = arith.constant 0 : i32
    %c0_i32_0 = arith.constant 0 : i32
    %c0_i32_1 = arith.constant 0 : i32
    return %c0_i32, %c0_i32_0 : i32, i32
  }
  func.func @transform_5(%arg0: i32) -> (i32, i32, i32) {
    %c0_i32 = arith.constant 0 : i32
    %c0_i32_0 = arith.constant 0 : i32
    %c0_i32_1 = arith.constant 0 : i32
    %c0_i32_2 = arith.constant 0 : i32
    return %c0_i32, %c0_i32_0, %c0_i32_1 : i32, i32, i32
  }
  func.func @transform_6(%arg0: i32) -> (i32, i32) {
    %c0_i32 = arith.constant 0 : i32
    %c0_i32_0 = arith.constant 0 : i32
    %c0_i32_1 = arith.constant 0 : i32
    return %c0_i32, %c0_i32_0 : i32, i32
  }
  func.func @transform_7(%arg0: i32) -> (i32, i32) {
    %c0_i32 = arith.constant 0 : i32
    %c0_i32_0 = arith.constant 0 : i32
    %c0_i32_1 = arith.constant 0 : i32
    return %c0_i32, %c0_i32_0 : i32, i32
  }
  func.func @transform_8(%arg0: i32) -> (i32, i32) {
    %c0_i32 = arith.constant 0 : i32
    %c0_i32_0 = arith.constant 0 : i32
    %c0_i32_1 = arith.constant 0 : i32
    return %c0_i32, %c0_i32_0 : i32, i32
  }
  func.func @transform_9(%arg0: i32) -> (i32, i32, i32) {
    %c0_i32 = arith.constant 0 : i32
    %c0_i32_0 = arith.constant 0 : i32
    %c0_i32_1 = arith.constant 0 : i32
    %c0_i32_2 = arith.constant 0 : i32
    return %c0_i32, %c0_i32_0, %c0_i32_1 : i32, i32, i32
  }
  func.func @transform_10(%arg0: i32) -> (i32, i32) {
    %c0_i32 = arith.constant 0 : i32
    %c0_i32_0 = arith.constant 0 : i32
    %c0_i32_1 = arith.constant 0 : i32
    return %c0_i32, %c0_i32_0 : i32, i32
  }
  func.func @transform_11(%arg0: i32) -> (i32, i32) {
    %c0_i32 = arith.constant 0 : i32
    %c0_i32_0 = arith.constant 0 : i32
    %c0_i32_1 = arith.constant 0 : i32
    return %c0_i32, %c0_i32_0 : i32, i32
  }
  func.func @transform_12(%arg0: i32) -> (i32, i32) {
    %c0_i32 = arith.constant 0 : i32
    %c0_i32_0 = arith.constant 0 : i32
    %c0_i32_1 = arith.constant 0 : i32
    return %c0_i32, %c0_i32_0 : i32, i32
  }
  func.func @transform_13(%arg0: i32) -> (i32, i32, i32) {
    %c0_i32 = arith.constant 0 : i32
    %c0_i32_0 = arith.constant 0 : i32
    %c0_i32_1 = arith.constant 0 : i32
    return %arg0, %c0_i32, %c0_i32_0 : i32, i32, i32
  }
}

</mosaic_0001>

<bundles_post_ra>
// kernel: simple_net_forward.1
= control target key start
LH: loop header
LB: loop body
LE: loop exit
PB: predicated region body
PF: predicated region fallthrough
CT: control target
= control target key end

     0   :  { %18 = vsyncpa [#allocation3], 0  ;;  %s11815_s0 = inlined_call_operand.vmem [shape: f32[2,64,64], index: 0, kind: input, shape index: {}]   ;;  %s11816_s1 = inlined_call_operand.vmem [shape: f32[5,64,600], index: 1, kind: input, shape index: {}]   ;;  %s11817_s2 = inlined_call_operand.vmem [shape: f32[1,600], index: 2, kind: input, shape index: {}]   ;;  %s11818_s3 = inlined_call_operand.vmem [shape: f32[20,58], index: 3, kind: input, shape index: {}]   ;;  %s11819_s4 = inlined_call_operand.vmem [shape: f32[598,200], index: 4, kind: input, shape index: {}]   ;;  %s11820_s5 = inlined_call_operand.vmem [shape: f32[5,200,160], index: 5, kind: input, shape index: {}]   ;;  %s11821_s6 = inlined_call_operand.vmem [shape: f32[1,160], index: 6, kind: input, shape index: {}]   ;;  %s11822_s7 = inlined_call_operand.vmem [shape: f32[5,14], index: 7, kind: input, shape index: {}]   ;;  %s11823_s8 = inlined_call_operand.vmem [shape: f32[158,50], index: 8, kind: input, shape index: {}]   ;;  %s11824_s9 = inlined_call_operand.vmem [shape: f32[5,50,100], index: 9, kind: input, shape index: {}]   ;;  %s11825_s10 = inlined_call_operand.vmem [shape: f32[1,100], index: 10, kind: input, shape index: {}]   ;;  %s11826_s11 = inlined_call_operand.vmem [shape: f32[100,15], index: 11, kind: input, shape index: {}]   ;;  %s11827_s12 = inlined_call_operand.vmem [shape: f32[1,15], index: 12, kind: input, shape index: {}]   ;;  %s11828_s13 = inlined_call_operand.hbm [shape: f32[2,1,15], index: 13, kind: output, shape index: {}]  }
   0x1   :  { %20 = vsyncpa [#allocation3 + $0x1], 0  ;;  %s8104_s25 = smov 0   ;;  %s8106_s26 = smov 0  }
   0x2   :  { %s8108_s27 = smov 0   ;;  %s8110_s28 = smov 0  }
   0x3 LB: > { %11876 = sst [smem:[#allocation5_spill]] %s8021_s27  ;;  %s8125_s29 = sadd.s32 4294967295, %s8025_s28   ;;  %s8025_s28 = sphi %s8110_s28, %s11935_s28   ;;  %s8021_s27 = sphi %s8108_s27, %s11937_s27   ;;  %s8017_s26 = sphi %s8106_s26, %s11939_s26   ;;  %s8013_s25 = sphi %s8104_s25, %s11938_s25  }
   0x4   : > { %s5736_s30 = sadd.s32 4294967294, %s8025_s28   ;;  %s8129_s14 = sadd.s32 1, %s8025_s28  }
   0x5   : > { %11877 = sst [smem:[#allocation6_spill]] %s8129_s14  ;;  %s311_s15 = sadd.s32 1, %s8021_s27 }
   0x6   : > { %s308_s16 = ssub.s32 %s8025_s28, %s8129_s14  ;;  %p321_p0 = scmp.ne.s32.totalorder %s8021_s27, %s8017_s26 }
   0x7   : > { %p309_p1 = scmp.eq.s32.totalorder %s308_s16, 0  ;;  %p322_p2 = scmp.eq.s32.totalorder %s8125_s29, 1 }
   0x8   : > { %p327_p3 = scmp.ne.s32.totalorder %s8017_s26, %s8013_s25  ;;  %p328_p4 = scmp.eq.s32.totalorder %s5736_s30, 1 }
   0x9   : > { %s8140_s17 = scalar_select %p309_p1, %s8021_s27, %s311_s15  }
   0xa   : > { %p8142_p5 = por %p322_p2, %p321_p0  ;;  %p8146_p6 = por %p328_p4, %p327_p3 }
   0xb   : > { %11878 = sst [smem:[#allocation7_spill]] %s8140_s17  ;;  %p5739_p7 = scmp.ge.s32.totalorder %s8025_s28, 1 }
   0xc   : > { %s11880_s19 = scalar_select %p8146_p6, 1, 0 }
   0xd   : > { %p390_p8 = scmp.lt.s32.totalorder %s8025_s28, 3 }
   0xe   : > { %11881 = sst [smem:[#allocation8_spill]] %s11880_s19 }
   0xf   : > { %p391_p9 = pnand %p5739_p7, %p390_p8 }
  0x11   : > { %394 = sbr.rel (%p391_p9) target bundleno = 2650 (0xa5a), region = 72 }
  0x18   : > { %v5743_v0 = vld [vmem:[%s11816_s1 + $0x148] sm:$0xff]  ;;  %v5748_v1 = vld [vmem:[%s11816_s1 + $0x170] sm:$0xff]  ;;  %v5745_v2 = vld [vmem:[%s11816_s1 + $0x158] sm:$0xff]  ;;  %p433_p10 = scmp.lt.s32.totalorder %s8125_s29, 1  ;;  %v11835_v7 = vmov 0.0   ;;  %vm711_vm0 = vcmask 1046528  }
  0x19   : > { %v6724_v3 = vpack.c.bf16 %v5748_v1, %v5743_v0  ;;  %v5750_v4 = vld [vmem:[%s11816_s1 + $0x180] sm:$0xff]  ;;  %v5747_v6 = vld [vmem:[%s11816_s1 + $0x168] sm:$0xff]  ;;  %808 = vmatprep.mubr.f32.mxu0 %v11835_v7  ;;  %921 = vmatprep.mubr.f32.mxu1 %v11835_v7  ;;  %v5744_v10 = vld [vmem:[%s11816_s1 + $0x150] sm:$0xff]  ;;  %vm727_vm1 = vcmask 523264   ;;  %vm1463_vm2 = vcmask 1045504   ;;  %vm1907_vm3 = vcmask 1044480  }
  0x1a   : > { %v5742_v5 = vld [vmem:[%s11816_s1 + $0x140] sm:$0xff]  ;;  %v6740_v8 = vpack.c.bf16 %v5750_v4, %v5745_v2  ;;  %v5749_v11 = vld [vmem:[%s11816_s1 + $0x178] sm:$0xff]  ;;  %s8183_s15 = scalar_select %p433_p10, %s8125_s29, 1  ;;  %v5755_v15 = vld [vmem:[%s11816_s1 + $0x1a8] sm:$0xff]  ;;  %vm2351_vm4 = vcmask 1043456   ;;  %vm3330_vm5 = vcmask 1039360  }
  0x1b   : > { %v6726_v9 = vpack.c.bf16 %v5747_v6, %v5742_v5  ;;  %v5753_v12 = vld [vmem:[%s11816_s1 + $0x198] sm:$0xff]  ;;  %6725 = vmatprep.subr.bf16.mxu0 %v6724_v3  ;;  %v6742_v13 = vpack.c.bf16 %v5749_v11, %v5744_v10  ;;  %v5758_v14 = vld [vmem:[%s11816_s1 + $0x1c0] sm:$0xff]  ;;  %v5760_v16 = vld [vmem:[%s11816_s1 + $0x1d0] sm:$0xff]  ;;  %s11872_s20 = smov 126   ;;  %s11874_s22 = smov 127   ;;  %vm3523_vm6 = vcmask 1031168  }
  0x1c   : > { %6741 = vmatprep.subr.bf16.mxu1 %v6740_v8  ;;  %v6728_v17 = vpack.c.bf16 %v5758_v14, %v5753_v12  ;;  %v6744_v18 = vpack.c.bf16 %v5760_v16, %v5755_v15  ;;  %v5752_v19 = vld [vmem:[%s11816_s1 + $0x190] sm:$0xff]  ;;  %v5757_v20 = vld [vmem:[%s11816_s1 + $0x1b8] sm:$0xff]  ;;  %v5754_v21 = vld [vmem:[%s11816_s1 + $0x1a0] sm:$0xff]  ;;  %s6299_s21 = sshll.u32 %s8183_s15, 6  ;;  %vm3646_vm7 = vcmask 1041408   ;;  %vm8030_vm8 = vmmov 1  }
  0x1d   : > { %6727 = vmatpush1.bf16.msra.mxu0 %v6726_v9  ;;  %6743 = vmatpush1.bf16.msra.mxu1 %v6742_v13  ;;  %v6730_v22 = vpack.c.bf16 %v5757_v20, %v5752_v19  ;;  %v5759_v23 = vld [vmem:[%s11816_s1 + $0x1c8] sm:$0xff]  ;;  %v5768_v25 = vld [vmem:[%s11816_s1 + $0x210] sm:$0xff]  ;;  %v5765_v28 = vld [vmem:[%s11816_s1 + $0x1f8] sm:$0xff]  ;;  %s8234_s16 = scalar_lea.vmem %s11815_s0, %s6299_s21  ;;  %vm3636_vm10 = vcmask 474112   ;;  %vm8032_vm11 = vmmov 0   ;;  %vm3908_vm12 = vcmask 703488  }
  0x1e   : > { %v5763_v24 = vld [vmem:[%s11816_s1 + $0x1e8] sm:$0xff]  ;;  %6729 = vmatprep.subr.bf16.mxu0 %v6728_v17  ;;  %6745 = vmatprep.subr.bf16.mxu1 %v6744_v18  ;;  %v6746_v26 = vpack.c.bf16 %v5759_v23, %v5754_v21  ;;  %v5770_v29 = vld [vmem:[%s11816_s1 + $0x220] sm:$0xff]  ;;  %v5764_v33 = vld [vmem:[%s11816_s1 + $0x1f0] sm:$0xff]  ;;  %vm4292_vm13 = vcmask 588800   ;;  %s11932_s23 = smov 127   ;;  %s11933_s17 = smov 126  }
  0x1f   : > { %v6732_v27 = vpack.c.bf16 %v5768_v25, %v5763_v24  ;;  %v5762_v30 = vld [vmem:[%s11816_s1 + $0x1e0] sm:$0xff]  ;;  %v6748_v31 = vpack.c.bf16 %v5770_v29, %v5765_v28  ;;  %v5767_v32 = vld [vmem:[%s11816_s1 + $0x208] sm:$0xff]  ;;  %v5769_v34 = vld [vmem:[%s11816_s1 + $0x218] sm:$0xff]  ;;  %vm4990_vm15 = vcmask 113664   ;;  %s6296_s24 = sshll.u32 %s8125_s29, 4  ;;  %s8033_s29 = smov [#allocation2]  }
  0x20   : > { %v6734_v35 = vpack.c.bf16 %v5767_v32, %v5762_v30  ;;  %v5773_v36 = vld [vmem:[%s11816_s1 + $0x238] sm:$0xff]  ;;  %v5778_v37 = vld [vmem:[%s11816_s1 + $0x260] sm:$0xff]  ;;  %v5775_v38 = vld [vmem:[%s11816_s1 + $0x248] sm:$0xff]  ;;  %v6750_v39 = vpack.c.bf16 %v5769_v34, %v5764_v33 }
  0x21   : > { %6731 = vmatpush1.bf16.msra.mxu0 %v6730_v22  ;;  %6747 = vmatpush1.bf16.msra.mxu1 %v6746_v26  ;;  %v6736_v40 = vpack.c.bf16 %v5778_v37, %v5773_v36  ;;  %v5780_v41 = vld [vmem:[%s11816_s1 + $0x270] sm:$0xff]  ;;  %v5777_v43 = vld [vmem:[%s11816_s1 + $0x258] sm:$0xff]  ;;  %v5774_v45 = vld [vmem:[%s11816_s1 + $0x240] sm:$0xff] }
  0x22   : > { %6733 = vmatprep.subr.bf16.mxu0 %v6732_v27  ;;  %v5772_v42 = vld [vmem:[%s11816_s1 + $0x230] sm:$0xff]  ;;  %6749 = vmatprep.subr.bf16.mxu1 %v6748_v31  ;;  %v6752_v44 = vpack.c.bf16 %v5780_v41, %v5775_v38  ;;  %v5779_v46 = vld [vmem:[%s11816_s1 + $0x268] sm:$0xff]  ;;  %v8261_v47 = vld [vmem:[%s8234_s16] sm:$0xff] }
  0x23   : > { %v8264_v48 = vld [vmem:[%s8234_s16 + $0x8] sm:$0xff]  ;;  %v5746_v49 = vld [vmem:[%s11816_s1 + $0x160] sm:$0xff]  ;;  %v6738_v50 = vpack.c.bf16 %v5777_v43, %v5772_v42  ;;  %v712_v51 = vrot.slane %v8261_v47, 1  ;;  %v6754_v54 = vpack.c.bf16 %v5779_v46, %v5774_v45  ;;  %v8275_v55 = vld [vmem:[%s8234_s16 + $0x10] sm:$0xff] }
  0x24   : > { %v713_v52 = vrot.slane %v8264_v48, 1  ;;  %v5751_v53 = vld [vmem:[%s11816_s1 + $0x188] sm:$0xff]  ;;  %v5756_v57 = vld [vmem:[%s11816_s1 + $0x1b0] sm:$0xff]  ;;  %v625_v58 = vld [vmem:[%s11816_s1 + $0x18] sm:$0xff]  ;;  %v715_v1 = vrot.slane %v8275_v55, 1 }
  0x25   : > { %6735 = vmatpush1.bf16.msra.mxu0 %v6734_v35  ;;  %6751 = vmatpush1.bf16.msra.mxu1 %v6750_v39  ;;  %v6756_v56 = vpack.c.bf16 %v5751_v53, %v5746_v49  ;;  %v630_v59 = vld [vmem:[%s11816_s1 + $0x40] sm:$0xff]  ;;  %v5761_v60 = vld [vmem:[%s11816_s1 + $0x1d8] sm:$0xff]  ;;  %v624_v62 = vld [vmem:[%s11816_s1 + $0x10] sm:$0xff] }
  0x26   : > { %6737 = vmatprep.subr.bf16.mxu0 %v6736_v40  ;;  %6753 = vmatprep.subr.bf16.mxu1 %v6752_v44  ;;  %v6788_v61 = vpack.c.bf16 %v630_v59, %v625_v58  ;;  %v629_v63 = vld [vmem:[%s11816_s1 + $0x38] sm:$0xff]  ;;  %v8296_v0 = vsel %vm711_vm0, %v712_v51, %v713_v52  ;;  %v635_v2 = vld [vmem:[%s11816_s1 + $0x68] sm:$0xff]  ;;  %v640_v3 = vld [vmem:[%s11816_s1 + $0x90] sm:$0xff]  ;;  %v6760_v5 = vpack.c.bf16 %v5761_v60, %v5756_v57 }
  0x27   : > { %v8306_v4 = vld [vmem:[%s8234_s16 + $0x18] sm:$0xff]  ;;  %v6790_v6 = vpack.c.bf16 %v629_v63, %v624_v62  ;;  %v5766_v8 = vld [vmem:[%s11816_s1 + $0x200] sm:$0xff]  ;;  %v5771_v9 = vld [vmem:[%s11816_s1 + $0x228] sm:$0xff]  ;;  %v6792_v10 = vpack.c.bf16 %v640_v3, %v635_v2  ;;  %v8326_v13 = vsel %vm711_vm0, %v713_v52, %v715_v1 }
  0x28   : > { %v634_v11 = vld [vmem:[%s11816_s1 + $0x60] sm:$0xff]  ;;  %v639_v12 = vld [vmem:[%s11816_s1 + $0x88] sm:$0xff]  ;;  %v717_v14 = vrot.slane %v8306_v4, 1  ;;  %v645_v15 = vld [vmem:[%s11816_s1 + $0xb8] sm:$0xff]  ;;  %v6764_v18 = vpack.c.bf16 %v5771_v9, %v5766_v8 }
  0x29   : > { %6739 = vmatpush1.bf16.msra.mxu0 %v6738_v50  ;;  %6755 = vmatpush1.bf16.msra.mxu1 %v6754_v54  ;;  %v650_v16 = vld [vmem:[%s11816_s1 + $0xe0] sm:$0xff]  ;;  %v6794_v19 = vpack.c.bf16 %v639_v12, %v634_v11  ;;  %v644_v20 = vld [vmem:[%s11816_s1 + $0xb0] sm:$0xff]  ;;  %v649_v22 = vld [vmem:[%s11816_s1 + $0xd8] sm:$0xff] }
  0x2a   : > { %6757 = vmatprep.subr.bf16.mxu0 %v6756_v56  ;;  %6789 = vmatprep.subr.bf16.mxu1 %v6788_v61  ;;  %v8337_v17 = vld [vmem:[%s8234_s16 + $0x20] sm:$0xff]  ;;  %v6796_v21 = vpack.c.bf16 %v650_v16, %v645_v15  ;;  %v5776_v23 = vld [vmem:[%s11816_s1 + $0x250] sm:$0xff]  ;;  %v5781_v24 = vld [vmem:[%s11816_s1 + $0x278] sm:$0xff]  ;;  %v8357_v25 = vsel %vm711_vm0, %v715_v1, %v717_v14  ;;  %v6798_v30 = vpack.c.bf16 %v649_v22, %v644_v20 }
  0x2b   : > { %v719_v26 = vrot.slane %v8337_v17, 1  ;;  %v655_v27 = vld [vmem:[%s11816_s1 + $0x108] sm:$0xff]  ;;  %v660_v28 = vld [vmem:[%s11816_s1 + $0x130] sm:$0xff]  ;;  %v6768_v31 = vpack.c.bf16 %v5781_v24, %v5776_v23  ;;  %v654_v32 = vld [vmem:[%s11816_s1 + $0x100] sm:$0xff] }
  0x2c   : > { %5782 = vmatmul.mubr.msk.f32.vlgmr.msra.gmra.mrb[0].mxu0 %vm727_vm1, %v8296_v0  ;;  %5790 = vmatmul.mubr.msk.f32.vlgmr.msra.gmra.mrb[0].mxu1 %vm727_vm1, %v8296_v0  ;;  %v8368_v29 = vld [vmem:[%s8234_s16 + $0x28] sm:$0xff]  ;;  %v6800_v33 = vpack.c.bf16 %v660_v28, %v655_v27  ;;  %v628_v36 = vld [vmem:[%s11816_s1 + $0x30] sm:$0xff]  ;;  %v5833_v39 = vld [vmem:[%s11816_s1 + $0x298] sm:$0xff] }
  0x2d   : > { %814 = vmatprep.mubr.f32.mxu0 %v11835_v7  ;;  %927 = vmatprep.mubr.f32.mxu1 %v11835_v7  ;;  %v659_v34 = vld [vmem:[%s11816_s1 + $0x128] sm:$0xff]  ;;  %v8388_v37 = vsel %vm711_vm0, %v717_v14, %v719_v26  ;;  %v721_v38 = vrot.slane %v8368_v29, 1  ;;  %v5838_v40 = vld [vmem:[%s11816_s1 + $0x2c0] sm:$0xff]  ;;  %v8399_v41 = vld [vmem:[%s8234_s16 + $0x30] sm:$0xff] }
  0x2e   : > { %6759 = vmatpush3.bf16.msra.mxu0 %v6756_v56  ;;  %6791 = vmatpush1.bf16.msra.mxu1 %v6790_v6  ;;  %v623_v35 = vld [vmem:[%s11816_s1 + $0x8] sm:$0xff]  ;;  %v6802_v42 = vpack.c.bf16 %v659_v34, %v654_v32  ;;  %v6836_v44 = vpack.c.bf16 %v5838_v40, %v5833_v39  ;;  %v723_v46 = vrot.slane %v8399_v41, 1  ;;  %v8412_v49 = vld [vmem:[%s8234_s16 + $0x38] sm:$0xff]  ;;  %v622_v53 = vld [vmem:[%s11816_s1] sm:$0xff] }
  0x2f   : > { %6761 = vmatprep.subr.bf16.mxu0 %v6760_v5  ;;  %6793 = vmatprep.subr.bf16.mxu1 %v6792_v10  ;;  %v6772_v43 = vpack.c.bf16 %v628_v36, %v623_v35  ;;  %v8407_v45 = vsel %vm711_vm0, %v719_v26, %v721_v38  ;;  %v8423_v51 = vrot.slane %v8412_v49, 1  ;;  %v627_v54 = vld [vmem:[%s11816_s1 + $0x28] sm:$0xff]  ;;  %v633_v56 = vld [vmem:[%s11816_s1 + $0x58] sm:$0xff]  ;;  %v638_v57 = vld [vmem:[%s11816_s1 + $0x80] sm:$0xff] }
  0x30   : > { %5783 = vmatmul.mubr.msk.f32.gmra.mrb[2].mxu0 %vm727_vm1, %v8326_v13  ;;  %5791 = vmatmul.mubr.msk.f32.gmra.mrb[2].mxu1 %vm727_vm1, %v8326_v13  ;;  %v8420_v50 = vsel %vm711_vm0, %v721_v38, %v723_v46  ;;  %v5832_v58 = vld [vmem:[%s11816_s1 + $0x290] sm:$0xff]  ;;  %v5837_v59 = vld [vmem:[%s11816_s1 + $0x2b8] sm:$0xff]  ;;  %v6774_v60 = vpack.c.bf16 %v627_v54, %v622_v53  ;;  %v5843_v61 = vld [vmem:[%s11816_s1 + $0x2e8] sm:$0xff] }
  0x31   : > { %820 = vmatprep.mubr.f32.mxu0 %v11835_v7  ;;  %933 = vmatprep.mubr.f32.mxu1 %v11835_v7  ;;  %v8433_v52 = vsel %vm711_vm0, %v723_v46, %v8423_v51  ;;  %v5848_v62 = vld [vmem:[%s11816_s1 + $0x310] sm:$0xff]  ;;  %v637_v1 = vld [vmem:[%s11816_s1 + $0x78] sm:$0xff]  ;;  %v643_v2 = vld [vmem:[%s11816_s1 + $0xa8] sm:$0xff]  ;;  %v6838_v3 = vpack.c.bf16 %v5837_v59, %v5832_v58  ;;  %v1464_v58 = vrot.slane %v8261_v47, 2  ;;  %v1465_v59 = vrot.slane %v8264_v48, 2 }
  0x32   : > { %6763 = vmatpush3.bf16.msra.mxu0 %v6760_v5  ;;  %6795 = vmatpush1.bf16.msra.mxu1 %v6794_v19  ;;  %v632_v63 = vld [vmem:[%s11816_s1 + $0x50] sm:$0xff]  ;;  %v6840_v6 = vpack.c.bf16 %v5848_v62, %v5843_v61  ;;  %v5842_v8 = vld [vmem:[%s11816_s1 + $0x2e0] sm:$0xff]  ;;  %v5847_v9 = vld [vmem:[%s11816_s1 + $0x308] sm:$0xff] }
  0x33   : > { %6765 = vmatprep.subr.bf16.mxu0 %v6764_v18  ;;  %6797 = vmatprep.subr.bf16.mxu1 %v6796_v21  ;;  %v648_v5 = vld [vmem:[%s11816_s1 + $0xd0] sm:$0xff]  ;;  %v6778_v10 = vpack.c.bf16 %v637_v1, %v632_v63  ;;  %v5853_v11 = vld [vmem:[%s11816_s1 + $0x338] sm:$0xff]  ;;  %v5858_v12 = vld [vmem:[%s11816_s1 + $0x360] sm:$0xff] }
  0x34   : > { %5784 = vmatmul.mubr.msk.f32.gmra.mrb[4].mxu0 %vm727_vm1, %v8357_v25  ;;  %5792 = vmatmul.mubr.msk.f32.gmra.mrb[4].mxu1 %vm727_vm1, %v8357_v25  ;;  %v647_v14 = vld [vmem:[%s11816_s1 + $0xc8] sm:$0xff]  ;;  %v6780_v15 = vpack.c.bf16 %v648_v5, %v643_v2  ;;  %v653_v16 = vld [vmem:[%s11816_s1 + $0xf8] sm:$0xff]  ;;  %v658_v19 = vld [vmem:[%s11816_s1 + $0x120] sm:$0xff]  ;;  %v6844_v20 = vpack.c.bf16 %v5858_v12, %v5853_v11  ;;  %v1467_v2 = vrot.slane %v8275_v55, 2  ;;  %v1469_v12 = vrot.slane %v8306_v4, 2 }
  0x35   : > { %826 = vmatprep.mubr.f32.mxu0 %v11835_v7  ;;  %939 = vmatprep.mubr.f32.mxu1 %v11835_v7  ;;  %v5852_v21 = vld [vmem:[%s11816_s1 + $0x330] sm:$0xff]  ;;  %v5857_v22 = vld [vmem:[%s11816_s1 + $0x358] sm:$0xff]  ;;  %v5863_v24 = vld [vmem:[%s11816_s1 + $0x388] sm:$0xff]  ;;  %v6784_v28 = vpack.c.bf16 %v658_v19, %v653_v16 }
  0x36   : > { %6767 = vmatpush3.bf16.msra.mxu0 %v6764_v18  ;;  %6799 = vmatpush1.bf16.msra.mxu1 %v6798_v30  ;;  %v6842_v18 = vpack.c.bf16 %v5847_v9, %v5842_v8  ;;  %v652_v26 = vld [vmem:[%s11816_s1 + $0xf0] sm:$0xff]  ;;  %v657_v27 = vld [vmem:[%s11816_s1 + $0x118] sm:$0xff]  ;;  %v626_v30 = vld [vmem:[%s11816_s1 + $0x20] sm:$0xff]  ;;  %v8657_v11 = vsel %vm1463_vm2, %v1465_v59, %v1467_v2 }
  0x37   : > { %6769 = vmatprep.subr.bf16.mxu0 %v6768_v31  ;;  %6801 = vmatprep.subr.bf16.mxu1 %v6800_v33  ;;  %v631_v32 = vld [vmem:[%s11816_s1 + $0x48] sm:$0xff]  ;;  %v5862_v34 = vld [vmem:[%s11816_s1 + $0x380] sm:$0xff]  ;;  %v6786_v36 = vpack.c.bf16 %v657_v27, %v652_v26  ;;  %v661_v53 = vld [vmem:[%s11816_s1 + $0x138] sm:$0xff] }
  0x38   : > { %5785 = vmatmul.mubr.msk.f32.gmra.mrb[6].mxu0 %vm727_vm1, %v8388_v37  ;;  %5793 = vmatmul.mubr.msk.f32.gmra.mrb[6].mxu1 %vm727_vm1, %v8388_v37  ;;  %v5867_v35 = vld [vmem:[%s11816_s1 + $0x3a8] sm:$0xff]  ;;  %v5902_v38 = vld [vmem:[%s11816_s1 + $0x400] sm:$0xff]  ;;  %v6804_v39 = vpack.c.bf16 %v631_v32, %v626_v30  ;;  %v5896_v61 = vld [vmem:[%s11816_s1 + $0x3d0] sm:$0xff]  ;;  %v1473_v30 = vrot.slane %v8368_v29, 2 }
  0x39   : > { %832 = vmatprep.mubr.f32.mxu0 %v11835_v7  ;;  %945 = vmatprep.mubr.f32.mxu1 %v11835_v7  ;;  %v6850_v40 = vpack.c.bf16 %v5867_v35, %v5862_v34  ;;  %v646_v46 = vld [vmem:[%s11816_s1 + $0xc0] sm:$0xff]  ;;  %v5901_v62 = vld [vmem:[%s11816_s1 + $0x3f8] sm:$0xff]  ;;  %v5907_v63 = vld [vmem:[%s11816_s1 + $0x428] sm:$0xff] }
  0x3a   : > { %6771 = vmatpush3.bf16.msra.mxu0 %v6768_v31  ;;  %6803 = vmatpush1.bf16.msra.mxu1 %v6802_v42  ;;  %v6846_v31 = vpack.c.bf16 %v5857_v22, %v5852_v21  ;;  %v636_v42 = vld [vmem:[%s11816_s1 + $0x70] sm:$0xff]  ;;  %v5911_v8 = vld [vmem:[%s11816_s1 + $0x448] sm:$0xff]  ;;  %v5917_v9 = vld [vmem:[%s11816_s1 + $0x478] sm:$0xff]  ;;  %v1471_v21 = vrot.slane %v8337_v17, 2 }
  0x3b   : > { %6773 = vmatprep.subr.bf16.mxu0 %v6772_v43  ;;  %6837 = vmatprep.subr.bf16.mxu1 %v6836_v44  ;;  %v641_v43 = vld [vmem:[%s11816_s1 + $0x98] sm:$0xff]  ;;  %v5912_v1 = vld [vmem:[%s11816_s1 + $0x450] sm:$0xff]  ;;  %v5966_v27 = vld [vmem:[%s11816_s1 + $0x540] sm:$0xff] }
  0x3c   : > { %5786 = vmatmul.mubr.msk.f32.gmra.mrb[8].mxu0 %vm727_vm1, %v8407_v45  ;;  %5794 = vmatmul.mubr.msk.f32.gmra.mrb[8].mxu1 %vm727_vm1, %v8407_v45  ;;  %v6888_v5 = vpack.c.bf16 %v5912_v1, %v5907_v63  ;;  %v5921_v16 = vld [vmem:[%s11816_s1 + $0x498] sm:$0xff]  ;;  %v5932_v19 = vld [vmem:[%s11816_s1 + $0x4f0] sm:$0xff]  ;;  %v5835_v32 = vld [vmem:[%s11816_s1 + $0x2a8] sm:$0xff] }
  0x3d   : > { %838 = vmatprep.mubr.f32.mxu0 %v11835_v7  ;;  %951 = vmatprep.mubr.f32.mxu1 %v11835_v7  ;;  %v5961_v26 = vld [vmem:[%s11816_s1 + $0x518] sm:$0xff]  ;;  %v5834_v63 = vld [vmem:[%s11816_s1 + $0x2a0] sm:$0xff]  ;;  %v5839_v1 = vld [vmem:[%s11816_s1 + $0x2c8] sm:$0xff] }
  0x3e   : > { %v6932_v34 = vpack.c.bf16 %v5966_v27, %v5961_v26  ;;  %v5841_v35 = vld [vmem:[%s11816_s1 + $0x2d8] sm:$0xff]  ;;  %v5986_v27 = vld [vmem:[%s11816_s1 + $0x5e0] sm:$0xff]  ;;  %vm9878_vm9 = vmpackc.low %vm3646_vm7, %vm8030_vm8 }
  0x3f   : > { %v5981_v26 = vld [vmem:[%s11816_s1 + $0x5b8] sm:$0xff]  ;;  %vm7402_vm14 = vmpackc.low %vm1463_vm2, %vm8030_vm8 }
  0x40   : > { %5787 = vmatmul.mubr.msk.f32.gmra.mrb[10].mxu0 %vm727_vm1, %v8420_v50  ;;  %5795 = vmatmul.mubr.msk.f32.gmra.mrb[10].mxu1 %vm727_vm1, %v8420_v50 }
  0x41   : > { %844 = vmatprep.mubr.f32.mxu0 %v11835_v7  ;;  %957 = vmatprep.mubr.f32.mxu1 %v11835_v7 }
  0x44   : > { %5788 = vmatmul.mubr.msk.f32.gmra.mrb[12].mxu0 %vm727_vm1, %v8433_v52  ;;  %5796 = vmatmul.mubr.msk.f32.gmra.mrb[12].mxu1 %vm727_vm1, %v8433_v52 }
  0x45   : > { %850 = vmatprep.mubr.f32.mxu0 %v11835_v7  ;;  %963 = vmatprep.mubr.f32.mxu1 %v11835_v7 }
  0x48   : > { %5789 = vmatmul.mubr.msk.f32.gmra.mrb[14].mxu0 %vm727_vm1, %v8423_v51  ;;  %5797 = vmatmul.mubr.msk.f32.gmra.mrb[14].mxu1 %vm727_vm1, %v8423_v51 }
  0x49   : > { %6461 = vmatprep.mubr.msk.f32.mxu0 %vm727_vm1, %v8296_v0  ;;  %1268 = vmatprep.mubr.f32.mxu1 %v11835_v7  ;;  %v6776_v0 = vpack.c.bf16 %v638_v57, %v633_v56  ;;  %v5831_v56 = vld [vmem:[%s11816_s1 + $0x288] sm:$0xff]  ;;  %v5836_v57 = vld [vmem:[%s11816_s1 + $0x2b0] sm:$0xff] }
  0x4c   : > { %6462 = vmatmul.mubr.msk.f32.vlgmr.msra.gmra.mrb[16].mxu0 %vm727_vm1, %v8326_v13  ;;  %5814 = vmatmul.mubr.msk.f32.vlgmr.msra.gmra.mrb[0].mxu1 %vm727_vm1, %v8261_v47  ;;  %v642_v13 = vld [vmem:[%s11816_s1 + $0xa0] sm:$0xff] }
  0x4d   : > { %6775 = vmatpush1.bf16.msra.mxu0 %v6774_v60  ;;  %6464 = vmatprep.mubr.msk.f32.mxu0 %vm727_vm1, %v8357_v25  ;;  %v6782_v23 = vpack.c.bf16 %v647_v14, %v642_v13  ;;  %v5868_v25 = vld [vmem:[%s11816_s1 + $0x3b0] sm:$0xff]  ;;  %v6820_v60 = vpack.c.bf16 %v5836_v57, %v5831_v56  ;;  %v5861_v56 = vld [vmem:[%s11816_s1 + $0x378] sm:$0xff]  ;;  %v5866_v57 = vld [vmem:[%s11816_s1 + $0x3a0] sm:$0xff] }
  0x4e   : > { %1274 = vmatprep.mubr.f32.mxu1 %v11835_v7  ;;  %6777 = vmatprep.subr.bf16.mxu0 %v6776_v0  ;;  %v6848_v33 = vpack.c.bf16 %v5868_v25, %v5863_v24  ;;  %v8635_v0 = vsel %vm1463_vm2, %v1464_v58, %v1465_v59  ;;  %v5926_v24 = vld [vmem:[%s11816_s1 + $0x4c0] sm:$0xff]  ;;  %v5931_v25 = vld [vmem:[%s11816_s1 + $0x4e8] sm:$0xff] }
  0x4f   : > { %6839 = vmatpush1.bf16.msra.mxu1 %v6838_v3  ;;  %v6886_v3 = vpack.c.bf16 %v5901_v62, %v5896_v61  ;;  %v5865_v61 = vld [vmem:[%s11816_s1 + $0x398] sm:$0xff]  ;;  %v6832_v62 = vpack.c.bf16 %v5866_v57, %v5861_v56  ;;  %v5895_v56 = vld [vmem:[%s11816_s1 + $0x3c8] sm:$0xff]  ;;  %v5900_v57 = vld [vmem:[%s11816_s1 + $0x3f0] sm:$0xff] }
  0x50   : > { %6465 = vmatmul.mubr.msk.f32.gmra.mrb[18].mxu0 %vm727_vm1, %v8388_v37  ;;  %6841 = vmatprep.subr.bf16.mxu1 %v6840_v6  ;;  %v5897_v37 = vld [vmem:[%s11816_s1 + $0x3d8] sm:$0xff]  ;;  %v5906_v6 = vld [vmem:[%s11816_s1 + $0x420] sm:$0xff] }
  0x51   : > { %5815 = vmatmul.mubr.msk.f32.gmra.mrb[2].mxu1 %vm727_vm1, %v8264_v48  ;;  %6779 = vmatpush1.bf16.msra.mxu0 %v6778_v10  ;;  %v6884_v44 = vpack.c.bf16 %v5902_v38, %v5897_v37  ;;  %v5922_v10 = vld [vmem:[%s11816_s1 + $0x4a0] sm:$0xff]  ;;  %v6890_v13 = vpack.c.bf16 %v5911_v8, %v5906_v6  ;;  %v8724_v38 = vsel %vm1463_vm2, %v1471_v21, %v1473_v30  ;;  %v5844_v8 = vld [vmem:[%s11816_s1 + $0x2f0] sm:$0xff] }
  0x52   : > { %6467 = vmatprep.mubr.msk.f32.mxu0 %vm727_vm1, %v8407_v45  ;;  %1280 = vmatprep.mubr.f32.mxu1 %v11835_v7  ;;  %v6808_v45 = vpack.c.bf16 %v641_v43, %v636_v42  ;;  %v6892_v14 = vpack.c.bf16 %v5922_v10, %v5917_v9  ;;  %v5845_v42 = vld [vmem:[%s11816_s1 + $0x2f8] sm:$0xff]  ;;  %v6852_v6 = vpack.c.bf16 %v5839_v1, %v5834_v63  ;;  %v5960_v10 = vld [vmem:[%s11816_s1 + $0x510] sm:$0xff]  ;;  %v1919_v1 = vrot.slane %v8399_v41, 3 }
  0x53   : > { %6781 = vmatprep.subr.bf16.mxu0 %v6780_v15  ;;  %6843 = vmatpush1.bf16.msra.mxu1 %v6842_v18  ;;  %v5916_v15 = vld [vmem:[%s11816_s1 + $0x470] sm:$0xff]  ;;  %v5927_v18 = vld [vmem:[%s11816_s1 + $0x4c8] sm:$0xff]  ;;  %v5849_v9 = vld [vmem:[%s11816_s1 + $0x318] sm:$0xff] }
  0x54   : > { %6468 = vmatmul.mubr.msk.f32.gmra.mrb[20].mxu0 %vm727_vm1, %v8420_v50  ;;  %6845 = vmatprep.subr.bf16.mxu1 %v6844_v20  ;;  %v651_v50 = vld [vmem:[%s11816_s1 + $0xe8] sm:$0xff]  ;;  %v8679_v20 = vsel %vm1463_vm2, %v1467_v2, %v1469_v12  ;;  %v6894_v22 = vpack.c.bf16 %v5921_v16, %v5916_v15  ;;  %v1911_v16 = vrot.slane %v8275_v55, 3 }
  0x55   : > { %5816 = vmatmul.mubr.msk.f32.gmra.mrb[4].mxu1 %vm727_vm1, %v8275_v55  ;;  %6783 = vmatpush1.bf16.msra.mxu0 %v6782_v23  ;;  %v6896_v23 = vpack.c.bf16 %v5932_v19, %v5927_v18  ;;  %v6856_v18 = vpack.c.bf16 %v5849_v9, %v5844_v8  ;;  %v2353_v8 = vrot.slane %v8264_v48, 4  ;;  %v5894_v9 = vld [vmem:[%s11816_s1 + $0x3c0] sm:$0xff] }
  0x56   : > { %6470 = vmatprep.mubr.msk.f32.mxu0 %vm727_vm1, %v8433_v52  ;;  %1286 = vmatprep.mubr.f32.mxu1 %v11835_v7  ;;  %v656_v52 = vld [vmem:[%s11816_s1 + $0x110] sm:$0xff] }
  0x57   : > { %6785 = vmatprep.subr.bf16.mxu0 %v6784_v28  ;;  %6847 = vmatpush1.bf16.msra.mxu1 %v6846_v31  ;;  %v6816_v54 = vpack.c.bf16 %v661_v53, %v656_v52  ;;  %v8701_v28 = vsel %vm1463_vm2, %v1469_v12, %v1471_v21  ;;  %v5830_v31 = vld [vmem:[%s11816_s1 + $0x280] sm:$0xff]  ;;  %v5855_v53 = vld [vmem:[%s11816_s1 + $0x348] sm:$0xff]  ;;  %v5965_v12 = vld [vmem:[%s11816_s1 + $0x538] sm:$0xff] }
  0x58   : > { %6471 = vmatmul.mubr.msk.f32.gmra.mrb[22].mxu0 %vm727_vm1, %v8423_v51  ;;  %6849 = vmatprep.subr.bf16.mxu1 %v6848_v33  ;;  %v6812_v51 = vpack.c.bf16 %v651_v50, %v646_v46  ;;  %v6898_v33 = vpack.c.bf16 %v5931_v25, %v5926_v24  ;;  %v6822_v37 = vpack.c.bf16 %v5835_v32, %v5830_v31  ;;  %v5850_v52 = vld [vmem:[%s11816_s1 + $0x320] sm:$0xff]  ;;  %v5975_v25 = vld [vmem:[%s11816_s1 + $0x588] sm:$0xff]  ;;  %v1913_v31 = vrot.slane %v8306_v4, 3 }
  0x59   : > { %5817 = vmatmul.mubr.msk.f32.gmra.mrb[6].mxu1 %vm727_vm1, %v8306_v4  ;;  %6787 = vmatpush1.bf16.msra.mxu0 %v6786_v36  ;;  %v5846_v36 = vld [vmem:[%s11816_s1 + $0x300] sm:$0xff]  ;;  %v6830_v58 = vpack.c.bf16 %v5855_v53, %v5850_v52  ;;  %v6934_v19 = vpack.c.bf16 %v5965_v12, %v5960_v10  ;;  %v5899_v10 = vld [vmem:[%s11816_s1 + $0x3e8] sm:$0xff]  ;;  %v5905_v12 = vld [vmem:[%s11816_s1 + $0x418] sm:$0xff] }
  0x5a   : > { %1155 = vmatprep.mubr.f32.mxu0 %v11835_v7  ;;  %1292 = vmatprep.mubr.f32.mxu1 %v11835_v7  ;;  %v6824_v43 = vpack.c.bf16 %v5846_v36, %v5841_v35  ;;  %v5854_v21 = vld [vmem:[%s11816_s1 + $0x340] sm:$0xff]  ;;  %v6940_v35 = vpack.c.bf16 %v5986_v27, %v5981_v26  ;;  %v5985_v36 = vld [vmem:[%s11816_s1 + $0x5d8] sm:$0xff]  ;;  %v2359_v27 = vrot.slane %v8337_v17, 4 }
  0x5b   : > { %6805 = vmatprep.subr.bf16.mxu0 %v6804_v39  ;;  %6851 = vmatpush1.bf16.msra.mxu1 %v6850_v40  ;;  %v5840_v40 = vld [vmem:[%s11816_s1 + $0x2d0] sm:$0xff]  ;;  %v5970_v24 = vld [vmem:[%s11816_s1 + $0x560] sm:$0xff] }
  0x5c   : > { %5806 = vmatmul.mubr.msk.f32.vlgmr.msra.gmra.mrb[0].mxu0 %vm727_vm1, %v8261_v47  ;;  %6885 = vmatprep.subr.bf16.mxu1 %v6884_v44  ;;  %v5851_v44 = vld [vmem:[%s11816_s1 + $0x328] sm:$0xff]  ;;  %v6826_v46 = vpack.c.bf16 %v5845_v42, %v5840_v40  ;;  %v5996_v42 = vld [vmem:[%s11816_s1 + $0x630] sm:$0xff]  ;;  %v5990_v52 = vld [vmem:[%s11816_s1 + $0x600] sm:$0xff] }
  0x5d   : > { %5818 = vmatmul.mubr.msk.f32.gmra.mrb[8].mxu1 %vm727_vm1, %v8337_v17  ;;  %1161 = vmatprep.mubr.f32.mxu0 %v11835_v7  ;;  %v5991_v40 = vld [vmem:[%s11816_s1 + $0x608] sm:$0xff] }
  0x5e   : > { %1298 = vmatprep.mubr.f32.mxu1 %v11835_v7  ;;  %6807 = vmatpush3.bf16.msra.mxu0 %v6804_v39  ;;  %v1475_v39 = vrot.slane %v8399_v41, 2  ;;  %v6944_v53 = vpack.c.bf16 %v5996_v42, %v5991_v40  ;;  %v5918_v40 = vld [vmem:[%s11816_s1 + $0x480] sm:$0xff]  ;;  %v5923_v42 = vld [vmem:[%s11816_s1 + $0x4a8] sm:$0xff] }
  0x5f   : > { %6809 = vmatprep.subr.bf16.mxu0 %v6808_v45 }
  0x60   : > { %5807 = vmatmul.mubr.msk.f32.gmra.mrb[2].mxu0 %vm727_vm1, %v8264_v48  ;;  %v8747_v50 = vsel %vm1463_vm2, %v1473_v30, %v1475_v39 }
  0x61   : > { %5819 = vmatmul.mubr.msk.f32.gmra.mrb[10].mxu1 %vm727_vm1, %v8368_v29  ;;  %1167 = vmatprep.mubr.f32.mxu0 %v11835_v7 }
  0x62   : > { %1304 = vmatprep.mubr.f32.mxu1 %v11835_v7  ;;  %6811 = vmatpush3.bf16.msra.mxu0 %v6808_v45  ;;  %v5856_v45 = vld [vmem:[%s11816_s1 + $0x350] sm:$0xff] }
  0x63   : > { %6813 = vmatprep.subr.bf16.mxu0 %v6812_v51 }
  0x64   : > { %5808 = vmatmul.mubr.msk.f32.gmra.mrb[4].mxu0 %vm727_vm1, %v8275_v55 }
  0x65   : > { %5820 = vmatmul.mubr.msk.f32.gmra.mrb[12].mxu1 %vm727_vm1, %v8399_v41  ;;  %1173 = vmatprep.mubr.f32.mxu0 %v11835_v7 }
  0x66   : > { %1310 = vmatprep.mubr.f32.mxu1 %v11835_v7  ;;  %6815 = vmatpush3.bf16.msra.mxu0 %v6812_v51  ;;  %v8750_v51 = vrot.slane %v8412_v49, 2 }
  0x67   : > { %6817 = vmatprep.subr.bf16.mxu0 %v6816_v54 }
  0x68   : > { %5809 = vmatmul.mubr.msk.f32.gmra.mrb[6].mxu0 %vm727_vm1, %v8306_v4  ;;  %v8773_v59 = vsel %vm1463_vm2, %v1475_v39, %v8750_v51  ;;  %v5869_v39 = vld [vmem:[%s11816_s1 + $0x3b8] sm:$0xff] }
  0x69   : > { %5821 = vmatmul.mubr.msk.f32.gmra.mrb[14].mxu1 %vm727_vm1, %v8412_v49  ;;  %1179 = vmatprep.mubr.f32.mxu0 %v11835_v7 }
  0x6a   : > { %1672 = vmatprep.mubr.f32.mxu1 %v11835_v7  ;;  %6819 = vmatpush3.bf16.msra.mxu0 %v6816_v54  ;;  %v6828_v54 = vpack.c.bf16 %v5856_v45, %v5851_v44  ;;  %v1915_v44 = vrot.slane %v8337_v17, 3 }
  0x6b   : > { %6821 = vmatprep.subr.bf16.mxu0 %v6820_v60  ;;  %v5860_v60 = vld [vmem:[%s11816_s1 + $0x370] sm:$0xff] }
  0x6c   : > { %5810 = vmatmul.mubr.msk.f32.gmra.mrb[8].mxu0 %vm727_vm1, %v8337_v17  ;;  %v6834_v2 = vpack.c.bf16 %v5865_v61, %v5860_v60  ;;  %v1917_v60 = vrot.slane %v8368_v29, 3 }
  0x6d   : > { %5878 = vmatmul.mubr.msk.f32.vlgmr.msra.gmra.mrb[0].mxu1 %vm727_vm1, %v8635_v0  ;;  %1185 = vmatprep.mubr.f32.mxu0 %v11835_v7 }
  0x6e   : > { %1678 = vmatprep.mubr.f32.mxu1 %v11835_v7  ;;  %6887 = vmatpush1.bf16.msra.mxu1 %v6886_v3  ;;  %v1908_v3 = vrot.slane %v8261_v47, 3  ;;  %v8909_v63 = vsel %vm1907_vm3, %v1915_v44, %v1917_v60 }
  0x6f   : > { %6889 = vmatprep.subr.bf16.mxu1 %v6888_v5  ;;  %v1909_v5 = vrot.slane %v8264_v48, 3 }
  0x70   : > { %5811 = vmatmul.mubr.msk.f32.gmra.mrb[10].mxu0 %vm727_vm1, %v8368_v29 }
  0x71   : > { %5879 = vmatmul.mubr.msk.f32.gmra.mrb[2].mxu1 %vm727_vm1, %v8657_v11  ;;  %1191 = vmatprep.mubr.f32.mxu0 %v11835_v7  ;;  %v8821_v15 = vsel %vm1907_vm3, %v1908_v3, %v1909_v5  ;;  %v8849_v30 = vsel %vm1907_vm3, %v1909_v5, %v1911_v16  ;;  %v8922_v3 = vrot.slane %v8412_v49, 3 }
  0x72   : > { %1684 = vmatprep.mubr.f32.mxu1 %v11835_v7  ;;  %6891 = vmatpush1.bf16.msra.mxu1 %v6890_v13  ;;  %v5971_v13 = vld [vmem:[%s11816_s1 + $0x568] sm:$0xff] }
  0x73   : > { %6893 = vmatprep.subr.bf16.mxu1 %v6892_v14  ;;  %v5976_v14 = vld [vmem:[%s11816_s1 + $0x590] sm:$0xff]  ;;  %v8932_v5 = vsel %vm1907_vm3, %v1919_v1, %v8922_v3 }
  0x74   : > { %5812 = vmatmul.mubr.msk.f32.gmra.mrb[12].mxu0 %vm727_vm1, %v8399_v41 }
  0x75   : > { %5880 = vmatmul.mubr.msk.f32.gmra.mrb[4].mxu1 %vm727_vm1, %v8679_v20  ;;  %1197 = vmatprep.mubr.f32.mxu0 %v11835_v7 }
  0x76   : > { %1690 = vmatprep.mubr.f32.mxu1 %v11835_v7  ;;  %6895 = vmatpush1.bf16.msra.mxu1 %v6894_v22  ;;  %v5859_v22 = vld [vmem:[%s11816_s1 + $0x368] sm:$0xff] }
  0x77   : > { %6897 = vmatprep.subr.bf16.mxu1 %v6896_v23  ;;  %v6936_v23 = vpack.c.bf16 %v5976_v14, %v5971_v13  ;;  %v6860_v32 = vpack.c.bf16 %v5859_v22, %v5854_v21  ;;  %v2355_v14 = vrot.slane %v8275_v55, 4  ;;  %v2357_v22 = vrot.slane %v8306_v4, 4 }
  0x78   : > { %5813 = vmatmul.mubr.msk.f32.gmra.mrb[14].mxu0 %vm727_vm1, %v8412_v49 }
  0x79   : > { %5881 = vmatmul.mubr.msk.f32.gmra.mrb[6].mxu1 %vm727_vm1, %v8701_v28  ;;  %6489 = vmatprep.mubr.msk.f32.mxu0 %vm727_vm1, %v8261_v47 }
  0x7a   : > { %1696 = vmatprep.mubr.f32.mxu1 %v11835_v7  ;;  %6899 = vmatpush1.bf16.msra.mxu1 %v6898_v33  ;;  %v6938_v33 = vpack.c.bf16 %v5975_v25, %v5970_v24  ;;  %v5919_v24 = vld [vmem:[%s11816_s1 + $0x488] sm:$0xff] }
  0x7b   : > { %6933 = vmatprep.subr.bf16.mxu1 %v6932_v34  ;;  %v5980_v34 = vld [vmem:[%s11816_s1 + $0x5b0] sm:$0xff] }
  0x7c   : > { %6490 = vmatmul.mubr.msk.f32.vlgmr.msra.gmra.mrb[16].mxu0 %vm727_vm1, %v8264_v48  ;;  %v6942_v45 = vpack.c.bf16 %v5985_v36, %v5980_v34  ;;  %v6870_v48 = vpack.c.bf16 %v5899_v10, %v5894_v9  ;;  %v5968_v9 = vld [vmem:[%s11816_s1 + $0x550] sm:$0xff]  ;;  %v5973_v10 = vld [vmem:[%s11816_s1 + $0x578] sm:$0xff] }
  0x7d   : > { %5882 = vmatmul.mubr.msk.f32.gmra.mrb[8].mxu1 %vm727_vm1, %v8724_v38  ;;  %6823 = vmatpush1.bf16.msra.mxu0 %v6822_v37  ;;  %v5864_v37 = vld [vmem:[%s11816_s1 + $0x390] sm:$0xff] }
  0x7e   : > { %6492 = vmatprep.mubr.msk.f32.mxu0 %vm727_vm1, %v8275_v55  ;;  %1702 = vmatprep.mubr.f32.mxu1 %v11835_v7  ;;  %v5920_v55 = vld [vmem:[%s11816_s1 + $0x490] sm:$0xff] }
  0x7f   : > { %6825 = vmatprep.subr.bf16.mxu0 %v6824_v43  ;;  %v8877_v43 = vsel %vm1907_vm3, %v1911_v16, %v1913_v31  ;;  %v5904_v16 = vld [vmem:[%s11816_s1 + $0x410] sm:$0xff] }
  0x80   : > { %6493 = vmatmul.mubr.msk.f32.gmra.mrb[18].mxu0 %vm727_vm1, %v8306_v4  ;;  %v5930_v4 = vld [vmem:[%s11816_s1 + $0x4e0] sm:$0xff] }
  0x81   : > { %5883 = vmatmul.mubr.msk.f32.gmra.mrb[10].mxu1 %vm727_vm1, %v8747_v50  ;;  %6827 = vmatpush1.bf16.msra.mxu0 %v6826_v46  ;;  %v6864_v46 = vpack.c.bf16 %v5869_v39, %v5864_v37  ;;  %v5908_v37 = vld [vmem:[%s11816_s1 + $0x430] sm:$0xff] }
  0x82   : > { %6495 = vmatprep.mubr.msk.f32.mxu0 %vm727_vm1, %v8337_v17  ;;  %1708 = vmatprep.mubr.f32.mxu1 %v11835_v7  ;;  %v5903_v17 = vld [vmem:[%s11816_s1 + $0x408] sm:$0xff] }
  0x83   : > { %6829 = vmatprep.subr.bf16.mxu0 %v6828_v54  ;;  %v5995_v54 = vld [vmem:[%s11816_s1 + $0x628] sm:$0xff] }
  0x84   : > { %6496 = vmatmul.mubr.msk.f32.gmra.mrb[20].mxu0 %vm727_vm1, %v8368_v29  ;;  %v6946_v61 = vpack.c.bf16 %v5995_v54, %v5990_v52  ;;  %v5933_v52 = vld [vmem:[%s11816_s1 + $0x4f8] sm:$0xff]  ;;  %v5959_v54 = vld [vmem:[%s11816_s1 + $0x508] sm:$0xff] }
  0x85   : > { %5884 = vmatmul.mubr.msk.f32.gmra.mrb[12].mxu1 %vm727_vm1, %v8773_v59  ;;  %6831 = vmatpush1.bf16.msra.mxu0 %v6830_v58  ;;  %v8899_v58 = vsel %vm1907_vm3, %v1913_v31, %v1915_v44  ;;  %v5924_v31 = vld [vmem:[%s11816_s1 + $0x4b0] sm:$0xff]  ;;  %v9066_v44 = vrot.slane %v8412_v49, 4 }
  0x86   : > { %6498 = vmatprep.mubr.msk.f32.mxu0 %vm727_vm1, %v8399_v41  ;;  %1714 = vmatprep.mubr.f32.mxu1 %v11835_v7 }
  0x87   : > { %6833 = vmatprep.subr.bf16.mxu0 %v6832_v62  ;;  %v6868_v62 = vpack.c.bf16 %v5900_v57, %v5895_v56  ;;  %v5964_v56 = vld [vmem:[%s11816_s1 + $0x530] sm:$0xff] }
  0x88   : > { %6499 = vmatmul.mubr.msk.f32.gmra.mrb[22].mxu0 %vm727_vm1, %v8412_v49  ;;  %v6916_v57 = vpack.c.bf16 %v5964_v56, %v5959_v54 }
  0x89   : > { %5885 = vmatmul.mubr.msk.f32.gmra.mrb[14].mxu1 %vm727_vm1, %v8750_v51  ;;  %6835 = vmatpush1.bf16.msra.mxu0 %v6834_v2  ;;  %v8919_v2 = vsel %vm1907_vm3, %v1917_v60, %v1919_v1  ;;  %v5958_v60 = vld [vmem:[%s11816_s1 + $0x500] sm:$0xff] }
  0x8a   : > { %1559 = vmatprep.mubr.f32.mxu0 %v11835_v7  ;;  %2116 = vmatprep.mubr.f32.mxu1 %v11835_v7  ;;  %v5974_v1 = vld [vmem:[%s11816_s1 + $0x580] sm:$0xff] }
  0x8b   : > { %6853 = vmatprep.subr.bf16.mxu0 %v6852_v6 }
  0x8c   : > { %5870 = vmatmul.mubr.msk.f32.vlgmr.msra.gmra.mrb[0].mxu0 %vm727_vm1, %v8635_v0 }
  0x8d   : > { %5942 = vmatmul.mubr.msk.f32.vlgmr.msra.gmra.mrb[0].mxu1 %vm727_vm1, %v8821_v15  ;;  %1565 = vmatprep.mubr.f32.mxu0 %v11835_v7 }
  0x8e   : > { %2122 = vmatprep.mubr.f32.mxu1 %v11835_v7  ;;  %6855 = vmatpush3.bf16.msra.mxu0 %v6852_v6  ;;  %v2352_v6 = vrot.slane %v8261_v47, 4  ;;  %v5910_v47 = vld [vmem:[%s11816_s1 + $0x440] sm:$0xff] }
  0x8f   : > { %6857 = vmatprep.subr.bf16.mxu0 %v6856_v18  ;;  %6935 = vmatpush1.bf16.msra.mxu1 %v6934_v19  ;;  %v6872_v19 = vpack.c.bf16 %v5910_v47, %v5905_v12  ;;  %v5979_v12 = vld [vmem:[%s11816_s1 + $0x5a8] sm:$0xff]  ;;  %v5984_v47 = vld [vmem:[%s11816_s1 + $0x5d0] sm:$0xff] }
  0x90   : > { %5871 = vmatmul.mubr.msk.f32.gmra.mrb[2].mxu0 %vm727_vm1, %v8657_v11  ;;  %6937 = vmatprep.subr.bf16.mxu1 %v6936_v23  ;;  %v8962_v13 = vsel %vm2351_vm4, %v2352_v6, %v2353_v8  ;;  %v5914_v23 = vld [vmem:[%s11816_s1 + $0x460] sm:$0xff] }
  0x91   : > { %5943 = vmatmul.mubr.msk.f32.gmra.mrb[2].mxu1 %vm727_vm1, %v8849_v30  ;;  %1571 = vmatprep.mubr.f32.mxu0 %v11835_v7  ;;  %v6878_v26 = vpack.c.bf16 %v5919_v24, %v5914_v23  ;;  %v5972_v23 = vld [vmem:[%s11816_s1 + $0x570] sm:$0xff]  ;;  %v5977_v24 = vld [vmem:[%s11816_s1 + $0x598] sm:$0xff] }
  0x92   : > { %2128 = vmatprep.mubr.f32.mxu1 %v11835_v7  ;;  %6859 = vmatpush3.bf16.msra.mxu0 %v6856_v18  ;;  %v5909_v18 = vld [vmem:[%s11816_s1 + $0x438] sm:$0xff] }
  0x93   : > { %6861 = vmatprep.subr.bf16.mxu0 %v6860_v32  ;;  %6939 = vmatpush1.bf16.msra.mxu1 %v6938_v33  ;;  %v6874_v21 = vpack.c.bf16 %v5909_v18, %v5904_v16  ;;  %v5983_v16 = vld [vmem:[%s11816_s1 + $0x5c8] sm:$0xff]  ;;  %v5989_v18 = vld [vmem:[%s11816_s1 + $0x5f8] sm:$0xff] }
  0x94   : > { %5872 = vmatmul.mubr.msk.f32.gmra.mrb[4].mxu0 %vm727_vm1, %v8679_v20  ;;  %6941 = vmatprep.subr.bf16.mxu1 %v6940_v35  ;;  %v2361_v35 = vrot.slane %v8368_v29, 4 }
  0x95   : > { %5944 = vmatmul.mubr.msk.f32.gmra.mrb[4].mxu1 %vm727_vm1, %v8877_v43  ;;  %1577 = vmatprep.mubr.f32.mxu0 %v11835_v7 }
  0x96   : > { %2134 = vmatprep.mubr.f32.mxu1 %v11835_v7  ;;  %6863 = vmatpush3.bf16.msra.mxu0 %v6860_v32  ;;  %v5929_v32 = vld [vmem:[%s11816_s1 + $0x4d8] sm:$0xff]  ;;  %v9047_v29 = vsel %vm2351_vm4, %v2359_v27, %v2361_v35 }
  0x97   : > { %6943 = vmatpush1.bf16.msra.mxu1 %v6942_v45  ;;  %6865 = vmatprep.subr.bf16.mxu0 %v6864_v46  ;;  %v6882_v34 = vpack.c.bf16 %v5929_v32, %v5924_v31  ;;  %v6908_v45 = vpack.c.bf16 %v5923_v42, %v5918_v40 }
  0x98   : > { %5873 = vmatmul.mubr.msk.f32.gmra.mrb[6].mxu0 %vm727_vm1, %v8701_v28  ;;  %6945 = vmatprep.subr.bf16.mxu1 %v6944_v53 }
  0x99   : > { %5945 = vmatmul.mubr.msk.f32.gmra.mrb[6].mxu1 %vm727_vm1, %v8899_v58  ;;  %1583 = vmatprep.mubr.f32.mxu0 %v11835_v7 }
  0x9a   : > { %2140 = vmatprep.mubr.f32.mxu1 %v11835_v7  ;;  %6867 = vmatpush3.bf16.msra.mxu0 %v6864_v46  ;;  %v5928_v46 = vld [vmem:[%s11816_s1 + $0x4d0] sm:$0xff] }
  0x9b   : > { %6947 = vmatpush1.bf16.msra.mxu1 %v6946_v61  ;;  %6869 = vmatprep.subr.bf16.mxu0 %v6868_v62  ;;  %v6912_v53 = vpack.c.bf16 %v5933_v52, %v5928_v46  ;;  %v5963_v61 = vld [vmem:[%s11816_s1 + $0x528] sm:$0xff]  ;;  %v5969_v62 = vld [vmem:[%s11816_s1 + $0x558] sm:$0xff] }
  0x9c   : > { %5874 = vmatmul.mubr.msk.f32.gmra.mrb[8].mxu0 %vm727_vm1, %v8724_v38  ;;  %v6918_v6 = vpack.c.bf16 %v5963_v61, %v5958_v60 }
  0x9d   : > { %5946 = vmatmul.mubr.msk.f32.gmra.mrb[8].mxu1 %vm727_vm1, %v8909_v63  ;;  %1589 = vmatprep.mubr.f32.mxu0 %v11835_v7 }
  0x9e   : > { %2146 = vmatprep.mubr.f32.mxu1 %v11835_v7 }
  0xa0   : > { %5875 = vmatmul.mubr.msk.f32.gmra.mrb[10].mxu0 %vm727_vm1, %v8747_v50 }
  0xa1   : > { %5947 = vmatmul.mubr.msk.f32.gmra.mrb[10].mxu1 %vm727_vm1, %v8919_v2  ;;  %1595 = vmatprep.mubr.f32.mxu0 %v11835_v7 }
  0xa2   : > { %2152 = vmatprep.mubr.f32.mxu1 %v11835_v7 }
  0xa4   : > { %5876 = vmatmul.mubr.msk.f32.gmra.mrb[12].mxu0 %vm727_vm1, %v8773_v59 }
  0xa5   : > { %5948 = vmatmul.mubr.msk.f32.gmra.mrb[12].mxu1 %vm727_vm1, %v8932_v5  ;;  %1601 = vmatprep.mubr.f32.mxu0 %v11835_v7 }
  0xa6   : > { %2158 = vmatprep.mubr.f32.mxu1 %v11835_v7 }
  0xa8   : > { %5877 = vmatmul.mubr.msk.f32.gmra.mrb[14].mxu0 %vm727_vm1, %v8750_v51 }
  0xa9   : > { %5949 = vmatmul.mubr.msk.f32.gmra.mrb[14].mxu1 %vm727_vm1, %v8922_v3  ;;  %6517 = vmatprep.mubr.msk.f32.mxu0 %vm727_vm1, %v8635_v0  ;;  %v5915_v0 = vld [vmem:[%s11816_s1 + $0x468] sm:$0xff] }
  0xaa   : > { %2560 = vmatprep.mubr.f32.mxu1 %v11835_v7  ;;  %v6876_v25 = vpack.c.bf16 %v5920_v55, %v5915_v0  ;;  %v5988_v0 = vld [vmem:[%s11816_s1 + $0x5f0] sm:$0xff]  ;;  %v5993_v55 = vld [vmem:[%s11816_s1 + $0x618] sm:$0xff] }
  0xac   : > { %6518 = vmatmul.mubr.msk.f32.vlgmr.msra.gmra.mrb[16].mxu0 %vm727_vm1, %v8657_v11  ;;  %v8985_v11 = vsel %vm2351_vm4, %v2353_v8, %v2355_v14  ;;  %v6920_v8 = vpack.c.bf16 %v5974_v1, %v5969_v62 }
  0xad   : > { %6006 = vmatmul.mubr.msk.f32.vlgmr.msra.gmra.mrb[0].mxu1 %vm727_vm1, %v8962_v13  ;;  %6871 = vmatpush1.bf16.msra.mxu0 %v6870_v48  ;;  %v6924_v48 = vpack.c.bf16 %v5984_v47, %v5979_v12 }
  0xae   : > { %6520 = vmatprep.mubr.msk.f32.mxu0 %vm727_vm1, %v8679_v20  ;;  %2566 = vmatprep.mubr.f32.mxu1 %v11835_v7  ;;  %v5925_v20 = vld [vmem:[%s11816_s1 + $0x4b8] sm:$0xff] }
  0xaf   : > { %6873 = vmatprep.subr.bf16.mxu0 %v6872_v19  ;;  %v6880_v33 = vpack.c.bf16 %v5930_v4, %v5925_v20  ;;  %v5992_v20 = vld [vmem:[%s11816_s1 + $0x610] sm:$0xff]  ;;  %v5997_v4 = vld [vmem:[%s11816_s1 + $0x638] sm:$0xff] }
  0xb0   : > { %6521 = vmatmul.mubr.msk.f32.gmra.mrb[18].mxu0 %vm727_vm1, %v8701_v28  ;;  %v9008_v28 = vsel %vm2351_vm4, %v2355_v14, %v2357_v22  ;;  %v5978_v14 = vld [vmem:[%s11816_s1 + $0x5a0] sm:$0xff] }
  0xb1   : > { %6007 = vmatmul.mubr.msk.f32.gmra.mrb[2].mxu1 %vm727_vm1, %v8985_v11  ;;  %6875 = vmatpush1.bf16.msra.mxu0 %v6874_v21  ;;  %v5962_v21 = vld [vmem:[%s11816_s1 + $0x520] sm:$0xff] }
  0xb2   : > { %6523 = vmatprep.mubr.msk.f32.mxu0 %vm727_vm1, %v8724_v38  ;;  %2572 = vmatprep.mubr.f32.mxu1 %v11835_v7  ;;  %v5898_v38 = vld [vmem:[%s11816_s1 + $0x3e0] sm:$0xff] }
  0xb3   : > { %6877 = vmatprep.subr.bf16.mxu0 %v6876_v25  ;;  %v6900_v36 = vpack.c.bf16 %v5903_v17, %v5898_v38  ;;  %v5987_v25 = vld [vmem:[%s11816_s1 + $0x5e8] sm:$0xff] }
  0xb4   : > { %6524 = vmatmul.mubr.msk.f32.gmra.mrb[20].mxu0 %vm727_vm1, %v8747_v50  ;;  %v9031_v50 = vsel %vm2351_vm4, %v2357_v22, %v2359_v27  ;;  %v9241_v27 = vld [vmem:[%s11817_s2] sm:$0x1f] }
  0xb5   : > { %6008 = vmatmul.mubr.msk.f32.gmra.mrb[4].mxu1 %vm727_vm1, %v9008_v28  ;;  %6879 = vmatpush1.bf16.msra.mxu0 %v6878_v26  ;;  %v6960_v26 = vpack.c.bf16 %v5997_v4, %v5992_v20 }
  0xb6   : > { %6526 = vmatprep.mubr.msk.f32.mxu0 %vm727_vm1, %v8773_v59  ;;  %2578 = vmatprep.mubr.f32.mxu1 %v11835_v7  ;;  %v5913_v59 = vld [vmem:[%s11816_s1 + $0x458] sm:$0xff] }
  0xb7   : > { %6881 = vmatprep.subr.bf16.mxu0 %v6880_v33  ;;  %v6904_v39 = vpack.c.bf16 %v5913_v59, %v5908_v37 }
  0xb8   : > { %6527 = vmatmul.mubr.msk.f32.gmra.mrb[22].mxu0 %vm727_vm1, %v8750_v51  ;;  %v2363_v51 = vrot.slane %v8399_v41, 4 }
  0xb9   : > { %6009 = vmatmul.mubr.msk.f32.gmra.mrb[6].mxu1 %vm727_vm1, %v9031_v50  ;;  %6883 = vmatpush1.bf16.msra.mxu0 %v6882_v34 }
  0xba   : > { %2003 = vmatprep.mubr.f32.mxu0 %v11835_v7  ;;  %2584 = vmatprep.mubr.f32.mxu1 %v11835_v7  ;;  %v9063_v41 = vsel %vm2351_vm4, %v2361_v35, %v2363_v51  ;;  %v9082_v49 = vsel %vm2351_vm4, %v2363_v51, %v9066_v44 }
  0xbb   : > { %6901 = vmatprep.subr.bf16.mxu0 %v6900_v36 }
  0xbc   : > { %5934 = vmatmul.mubr.msk.f32.vlgmr.msra.gmra.mrb[0].mxu0 %vm727_vm1, %v8821_v15 }
  0xbd   : > { %6010 = vmatmul.mubr.msk.f32.gmra.mrb[8].mxu1 %vm727_vm1, %v9047_v29  ;;  %2009 = vmatprep.mubr.f32.mxu0 %v11835_v7 }
  0xbe   : > { %2590 = vmatprep.mubr.f32.mxu1 %v11835_v7  ;;  %6903 = vmatpush3.bf16.msra.mxu0 %v6900_v36 }
  0xbf   : > { %6905 = vmatprep.subr.bf16.mxu0 %v6904_v39 }
  0xc0   : > { %5935 = vmatmul.mubr.msk.f32.gmra.mrb[2].mxu0 %vm727_vm1, %v8849_v30 }
  0xc1   : > { %6011 = vmatmul.mubr.msk.f32.gmra.mrb[10].mxu1 %vm727_vm1, %v9063_v41  ;;  %2015 = vmatprep.mubr.f32.mxu0 %v11835_v7 }
  0xc2   : > { %2596 = vmatprep.mubr.f32.mxu1 %v11835_v7  ;;  %6907 = vmatpush3.bf16.msra.mxu0 %v6904_v39 }
  0xc3   : > { %6909 = vmatprep.subr.bf16.mxu0 %v6908_v45 }
  0xc4   : > { %5936 = vmatmul.mubr.msk.f32.gmra.mrb[4].mxu0 %vm727_vm1, %v8877_v43 }
  0xc5   : > { %6012 = vmatmul.mubr.msk.f32.gmra.mrb[12].mxu1 %vm727_vm1, %v9082_v49  ;;  %2021 = vmatprep.mubr.f32.mxu0 %v11835_v7 }
  0xc6   : > { %2602 = vmatprep.mubr.f32.mxu1 %v11835_v7  ;;  %6911 = vmatpush3.bf16.msra.mxu0 %v6908_v45 }
  0xc7   : > { %6913 = vmatprep.subr.bf16.mxu0 %v6912_v53 }
  0xc8   : > { %5937 = vmatmul.mubr.msk.f32.gmra.mrb[6].mxu0 %vm727_vm1, %v8899_v58 }
  0xc9   : > { %6013 = vmatmul.mubr.msk.f32.gmra.mrb[14].mxu1 %vm727_vm1, %v9066_v44  ;;  %2027 = vmatprep.mubr.f32.mxu0 %v11835_v7 }
  0xca   : > { %6915 = vmatpush3.bf16.msra.mxu0 %v6912_v53  ;;  %3726 = vmatprep.mubr.f32.mxu1 %v11835_v7 }
  0xcb   : > { %6917 = vmatprep.subr.bf16.mxu0 %v6916_v57 }
  0xcc   : > { %5938 = vmatmul.mubr.msk.f32.gmra.mrb[8].mxu0 %vm727_vm1, %v8909_v63 }
  0xcd   : > { %2033 = vmatprep.mubr.f32.mxu0 %v11835_v7 }
  0xd0   : > { %5939 = vmatmul.mubr.msk.f32.gmra.mrb[10].mxu0 %vm727_vm1, %v8919_v2 }
  0xd1   : > { %2039 = vmatprep.mubr.f32.mxu0 %v11835_v7 }
  0xd4   : > { %5940 = vmatmul.mubr.msk.f32.gmra.mrb[12].mxu0 %vm727_vm1, %v8932_v5 }
  0xd5   : > { %2045 = vmatprep.mubr.f32.mxu0 %v11835_v7 }
  0xd8   : > { %5941 = vmatmul.mubr.msk.f32.gmra.mrb[14].mxu0 %vm727_vm1, %v8922_v3 }
  0xd9   : > { %6545 = vmatprep.mubr.msk.f32.mxu0 %vm727_vm1, %v8821_v15  ;;  %v6922_v15 = vpack.c.bf16 %v5973_v10, %v5968_v9 }
  0xdc   : > { %6546 = vmatmul.mubr.msk.f32.vlgmr.msra.gmra.mrb[16].mxu0 %vm727_vm1, %v8849_v30  ;;  %v5994_v30 = vld [vmem:[%s11816_s1 + $0x620] sm:$0xff] }
  0xdd   : > { %6919 = vmatpush1.bf16.msra.mxu0 %v6918_v6  ;;  %6548 = vmatprep.mubr.msk.f32.mxu0 %vm727_vm1, %v8877_v43  ;;  %v6926_v43 = vpack.c.bf16 %v5983_v16, %v5978_v14  ;;  %v6928_v19 = vpack.c.bf16 %v5994_v30, %v5989_v18 }
  0xde   : > { %6921 = vmatprep.subr.bf16.mxu0 %v6920_v8 }
  0xe0   : > { %6549 = vmatmul.mubr.msk.f32.gmra.mrb[18].mxu0 %vm727_vm1, %v8899_v58  ;;  %v5967_v58 = vld [vmem:[%s11816_s1 + $0x548] sm:$0xff] }
  0xe1   : > { %6923 = vmatpush1.bf16.msra.mxu0 %v6922_v15  ;;  %6551 = vmatprep.mubr.msk.f32.mxu0 %vm727_vm1, %v8909_v63  ;;  %v6930_v63 = vpack.c.bf16 %v5993_v55, %v5988_v0  ;;  %v6948_v22 = vpack.c.bf16 %v5967_v58, %v5962_v21 }
  0xe2   : > { %6925 = vmatprep.subr.bf16.mxu0 %v6924_v48 }
  0xe4   : > { %6552 = vmatmul.mubr.msk.f32.gmra.mrb[20].mxu0 %vm727_vm1, %v8919_v2  ;;  %v6952_v2 = vpack.c.bf16 %v5977_v24, %v5972_v23 }
  0xe5   : > { %6927 = vmatpush1.bf16.msra.mxu0 %v6926_v43  ;;  %6554 = vmatprep.mubr.msk.f32.mxu0 %vm727_vm1, %v8932_v5  ;;  %v5982_v5 = vld [vmem:[%s11816_s1 + $0x5c0] sm:$0xff] }
  0xe6   : > { %6929 = vmatprep.subr.bf16.mxu0 %v6928_v19 }
  0xe8   : > { %6555 = vmatmul.mubr.msk.f32.gmra.mrb[22].mxu0 %vm727_vm1, %v8922_v3  ;;  %v6956_v3 = vpack.c.bf16 %v5987_v25, %v5982_v5 }
  0xe9   : > { %6931 = vmatpush1.bf16.msra.mxu0 %v6930_v63  ;;  %2447 = vmatprep.mubr.f32.mxu0 %v11835_v7 }
  0xea   : > { %6949 = vmatprep.subr.bf16.mxu0 %v6948_v22 }
  0xec   : > { %5998 = vmatmul.mubr.msk.f32.vlgmr.msra.gmra.mrb[0].mxu0 %vm727_vm1, %v8962_v13 }
  0xed   : > { %2453 = vmatprep.mubr.f32.mxu0 %v11835_v7  ;;  %6951 = vmatpush3.bf16.msra.mxu0 %v6948_v22 }
  0xee   : > { %6953 = vmatprep.subr.bf16.mxu0 %v6952_v2 }
  0xf0   : > { %5999 = vmatmul.mubr.msk.f32.gmra.mrb[2].mxu0 %vm727_vm1, %v8985_v11 }
  0xf1   : > { %2459 = vmatprep.mubr.f32.mxu0 %v11835_v7  ;;  %6955 = vmatpush3.bf16.msra.mxu0 %v6952_v2 }
  0xf2   : > { %6957 = vmatprep.subr.bf16.mxu0 %v6956_v3 }
  0xf4   : > { %6000 = vmatmul.mubr.msk.f32.gmra.mrb[4].mxu0 %vm727_vm1, %v9008_v28 }
  0xf5   : > { %2465 = vmatprep.mubr.f32.mxu0 %v11835_v7  ;;  %6959 = vmatpush3.bf16.msra.mxu0 %v6956_v3 }
  0xf6   : > { %6961 = vmatprep.subr.bf16.mxu0 %v6960_v26 }
  0xf8   : > { %6001 = vmatmul.mubr.msk.f32.gmra.mrb[6].mxu0 %vm727_vm1, %v9031_v50 }
  0xf9   : > { %2471 = vmatprep.mubr.f32.mxu0 %v11835_v7  ;;  %6963 = vmatpush3.bf16.msra.mxu0 %v6960_v26 }
  0xfc   : > { %6002 = vmatmul.mubr.msk.f32.gmra.mrb[8].mxu0 %vm727_vm1, %v9047_v29 }
  0xfd   : > { %2477 = vmatprep.mubr.f32.mxu0 %v11835_v7 }
 0x100   : > { %6003 = vmatmul.mubr.msk.f32.gmra.mrb[10].mxu0 %vm727_vm1, %v9063_v41 }
 0x101   : > { %2483 = vmatprep.mubr.f32.mxu0 %v11835_v7 }
 0x104   : > { %6004 = vmatmul.mubr.msk.f32.gmra.mrb[12].mxu0 %vm727_vm1, %v9082_v49 }
 0x105   : > { %2489 = vmatprep.mubr.f32.mxu0 %v11835_v7 }
 0x108   : > { %6005 = vmatmul.mubr.msk.f32.gmra.mrb[14].mxu0 %vm727_vm1, %v9066_v44 }
 0x109   : > { %6573 = vmatprep.mubr.msk.f32.mxu0 %vm727_vm1, %v8962_v13  ;;  %v2755_v13 = vlaneseq }
 0x10c   : > { %6574 = vmatmul.mubr.msk.f32.vlgmr.msra.gmra.mrb[16].mxu0 %vm727_vm1, %v8985_v11  ;;  %v9235_v11 = vshrl.u32 %v2755_v13, 7 }
 0x10d   : > { %6576 = vmatprep.mubr.msk.f32.mxu0 %vm727_vm1, %v9008_v28 }
 0x10e   : > { %11882 = vst [vmem:[#allocation9_spill] sm:$0xff] %v9235_v11  ;;  %v2765_v28 = vsub.s32 2, %v9235_v11  ;;  %v2769_v31 = vsub.s32 3, %v9235_v11 }
 0x110   : > { %6577 = vmatmul.mubr.msk.f32.gmra.mrb[18].mxu0 %vm727_vm1, %v9031_v50  ;;  %v9245_v32 = vrot.slane %v9241_v27, %v2765_v28  ;;  %v9248_v33 = vrot.slane %v9241_v27, %v2769_v31 }
 0x111   : > { %6579 = vmatprep.mubr.msk.f32.mxu0 %vm727_vm1, %v9047_v29 }
 0x114   : > { %6580 = vmatmul.mubr.msk.f32.gmra.mrb[20].mxu0 %vm727_vm1, %v9063_v41 }
 0x115   : > { %6582 = vmatprep.mubr.msk.f32.mxu0 %vm727_vm1, %v9082_v49 }
 0x118   : > { %6583 = vmatmul.mubr.msk.f32.gmra.mrb[22].mxu0 %vm727_vm1, %v9066_v44  ;;  %vm5156_vm1 = vcmask 408576  }
 0x180   : > { %v2562_v38 = vpop.f32.mrb[0].mxu1 }
 0x181   : > { %v2782_v17 = vadd.f32 %v9245_v32, %v2562_v38  ;;  %v2564_v34 = vpop.f32.mrb[1].mxu1 }
 0x182   : > { %v2783_v50 = vadd.f32 %v9248_v33, %v2564_v34 }
 0x183   : > { %v2822_v35 = vmax.f32 %v2782_v17, 0.0 }
 0x184   : > { %v2568_v36 = vpop.f32.mrb[2].mxu1  ;;  %v2823_v37 = vmax.f32 %v2783_v50, 0.0 }
 0x185   : > { %v2787_v59 = vadd.f32 %v9245_v32, %v2568_v36  ;;  %v2570_v29 = vpop.f32.mrb[3].mxu1  ;;  %v2906_v40 = vrot.slane %v2822_v35, 1  ;;  %v3061_v42 = vrot.slane %v2822_v35, 2 }
 0x186   : > { %v2788_v51 = vadd.f32 %v9248_v33, %v2570_v29  ;;  %v2909_v45 = vrot.slane %v2823_v37, 1  ;;  %v3064_v54 = vrot.slane %v2823_v37, 2 }
 0x187   : > { %v2827_v39 = vmax.f32 %v2787_v59, 0.0 }
 0x188   : > { %v2828_v41 = vmax.f32 %v2788_v51, 0.0  ;;  %v2574_v44 = vpop.f32.mrb[4].mxu1 }
 0x189   : > { %v2907_v46 = vrot.slane %v2827_v39, 1  ;;  %v3062_v52 = vrot.slane %v2827_v39, 2  ;;  %v2792_v49 = vadd.f32 %v9245_v32, %v2574_v44  ;;  %v2576_v53 = vpop.f32.mrb[5].mxu1 }
 0x18a   : > { %v2910_v56 = vrot.slane %v2828_v41, 1  ;;  %v3065_v57 = vrot.slane %v2828_v41, 2  ;;  %v2793_v60 = vadd.f32 %v9248_v33, %v2576_v53 }
 0x18b   : > { %v2832_v61 = vmax.f32 %v2792_v49, 0.0  ;;  %v2908_v62 = vsel %vm711_vm0, %v2906_v40, %v2907_v46  ;;  %v3063_v1 = vsel %vm1463_vm2, %v3061_v42, %v3062_v52 }
 0x18c   : > { %v2911_v6 = vsel %vm711_vm0, %v2909_v45, %v2910_v56  ;;  %v2833_v8 = vmax.f32 %v2793_v60, 0.0  ;;  %v2580_v9 = vpop.f32.mrb[6].mxu1  ;;  %v3017_v10 = vmax.f32 %v2822_v35, %v2908_v62  ;;  %v3066_v12 = vsel %vm1463_vm2, %v3064_v54, %v3065_v57 }
 0x18d   : > { %v2919_v47 = vrot.slane %v2832_v61, 1  ;;  %v3074_v15 = vrot.slane %v2832_v61, 2  ;;  %v2797_v48 = vadd.f32 %v9245_v32, %v2580_v9  ;;  %v2582_v14 = vpop.f32.mrb[7].mxu1  ;;  %v3018_v16 = vmax.f32 %v2823_v37, %v2911_v6 }
 0x18e   : > { %v2921_v18 = vrot.slane %v2833_v8, 1  ;;  %v3076_v30 = vrot.slane %v2833_v8, 2  ;;  %v2798_v43 = vadd.f32 %v9248_v33, %v2582_v14  ;;  %v9262_v19 = vmax.f32 %v3017_v10, %v3063_v1 }
 0x18f   : > { %v2920_v0 = vsel %vm711_vm0, %v2907_v46, %v2919_v47  ;;  %v2837_v55 = vmax.f32 %v2797_v48, 0.0  ;;  %v3075_v21 = vsel %vm1463_vm2, %v3062_v52, %v3074_v15  ;;  %v9266_v58 = vmax.f32 %v3018_v16, %v3066_v12 }
 0x190   : > { %v2922_v63 = vsel %vm711_vm0, %v2910_v56, %v2921_v18  ;;  %v2838_v22 = vmax.f32 %v2798_v43, 0.0  ;;  %v2586_v23 = vpop.f32.mrb[8].mxu1  ;;  %v3022_v24 = vmax.f32 %v2827_v39, %v2920_v0  ;;  %v3077_v2 = vsel %vm1463_vm2, %v3065_v57, %v3076_v30 }
 0x191   : > { %v2929_v5 = vrot.slane %v2837_v55, 1  ;;  %v3084_v25 = vrot.slane %v2837_v55, 2  ;;  %v2802_v3 = vadd.f32 %v9245_v32, %v2586_v23  ;;  %v2588_v20 = vpop.f32.mrb[9].mxu1  ;;  %v3023_v4 = vmax.f32 %v2828_v41, %v2922_v63 }
 0x192   : > { %v2931_v26 = vrot.slane %v2838_v22, 1  ;;  %v3086_v13 = vrot.slane %v2838_v22, 2  ;;  %v2803_v28 = vadd.f32 %v9248_v33, %v2588_v20  ;;  %v9272_v31 = vmax.f32 %v3022_v24, %v3075_v21 }
 0x193   : > { %v2930_v38 = vsel %vm711_vm0, %v2919_v47, %v2929_v5  ;;  %v2842_v17 = vmax.f32 %v2802_v3, 0.0  ;;  %v3085_v34 = vsel %vm1463_vm2, %v3074_v15, %v3084_v25  ;;  %v9276_v50 = vmax.f32 %v3023_v4, %v3077_v2 }
 0x194   : > { %11883 = vst [vmem:[#allocation10_spill] sm:$0xff] %v9272_v31  ;;  %v2932_v35 = vsel %vm711_vm0, %v2921_v18, %v2931_v26  ;;  %v2843_v36 = vmax.f32 %v2803_v28, 0.0  ;;  %v2592_v37 = vpop.f32.mrb[10].mxu1  ;;  %v3027_v59 = vmax.f32 %v2832_v61, %v2930_v38  ;;  %v3087_v29 = vsel %vm1463_vm2, %v3076_v30, %v3086_v13 }
 0x195   : > { %v2939_v51 = vrot.slane %v2842_v17, 1  ;;  %v3094_v39 = vrot.slane %v2842_v17, 2  ;;  %v2807_v40 = vadd.f32 %v9245_v32, %v2592_v37  ;;  %v2594_v42 = vpop.f32.mrb[11].mxu1  ;;  %v3028_v41 = vmax.f32 %v2833_v8, %v2932_v35 }
 0x196   : > { %v2941_v44 = vrot.slane %v2843_v36, 1  ;;  %v3096_v45 = vrot.slane %v2843_v36, 2  ;;  %v2808_v46 = vadd.f32 %v9248_v33, %v2594_v42  ;;  %v9282_v52 = vmax.f32 %v3027_v59, %v3085_v34 }
 0x197   : > { %v2940_v49 = vsel %vm711_vm0, %v2929_v5, %v2939_v51  ;;  %v2847_v53 = vmax.f32 %v2807_v40, 0.0  ;;  %v3095_v54 = vsel %vm1463_vm2, %v3084_v25, %v3094_v39  ;;  %v9286_v56 = vmax.f32 %v3028_v41, %v3087_v29 }
 0x198   : > { %11884 = vst [vmem:[#allocation11_spill] sm:$0xff] %v9282_v52  ;;  %v2942_v57 = vsel %vm711_vm0, %v2931_v26, %v2941_v44  ;;  %v2848_v60 = vmax.f32 %v2808_v46, 0.0  ;;  %v2598_v61 = vpop.f32.mrb[12].mxu1  ;;  %v3032_v62 = vmax.f32 %v2837_v55, %v2940_v49  ;;  %v3097_v1 = vsel %vm1463_vm2, %v3086_v13, %v3096_v45 }
 0x199   : > { %v2949_v6 = vrot.slane %v2847_v53, 1  ;;  %v3104_v8 = vrot.slane %v2847_v53, 2  ;;  %v2812_v9 = vadd.f32 %v9245_v32, %v2598_v61  ;;  %v2600_v10 = vpop.f32.mrb[13].mxu1  ;;  %v3033_v12 = vmax.f32 %v2838_v22, %v2942_v57 }
 0x19a   : > { %v2951_v47 = vrot.slane %v2848_v60, 1  ;;  %v3106_v15 = vrot.slane %v2848_v60, 2  ;;  %v2813_v48 = vadd.f32 %v9248_v33, %v2600_v10  ;;  %v9292_v14 = vmax.f32 %v3032_v62, %v3095_v54 }
 0x19b   : > { %v2950_v16 = vsel %vm711_vm0, %v2939_v51, %v2949_v6  ;;  %v2852_v18 = vmax.f32 %v2812_v9, 0.0  ;;  %v3105_v30 = vsel %vm1463_vm2, %v3094_v39, %v3104_v8  ;;  %v9296_v43 = vmax.f32 %v3033_v12, %v3097_v1 }
 0x19c   : > { %11885 = vst [vmem:[#allocation12_spill] sm:$0xff] %v9292_v14  ;;  %v2952_v0 = vsel %vm711_vm0, %v2941_v44, %v2951_v47  ;;  %v2853_v55 = vmax.f32 %v2813_v48, 0.0  ;;  %v2604_v21 = vpop.f32.mrb[14].mxu1  ;;  %v3037_v63 = vmax.f32 %v2842_v17, %v2950_v16  ;;  %v3107_v22 = vsel %vm1463_vm2, %v3096_v45, %v3106_v15 }
 0x19d   : > { %v2959_v23 = vrot.slane %v2852_v18, 1  ;;  %v3114_v24 = vrot.slane %v2852_v18, 2  ;;  %v2817_v2 = vadd.f32 %v9245_v32, %v2604_v21  ;;  %v2606_v5 = vpop.f32.mrb[15].mxu1  ;;  %v3038_v25 = vmax.f32 %v2843_v36, %v2952_v0 }
 0x19e   : > { %v2961_v3 = vrot.slane %v2853_v55, 1  ;;  %v3116_v20 = vrot.slane %v2853_v55, 2  ;;  %v2818_v4 = vadd.f32 %v9248_v33, %v2606_v5  ;;  %v9302_v26 = vmax.f32 %v3037_v63, %v3105_v30 }
 0x19f   : > { %v2960_v13 = vsel %vm711_vm0, %v2949_v6, %v2959_v23  ;;  %v9305_v28 = vmax.f32 %v2817_v2, 0.0  ;;  %v3115_v38 = vsel %vm1463_vm2, %v3104_v8, %v3114_v24  ;;  %v9308_v17 = vmax.f32 %v3038_v25, %v3107_v22 }
 0x1a0   : > { %11886 = vst [vmem:[#allocation13_spill] sm:$0xff] %v9302_v26  ;;  %v2962_v34 = vsel %vm711_vm0, %v2951_v47, %v2961_v3  ;;  %v9311_v35 = vmax.f32 %v2818_v4, 0.0  ;;  %v3042_v32 = vmax.f32 %v2847_v53, %v2960_v13  ;;  %v3117_v36 = vsel %vm1463_vm2, %v3106_v15, %v3116_v20 }
 0x1a1   : > { %v2969_v37 = vrot.slane %v9305_v28, 1  ;;  %v11839_v33 = vrot.slane %v9305_v28, 2  ;;  %v3043_v59 = vmax.f32 %v2848_v60, %v2962_v34  ;;  %v11834_v57 = vsub.s32 0, %v9235_v11 }
 0x1a2   : > { %v11838_v29 = vrot.slane %v9311_v35, 1  ;;  %v11837_v51 = vrot.slane %v9311_v35, 2  ;;  %v9318_v39 = vmax.f32 %v3042_v32, %v3115_v38  ;;  %v11833_v60 = vsub.s32 1, %v9235_v11 }
 0x1a3   : > { %v2970_v40 = vsel %vm711_vm0, %v2959_v23, %v2969_v37  ;;  %v3125_v42 = vsel %vm1463_vm2, %v3114_v24, %v11839_v33  ;;  %v9326_v41 = vmax.f32 %v3043_v59, %v3117_v36  ;;  %v9343_v61 = vrot.slane %v9241_v27, %v11834_v57 }
 0x1a4   : > { %v2972_v44 = vsel %vm711_vm0, %v2961_v3, %v11838_v29  ;;  %v3047_v45 = vmax.f32 %v2852_v18, %v2970_v40  ;;  %v3127_v46 = vsel %vm1463_vm2, %v3116_v20, %v11837_v51  ;;  %v9348_v62 = vrot.slane %v9241_v27, %v11833_v60 }
 0x1a5   : > { %v3048_v49 = vmax.f32 %v2853_v55, %v2972_v44 }
 0x1a6   : > { %v9334_v53 = vmax.f32 %v3047_v45, %v3125_v42 }
 0x1a7   : > { %v9336_v54 = vmax.f32 %v3048_v49, %v3127_v46 }
 0x1bf   : > { %v2449_v1 = vpop.f32.mrb[0].mxu0 }
 0x1c0   : > { %v2780_v6 = vadd.f32 %v9343_v61, %v2449_v1  ;;  %v2451_v8 = vpop.f32.mrb[1].mxu0 }
 0x1c1   : > { %v2781_v9 = vadd.f32 %v9348_v62, %v2451_v8 }
 0x1c2   : > { %v2820_v10 = vmax.f32 %v2780_v6, 0.0 }
 0x1c3   : > { %v2455_v12 = vpop.f32.mrb[2].mxu0  ;;  %v2821_v47 = vmax.f32 %v2781_v9, 0.0 }
 0x1c4   : > { %v2785_v15 = vadd.f32 %v9343_v61, %v2455_v12  ;;  %v2457_v48 = vpop.f32.mrb[3].mxu0  ;;  %v2900_v30 = vrot.slane %v2820_v10, 1  ;;  %v3055_v0 = vrot.slane %v2820_v10, 2 }
 0x1c5   : > { %v2786_v16 = vadd.f32 %v9348_v62, %v2457_v48  ;;  %v2903_v63 = vrot.slane %v2821_v47, 1  ;;  %v3058_v5 = vrot.slane %v2821_v47, 2 }
 0x1c6   : > { %v2825_v18 = vmax.f32 %v2785_v15, 0.0 }
 0x1c7   : > { %v9354_v55 = vmax.f32 %v2786_v16, 0.0  ;;  %v2461_v21 = vpop.f32.mrb[4].mxu0 }
 0x1c8   : > { %v2901_v22 = vrot.slane %v2825_v18, 1  ;;  %v3056_v23 = vrot.slane %v2825_v18, 2  ;;  %v2790_v24 = vadd.f32 %v9343_v61, %v2461_v21  ;;  %v2463_v2 = vpop.f32.mrb[5].mxu0 }
 0x1c9   : > { %v2904_v25 = vrot.slane %v9354_v55, 1  ;;  %v3059_v3 = vrot.slane %v9354_v55, 2  ;;  %v2791_v20 = vadd.f32 %v9348_v62, %v2463_v2 }
 0x1ca   : > { %v2902_v4 = vsel %vm711_vm0, %v2900_v30, %v2901_v22  ;;  %v9361_v13 = vmax.f32 %v2790_v24, 0.0  ;;  %v3057_v38 = vsel %vm1463_vm2, %v3055_v0, %v3056_v23 }
 0x1cb   : > { %v9364_v34 = vmax.f32 %v2791_v20, 0.0  ;;  %v2467_v32 = vpop.f32.mrb[6].mxu0  ;;  %v2905_v36 = vsel %vm711_vm0, %v2903_v63, %v2904_v25  ;;  %v3060_v59 = vsel %vm1463_vm2, %v3058_v5, %v3059_v3  ;;  %v3015_v40 = vmax.f32 %v2820_v10, %v2902_v4 }
 0x1cc   : > { %v2915_v42 = vrot.slane %v9361_v13, 1  ;;  %v3070_v44 = vrot.slane %v9361_v13, 2  ;;  %v2795_v45 = vadd.f32 %v9343_v61, %v2467_v32  ;;  %v2469_v46 = vpop.f32.mrb[7].mxu0  ;;  %v3016_v49 = vmax.f32 %v2821_v47, %v2905_v36 }
 0x1cd   : > { %v2917_v1 = vrot.slane %v9364_v34, 1  ;;  %v3072_v6 = vrot.slane %v9364_v34, 2  ;;  %v2796_v8 = vadd.f32 %v9348_v62, %v2469_v46  ;;  %v9374_v9 = vmax.f32 %v3015_v40, %v3057_v38 }
 0x1ce   : > { %v2916_v12 = vsel %vm711_vm0, %v2901_v22, %v2915_v42  ;;  %v9377_v15 = vmax.f32 %v2795_v45, 0.0  ;;  %v9379_v10 = vmax.f32 %v3016_v49, %v3060_v59  ;;  %v3071_v48 = vsel %vm1463_vm2, %v3056_v23, %v3070_v44 }
 0x1cf   : > { %v2918_v47 = vsel %vm711_vm0, %v2904_v25, %v2917_v1  ;;  %v9385_v16 = vmax.f32 %v2796_v8, 0.0  ;;  %v2473_v30 = vpop.f32.mrb[8].mxu0  ;;  %v3020_v0 = vmax.f32 %v2825_v18, %v2916_v12  ;;  %v3073_v21 = vsel %vm1463_vm2, %v3059_v3, %v3072_v6 }
 0x1d0   : > { %v2925_v63 = vrot.slane %v9377_v15, 1  ;;  %v2800_v22 = vadd.f32 %v9343_v61, %v2473_v30  ;;  %v2475_v24 = vpop.f32.mrb[9].mxu0  ;;  %v7748_v2 = vpack.i.bf16 %v9262_v19, %v9379_v10  ;;  %v2773_v5 = vsub.s32 4, %v9235_v11 }
 0x1d1   : > { %v2927_v23 = vrot.slane %v9385_v16, 1  ;;  %v3082_v25 = vrot.slane %v9385_v16, 2  ;;  %v2801_v20 = vadd.f32 %v9348_v62, %v2475_v24  ;;  %v9400_v3 = vmax.f32 %v3020_v0, %v3071_v48 }
 0x1d2   : > { %v2926_v18 = vsel %vm711_vm0, %v2915_v42, %v2925_v63  ;;  %v9397_v4 = vmax.f32 %v2800_v22, 0.0  ;;  %7749 = vrot.lane.b32.xlu1 %v7748_v2, %s11872_s20  ;;  %v3021_v38 = vmax.f32 %v9354_v55, %v2918_v47  ;;  %7744 = vrot.lane.b32.xlu0 %v7748_v2, %s11874_s22  ;;  %v9421_v8 = vmax.f32 %v9305_v28, %v2969_v37 }
 0x1d3   : > { %v2928_v32 = vsel %vm711_vm0, %v2917_v1, %v2927_v23  ;;  %v9404_v36 = vmax.f32 %v2801_v20, 0.0  ;;  %v2479_v59 = vpop.f32.mrb[10].mxu0  ;;  %v3083_v40 = vsel %vm1463_vm2, %v3072_v6, %v3082_v25  ;;  %v3025_v42 = vmax.f32 %v9361_v13, %v2926_v18 }
 0x1d4   : > { %v2935_v45 = vrot.slane %v9397_v4, 1  ;;  %v2805_v46 = vadd.f32 %v9343_v61, %v2479_v59  ;;  %v2481_v49 = vpop.f32.mrb[11].mxu0  ;;  %v7753_v55 = vpack.i.bf16 %v9400_v3, %v9374_v9  ;;  %v9416_v1 = vrot.slane %v9241_v27, %v2773_v5 }
 0x1d5   : > { %v2937_v6 = vrot.slane %v9404_v36, 1  ;;  %v2806_v12 = vadd.f32 %v9348_v62, %v2481_v49  ;;  %v9425_v48 = vmax.f32 %v3021_v38, %v3073_v21  ;;  %v3080_v47 = vrot.slane %v9377_v15, 2 }
 0x1d6   : > { %v2936_v30 = vsel %vm711_vm0, %v2925_v63, %v2935_v45  ;;  %v9429_v0 = vmax.f32 %v2805_v46, 0.0  ;;  %7754 = vrot.lane.b32.xlu1 %v7753_v55, %s11874_s22  ;;  %v3026_v27 = vmax.f32 %v9364_v34, %v2928_v32  ;;  %v11841_v22 = vrot.slane %v9397_v4, 2 }
 0x1d7   : > { %v2938_v37 = vsel %vm711_vm0, %v2927_v23, %v2937_v6  ;;  %v9435_v24 = vmax.f32 %v2806_v12, 0.0  ;;  %v7763_v21 = vpack.i.bf16 %v9272_v31, %v9425_v48  ;;  %v2485_v2 = vpop.f32.mrb[12].mxu0  ;;  %v3092_v38 = vrot.slane %v9404_v36, 2 }
 0x1d8   : > { %v2945_v5 = vrot.slane %v9429_v0, 1  ;;  %v2810_v63 = vadd.f32 %v9343_v61, %v2485_v2  ;;  %v2487_v20 = vpop.f32.mrb[13].mxu0  ;;  %v9441_v18 = vmax.f32 %v3026_v27, %v3083_v40  ;;  %v3030_v32 = vmax.f32 %v9377_v15, %v2936_v30 }
 0x1d9   : > { %v2947_v34 = vrot.slane %v9435_v24, 1  ;;  %7764 = vrot.lane.b32.xlu0 %v7763_v21, %s11874_s22  ;;  %v2811_v23 = vadd.f32 %v9348_v62, %v2487_v20  ;;  %v11843_v46 = vrot.slane %v9429_v0, 2  ;;  %v3081_v2 = vsel %vm1463_vm2, %v3070_v44, %v3080_v47 }
 0x1da   : > { %v9449_v59 = vsel %vm711_vm0, %v2935_v45, %v2945_v5  ;;  %v9452_v49 = vmax.f32 %v2810_v63, 0.0  ;;  %7759 = vrot.lane.b32.xlu1 %v7753_v55, %s11872_s20  ;;  %v3091_v15 = vsel %vm1463_vm2, %v3080_v47, %v11841_v22  ;;  %v7778_v55 = vpack.i.bf16 %v9282_v52, %v9441_v18 }
 0x1db   : > { %v2948_v40 = vsel %vm711_vm0, %v2937_v6, %v2947_v34  ;;  %v9456_v12 = vmax.f32 %v2811_v23, 0.0  ;;  %v2491_v27 = vpop.f32.mrb[14].mxu0  ;;  %v9468_v6 = vmax.f32 %v3025_v42, %v3081_v2  ;;  %v11840_v20 = vrot.slane %v9435_v24, 2 }
 0x1dc   : > { %v2955_v45 = vrot.slane %v9452_v49, 1  ;;  %v2815_v30 = vadd.f32 %v9343_v61, %v2491_v27  ;;  %v2493_v63 = vpop.f32.mrb[15].mxu0  ;;  %v9474_v23 = vmax.f32 %v3030_v32, %v3091_v15  ;;  %v3031_v42 = vmax.f32 %v9385_v16, %v2938_v37 }
 0x1dd   : > { %v2957_v13 = vrot.slane %v9456_v12, 1  ;;  %7769 = vrot.lane.b32.xlu0 %v7763_v21, %s11872_s20  ;;  %v2816_v44 = vadd.f32 %v9348_v62, %v2493_v63  ;;  %v3093_v27 = vsel %vm1463_vm2, %v3082_v25, %v3092_v38 }
 0x1de   : > { %v9477_v47 = vsel %vm711_vm0, %v2945_v5, %v2955_v45  ;;  %v9479_v61 = vmax.f32 %v2815_v30, 0.0  ;;  %7779 = vrot.lane.b32.xlu1 %v7778_v55, %s11872_s20  ;;  %v7788_v37 = vpack.i.bf16 %v9474_v23, %v9468_v6  ;;  %v9498_v63 = vmax.f32 %v3031_v42, %v3093_v27 }
 0x1df   : > { %v9490_v62 = vsel %vm711_vm0, %v2947_v34, %v2957_v13  ;;  %v9492_v32 = vmax.f32 %v2816_v44, 0.0  ;;  %v6575_v5 = vpop.f32.mrb[16].mxu0  ;;  %v3036_v44 = vmax.f32 %v9404_v36, %v2948_v40 }
 0x1e0   : > { %v2965_v2 = vrot.slane %v9479_v61, 1  ;;  %v2789_v15 = vadd.f32 %v6575_v5, %v9416_v1  ;;  %v2675_v30 = vpop.f32.mrb[17].mxu0  ;;  %v7798_v40 = vpack.i.bf16 %v9292_v14, %v9498_v63  ;;  %v3040_v5 = vmax.f32 %v9429_v0, %v9477_v47 }
 0x1e1   : > { %v2967_v25 = vrot.slane %v9492_v32, 1  ;;  %7774 = vrot.lane.b32.xlu0 %v7778_v55, %s11874_s22  ;;  %v2784_v34 = vadd.f32 %v9416_v1, %v2675_v30 }
 0x1e2   : > { %v9506_v60 = vsel %vm711_vm0, %v2955_v45, %v2965_v2  ;;  %v9509_v57 = vmax.f32 %v2789_v15, 0.0  ;;  %7789 = vrot.lane.b32.xlu1 %v7788_v37, %s11872_s20  ;;  %v9513_v42 = vmax.f32 %v9479_v61, %v2965_v2 }
 0x1e3   : > { %v9516_v27 = vsel %vm711_vm0, %v2957_v13, %v2967_v25  ;;  %v2824_v55 = vmax.f32 %v2784_v34, 0.0  ;;  %v6578_v7 = vpop.f32.mrb[18].mxu0  ;;  %v9524_v29 = vmax.f32 %v9492_v32, %v2967_v25  ;;  %v3035_v25 = vmax.f32 %v9397_v4, %v9449_v59 }
 0x1e4   : > { %v2913_v45 = vrot.slane %v9509_v57, 1  ;;  %v11842_v30 = vrot.slane %v9509_v57, 2  ;;  %v2799_v15 = vadd.f32 %v6578_v7, %v9416_v1  ;;  %v2685_v51 = vpop.f32.mrb[19].mxu0  ;;  %v3103_v7 = vsel %vm1463_vm2, %v3092_v38, %v11840_v20 }
 0x1e5   : > { %v2912_v2 = vrot.slane %v2824_v55, 1  ;;  %v3067_v33 = vrot.slane %v2824_v55, 2  ;;  %7784 = vrot.lane.b32.xlu0 %v7788_v37, %s11874_s22  ;;  %v2794_v13 = vadd.f32 %v9416_v1, %v2685_v51  ;;  %v9546_v21 = vmax.f32 %v3036_v44, %v3103_v7 }
 0x1e6   : > { %v9528_v34 = vmax.f32 %v2799_v15, 0.0  ;;  %7794 = vrot.lane.b32.xlu1 %v7798_v40, %s11874_s22 }
 0x1e7   : > { %v2914_v37 = vsel %vm711_vm0, %v2912_v2, %v2913_v45  ;;  %v3069_v51 = vsel %vm1463_vm2, %v3067_v33, %v11842_v30  ;;  %v9544_v15 = vmax.f32 %v2794_v13, 0.0  ;;  %v6581_v16 = vpop.f32.mrb[20].mxu0  ;;  %v7808_v44 = vpack.i.bf16 %v9302_v26, %v9546_v21 }
 0x1e8   : > { %v3019_v36 = vmax.f32 %v2824_v55, %v2914_v37  ;;  %v2933_v38 = vrot.slane %v9528_v34, 1  ;;  %v11846_v20 = vrot.slane %v9528_v34, 2  ;;  %v2809_v59 = vadd.f32 %v6581_v16, %v9416_v1  ;;  %v2695_v22 = vpop.f32.mrb[21].mxu0 }
 0x1e9   : > { %v2923_v47 = vrot.slane %v9544_v15, 1  ;;  %v11847_v2 = vrot.slane %v9544_v15, 2  ;;  %7799 = vrot.lane.b32.xlu0 %v7798_v40, %s11872_s20  ;;  %v2804_v33 = vadd.f32 %v9416_v1, %v2695_v22  ;;  %v11887_v16 = vrot.slane %v9397_v4, 2 }
 0x1ea   : > { %v9557_v13 = vmax.f32 %v3019_v36, %v3069_v51  ;;  %v9559_v55 = vmax.f32 %v2809_v59, 0.0  ;;  %7809 = vrot.lane.b32.xlu1 %v7808_v44, %s11872_s20 }
 0x1eb   : > { %v3101_v7 = vsel %vm1463_vm2, %v11887_v16, %v11843_v46  ;;  %v2924_v37 = vsel %vm711_vm0, %v2913_v45, %v2923_v47  ;;  %v2934_v30 = vsel %vm711_vm0, %v2923_v47, %v2933_v38  ;;  %v3089_v22 = vsel %vm1463_vm2, %v11847_v2, %v11846_v20  ;;  %v6584_v51 = vpop.f32.mrb[22].mxu0 }
 0x1ec   : > { %v2844_v40 = vmax.f32 %v2804_v33, 0.0  ;;  %v3029_v36 = vmax.f32 %v9544_v15, %v2934_v30  ;;  %v2953_v4 = vrot.slane %v9559_v55, 1  ;;  %v3108_v59 = vrot.slane %v9559_v55, 2  ;;  %v2705_v16 = vpop.f32.mrb[23].mxu0 }
 0x1ed   : > { %v2819_v45 = vadd.f32 %v6584_v51, %v9416_v1  ;;  %7804 = vrot.lane.b32.xlu0 %v7808_v44, %s11874_s22  ;;  %v2814_v11 = vadd.f32 %v9416_v1, %v2705_v16  ;;  %v11888_v33 = vrot.slane %v9452_v49, 2  ;;  %v11889_v20 = vrot.slane %v9429_v0, 2 }
 0x1ee   : > { %v2943_v47 = vrot.slane %v2844_v40, 1  ;;  %v3098_v46 = vrot.slane %v2844_v40, 2  ;;  %v9585_v30 = vmax.f32 %v3029_v36, %v3089_v22  ;;  %v9589_v14 = vmax.f32 %v3035_v25, %v3101_v7 }
 0x1ef   : > { %v3111_v2 = vsel %vm1463_vm2, %v11889_v20, %v11888_v33  ;;  %v9587_v26 = vmax.f32 %v2819_v45, 0.0  ;;  %v2854_v16 = vmax.f32 %v2814_v11, 0.0  ;;  %v11890_v11 = vrot.slane %v9456_v12, 2 }
 0x1f0   : > { %v9591_v51 = vmax.f32 %v3040_v5, %v3111_v2  ;;  %v2944_v52 = vsel %vm711_vm0, %v2933_v38, %v2943_v47  ;;  %v2954_v44 = vsel %vm711_vm0, %v2943_v47, %v2953_v4  ;;  %v3109_v1 = vsel %vm1463_vm2, %v3098_v46, %v3108_v59 }
 0x1f1   : > { %v3039_v31 = vmax.f32 %v2844_v40, %v2954_v44  ;;  %v2973_v0 = vrot.slane %v9587_v26, 1  ;;  %v3128_v20 = vrot.slane %v9587_v26, 2  ;;  %v2963_v36 = vrot.slane %v2854_v16, 1 }
 0x1f2   : > { %v7818_v22 = vpack.i.bf16 %v9591_v51, %v9589_v14  ;;  %v3118_v25 = vrot.slane %v2854_v16, 2  ;;  %v3041_v5 = vmax.f32 %v9435_v24, %v9490_v62  ;;  %v3122_v38 = vrot.slane %v9492_v32, 2 }
 0x1f3   : > { %v9603_v2 = vmax.f32 %v3039_v31, %v3109_v1  ;;  %v11891_v7 = vrot.slane %v9435_v24, 2  ;;  %v3045_v45 = vmax.f32 %v9452_v49, %v9506_v60  ;;  %v2964_v47 = vsel %vm711_vm0, %v2953_v4, %v2963_v36 }
 0x1f4   : > { %7819 = vrot.lane.b32.xlu1 %v7818_v22, %s11872_s20  ;;  %v2974_v33 = vsel %vm711_vm0, %v2963_v36, %v2973_v0  ;;  %v3129_v62 = vsel %vm1463_vm2, %v3118_v25, %v3128_v20  ;;  %7814 = vrot.lane.b32.xlu0 %v7818_v22, %s11874_s22  ;;  %v11892_v32 = vrot.slane %v9479_v61, 2  ;;  %v9625_v24 = vmax.f32 %v9524_v29, %v3122_v38 }
 0x1f5   : > { %v3113_v40 = vsel %vm1463_vm2, %v11891_v7, %v11890_v11  ;;  %v3049_v1 = vmax.f32 %v2854_v16, %v2974_v33  ;;  %v11894_v4 = vrot.slane %v9452_v49, 2  ;;  %v3046_v11 = vmax.f32 %v9456_v12, %v9516_v27 }
 0x1f6   : > { %v9617_v31 = vmax.f32 %v3041_v5, %v3113_v40  ;;  %v9622_v44 = vmax.f32 %v9513_v42, %v11892_v32  ;;  %v11893_v60 = vmov %v11892_v32  ;;  %v11895_v29 = vrot.slane %v9456_v12, 2 }
 0x1f7   : > { %v3121_v36 = vsel %vm1463_vm2, %v11894_v4, %v11893_v60  ;;  %v9638_v42 = vmax.f32 %v3049_v1, %v3129_v62  ;;  %v11896_v61 = vrot.slane %v9305_v28, 2  ;;  %v3024_v40 = vmax.f32 %v9509_v57, %v2924_v37 }
 0x1f8   : > { %v7828_v22 = vpack.i.bf16 %v9318_v39, %v9617_v31  ;;  %v9634_v5 = vmax.f32 %v3045_v45, %v3121_v36  ;;  %v3123_v16 = vsel %vm1463_vm2, %v11895_v29, %v3122_v38  ;;  %v11897_v27 = vrot.slane %v9544_v15, 2 }
 0x1f9   : > { %v9646_v49 = vmax.f32 %v9421_v8, %v11896_v61  ;;  %v9650_v7 = vmax.f32 %v3046_v11, %v3123_v16  ;;  %v11898_v45 = vrot.slane %v9509_v57, 2  ;;  %v3034_v38 = vmax.f32 %v9528_v34, %v2944_v52 }
 0x1fa   : > { %7829 = vrot.lane.b32.xlu0 %v7828_v22, %s11872_s20  ;;  %7824 = vrot.lane.b32.xlu1 %v7828_v22, %s11874_s22  ;;  %v7838_v28 = vpack.i.bf16 %v9622_v44, %v9634_v5  ;;  %v11899_v33 = vrot.slane %v9528_v34, 2  ;;  %v3044_v15 = vmax.f32 %v9559_v55, %v2964_v47  ;;  %v3119_v37 = vsel %vm1463_vm2, %v3108_v59, %v3118_v25 }
 0x1fb   : > { %v3079_v12 = vsel %vm1463_vm2, %v11898_v45, %v11897_v27  ;;  %v7833_v8 = vpack.i.bf16 %v9646_v49, %v9625_v24  ;;  %v7853_v1 = vpack.i.bf16 %v9334_v53, %v9650_v7  ;;  %v3054_v55 = vmax.f32 %v9587_v26, %v2973_v0 }
 0x1fc   : > { %v3099_v62 = vsel %vm1463_vm2, %v11899_v33, %v3098_v46  ;;  %v9666_v32 = vmax.f32 %v3024_v40, %v3079_v12  ;;  %v9676_v52 = vmax.f32 %v3044_v15, %v3119_v37  ;;  %v7863_v46 = vpack.i.bf16 %v9557_v13, %v9266_v58 }
 0x1fd   : > { %v9670_v57 = vmax.f32 %v3034_v38, %v3099_v62  ;;  %v7883_v59 = vpack.i.bf16 %v9585_v30, %v9286_v56  ;;  %v11900_v47 = vrot.slane %v9311_v35, 1  ;;  %v9700_v4 = vmax.f32 %v3054_v55, %v3128_v20 }
 0x1fe   : > { %7839 = vrot.lane.b32.xlu0 %v7838_v28, %s11874_s22  ;;  %7834 = vrot.lane.b32.xlu1 %v7833_v8, %s11874_s22  ;;  %v7873_v34 = vpack.i.bf16 %v9666_v32, %v9276_v50  ;;  %v11901_v36 = vrot.slane %v9311_v35, 2  ;;  %v7903_v26 = vpack.i.bf16 %v9603_v2, %v9308_v17  ;;  %v7918_v20 = vpack.i.bf16 %v9676_v52, %v9326_v41 }
 0x1ff   : > { %v7893_v25 = vpack.i.bf16 %v9670_v57, %v9296_v43  ;;  %v3053_v60 = vmax.f32 %v9311_v35, %v11900_v47  ;;  %v7928_v35 = vpack.i.bf16 %v9638_v42, %v9336_v54 }
 0x201   : > { %v9704_v22 = vmax.f32 %v3053_v60, %v11901_v36 }
 0x202   : > { %7854 = vrot.lane.b32.xlu1 %v7853_v1, %s11872_s20  ;;  %7844 = vrot.lane.b32.xlu0 %v7853_v1, %s11874_s22 }
 0x203   : > { %v7913_v0 = vpack.i.bf16 %v9700_v4, %v9704_v22 }
 0x206   : > { %7859 = vrot.lane.b32.xlu1 %v7838_v28, %s11872_s20  ;;  %7849 = vrot.lane.b32.xlu0 %v7833_v8, %s11872_s20 }
 0x20a   : > { %7864 = vrot.lane.b32.xlu0 %v7863_v46, %s11874_s22  ;;  %7874 = vrot.lane.b32.xlu1 %v7873_v34, %s11874_s22 }
 0x20e   : > { %7869 = vrot.lane.b32.xlu0 %v7863_v46, %s11872_s20  ;;  %7879 = vrot.lane.b32.xlu1 %v7873_v34, %s11872_s20 }
 0x212   : > { %7884 = vrot.lane.b32.xlu0 %v7883_v59, %s11874_s22  ;;  %7894 = vrot.lane.b32.xlu1 %v7893_v25, %s11874_s22 }
 0x216   : > { %7889 = vrot.lane.b32.xlu0 %v7883_v59, %s11872_s20  ;;  %7899 = vrot.lane.b32.xlu1 %v7893_v25, %s11872_s20 }
 0x21a   : > { %7904 = vrot.lane.b32.xlu0 %v7903_v26, %s11874_s22  ;;  %7914 = vrot.lane.b32.xlu1 %v7913_v0, %s11874_s22 }
 0x21e   : > { %7909 = vrot.lane.b32.xlu0 %v7903_v26, %s11872_s20  ;;  %7919 = vrot.lane.b32.xlu1 %v7918_v20, %s11874_s22 }
 0x222   : > { %7929 = vrot.lane.b32.xlu0 %v7928_v35, %s11874_s22  ;;  %7924 = vrot.lane.b32.xlu1 %v7918_v20, %s11872_s20  ;;  %s431_s22 = sand.u32 1, %s8017_s26  }
 0x223   : > { %s432_s30 = scalar_lea.vmem [#allocation2], %s431_s22  ;;  %s5669_s14 = scalar_lea.sflag [#allocation3], %s431_s22 }
 0x224   : > { %s5681_s16 = sshll.u32 %s432_s30, 4  ;;  %s11775_s16 = int_to_ptr.vmem [resolvable:$true] %s5681_s16 }
 0x225   : > { %s7963_s15 = scalar_lea.vmem %s11775_s16, 16 }
 0x226   : > { %7934 = vrot.lane.b32.xlu0 %v7928_v35, %s11872_s20  ;;  %7939 = vrot.lane.b32.xlu1 %v7913_v0, %s11872_s20  ;;  %s11773_s20 = scalar_lea.hbm %s11828_s13, %s6296_s24  ;;  %p7964_p11 = scmp.ne.s32.totalorder %s11775_s16, %s7963_s15 }
 0x228   : > { %p7965_p12 = pnand %p7964_p11, %p8142_p5 }
 0x22a   : > { %p7966_p13 = pneg %p7965_p12 }
 0x244   : > { %v9724_v11 = vpop.permute.xlu1 %7749  ;;  %v9726_v29 = vpop.permute.xlu0 %7744 }
 0x245   : > { %v7747_v16 = vunpack.i.h.bf16 %v9726_v29  ;;  %v7746_v61 = vunpack.i.l.bf16 %v9726_v29  ;;  %v7751_v15 = vunpack.i.l.bf16 %v9724_v11  ;;  %v7752_v1 = vunpack.i.h.bf16 %v9724_v11 }
 0x247   : > { %v3332_v28 = vsel %vm3330_vm5, %v7746_v61, %v7747_v16 }
 0x248   : > { %v7755_v40 = vpop.permute.xlu1 %7754  ;;  %v3404_v59 = vmax.f32 %v9379_v10, %v3332_v28  ;;  %v3525_v10 = vsel %vm3523_vm6, %v7751_v15, %v7752_v1 }
 0x249   : > { %v7756_v27 = vunpack.i.l.bf16 %v7755_v40  ;;  %v7757_v45 = vunpack.i.h.bf16 %v7755_v40 }
 0x24a   : > { %v3597_v28 = vmax.f32 %v3404_v59, %v3525_v10 }
 0x24b   : > { %v9730_v12 = vpop.permute.xlu0 %7764  ;;  %v3331_v8 = vsel %vm3330_vm5, %v7756_v27, %v7746_v61 }
 0x24c   : > { %v7767_v38 = vunpack.i.h.bf16 %v9730_v12  ;;  %v7766_v33 = vunpack.i.l.bf16 %v9730_v12  ;;  %v7760_v62 = vpop.permute.xlu1 %7759  ;;  %v3403_v25 = vmax.f32 %v9374_v9, %v3331_v8 }
 0x24d   : > { %v7761_v37 = vunpack.i.l.bf16 %v7760_v62  ;;  %v7762_v55 = vunpack.i.h.bf16 %v7760_v62 }
 0x24e   : > { %v3335_v46 = vsel %vm3330_vm5, %v7757_v45, %v7766_v33  ;;  %v3336_v34 = vsel %vm3330_vm5, %v7766_v33, %v7767_v38 }
 0x24f   : > { %v3524_v47 = vsel %vm3523_vm6, %v7761_v37, %v7751_v15  ;;  %v9747_v60 = vpop.permute.xlu0 %7769  ;;  %v3408_v20 = vmax.f32 %v9400_v3, %v3335_v46  ;;  %v3409_v35 = vmax.f32 %v9425_v48, %v3336_v34 }
 0x250   : > { %v11858_v36 = vunpack.i.h.bf16 %v9747_v60  ;;  %v7771_v26 = vunpack.i.l.bf16 %v9747_v60  ;;  %v9751_v0 = vpop.permute.xlu1 %7779  ;;  %v3596_v61 = vmax.f32 %v3403_v25, %v3524_v47 }
 0x251   : > { %v11852_v59 = vunpack.i.h.bf16 %v9751_v0 }
 0x252   : > { %v3528_v9 = vsel %vm3523_vm6, %v7762_v55, %v7771_v26  ;;  %v3529_v40 = vsel %vm3523_vm6, %v7771_v26, %v11858_v36 }
 0x253   : > { %v3601_v27 = vmax.f32 %v3408_v20, %v3528_v9  ;;  %v9762_v45 = vpop.permute.xlu0 %7774  ;;  %v3602_v8 = vmax.f32 %v3409_v35, %v3529_v40  ;;  %v7781_v20 = vunpack.i.l.bf16 %v9751_v0 }
 0x254   : > { %v11856_v3 = vunpack.i.h.bf16 %v9762_v45  ;;  %v7776_v48 = vunpack.i.l.bf16 %v9762_v45  ;;  %v7790_v33 = vpop.permute.xlu1 %7789 }
 0x255   : > { %v6964_v62 = vpack.c.bf16 %v3602_v8, %v3597_v28  ;;  %v6966_v37 = vpack.c.bf16 %v3601_v27, %v3596_v61  ;;  %v7792_v35 = vunpack.i.h.bf16 %v7790_v33  ;;  %v7791_v61 = vunpack.i.l.bf16 %v7790_v33 }
 0x256   : > { %v3340_v46 = vsel %vm3330_vm5, %v7776_v48, %v11856_v3 }
 0x257   : > { %6965 = vmatprep.subr.bf16.mxu1 %v6964_v62  ;;  %v7785_v15 = vpop.permute.xlu0 %7784  ;;  %v3414_v9 = vmax.f32 %v9441_v18, %v3340_v46  ;;  %v3533_v18 = vsel %vm3523_vm6, %v7781_v20, %v11852_v59 }
 0x258   : > { %v7786_v34 = vunpack.i.l.bf16 %v7785_v15  ;;  %6967 = vmatpush1.bf16.msra.mxu1 %v6966_v37  ;;  %v9769_v55 = vpop.permute.xlu1 %7794  ;;  %v7787_v25 = vunpack.i.h.bf16 %v7785_v15 }
 0x259   : > { %v11855_v47 = vunpack.i.h.bf16 %v9769_v55  ;;  %v7796_v26 = vunpack.i.l.bf16 %v9769_v55 }
 0x25a   : > { %v3339_v10 = vsel %vm3330_vm5, %v7786_v34, %v7776_v48 }
 0x25b   : > { %v3413_v40 = vmax.f32 %v9468_v6, %v3339_v10  ;;  %v9778_v27 = vpop.permute.xlu0 %7799  ;;  %v3343_v28 = vsel %vm3330_vm5, %v7787_v25, %v7796_v26  ;;  %v3344_v8 = vsel %vm3330_vm5, %v7796_v26, %v11855_v47  ;;  %v3532_v6 = vsel %vm3523_vm6, %v7791_v61, %v7781_v20 }
 0x25c   : > { %v11854_v62 = vunpack.i.h.bf16 %v9778_v27  ;;  %v7801_v37 = vunpack.i.l.bf16 %v9778_v27  ;;  %v3418_v33 = vmax.f32 %v9474_v23, %v3343_v28  ;;  %v3419_v48 = vmax.f32 %v9498_v63, %v3344_v8  ;;  %v9796_v34 = vpop.permute.xlu1 %7809 }
 0x25d   : > { %v3606_v25 = vmax.f32 %v3413_v40, %v3532_v6  ;;  %v3607_v23 = vmax.f32 %v3414_v9, %v3533_v18  ;;  %v7811_v9 = vunpack.i.l.bf16 %v9796_v34 }
 0x25e   : > { %v3536_v15 = vsel %vm3523_vm6, %v7792_v35, %v7801_v37  ;;  %v3537_v46 = vsel %vm3523_vm6, %v7801_v37, %v11854_v62 }
 0x25f   : > { %v3611_v26 = vmax.f32 %v3418_v33, %v3536_v15  ;;  %v9798_v10 = vpop.permute.xlu0 %7804  ;;  %v3612_v63 = vmax.f32 %v3419_v48, %v3537_v46  ;;  %v11857_v33 = vunpack.i.h.bf16 %v9796_v34 }
 0x260   : > { %v11853_v59 = vunpack.i.h.bf16 %v9798_v10  ;;  %v7806_v20 = vunpack.i.l.bf16 %v9798_v10 }
 0x261   : > { %v6968_v28 = vpack.c.bf16 %v3612_v63, %v3607_v23  ;;  %v6970_v8 = vpack.c.bf16 %v3611_v26, %v3606_v25 }
 0x262   : > { %v3348_v37 = vsel %vm3330_vm5, %v7806_v20, %v11853_v59 }
 0x263   : > { %6969 = vmatprep.subr.bf16.mxu1 %v6968_v28  ;;  %v3424_v18 = vmax.f32 %v9546_v21, %v3348_v37  ;;  %v3541_v21 = vsel %vm3523_vm6, %v7811_v9, %v11857_v33 }
 0x264   : > { %6971 = vmatpush1.bf16.msra.mxu1 %v6970_v8 }
 0x265   : > { %v3617_v47 = vmax.f32 %v3424_v18, %v3541_v21 }
 0x266   : > { %v7820_v35 = vpop.permute.xlu1 %7819  ;;  %v7815_v61 = vpop.permute.xlu0 %7814 }
 0x267   : > { %v7816_v40 = vunpack.i.l.bf16 %v7815_v61  ;;  %v7821_v6 = vunpack.i.l.bf16 %v7820_v35  ;;  %v7817_v15 = vunpack.i.h.bf16 %v7815_v61 }
 0x269   : > { %v3347_v48 = vsel %vm3330_vm5, %v7816_v40, %v7806_v20  ;;  %v7822_v20 = vunpack.i.h.bf16 %v7820_v35  ;;  %v3540_v37 = vsel %vm3523_vm6, %v7821_v6, %v7811_v9 }
 0x26a   : > { %v3423_v46 = vmax.f32 %v9589_v14, %v3347_v48 }
 0x26c   : > { %v9810_v25 = vpop.permute.xlu0 %7829  ;;  %v9812_v26 = vpop.permute.xlu1 %7824  ;;  %v3616_v3 = vmax.f32 %v3423_v46, %v3540_v37 }
 0x26d   : > { %v11859_v23 = vunpack.i.h.bf16 %v9810_v25  ;;  %v7831_v63 = vunpack.i.l.bf16 %v9810_v25  ;;  %v7827_v28 = vunpack.i.h.bf16 %v9812_v26  ;;  %v7826_v8 = vunpack.i.l.bf16 %v9812_v26 }
 0x26f   : > { %v3351_v61 = vsel %vm3330_vm5, %v7817_v15, %v7826_v8  ;;  %v3352_v14 = vsel %vm3330_vm5, %v7826_v8, %v7827_v28  ;;  %v3544_v33 = vsel %vm3523_vm6, %v7822_v20, %v7831_v63  ;;  %v3545_v35 = vsel %vm3523_vm6, %v7831_v63, %v11859_v23 }
 0x270   : > { %v3428_v40 = vmax.f32 %v9591_v51, %v3351_v61  ;;  %v3429_v48 = vmax.f32 %v9617_v31, %v3352_v14  ;;  %v7840_v59 = vpop.permute.xlu0 %7839  ;;  %v9828_v62 = vpop.permute.xlu1 %7834 }
 0x271   : > { %v7842_v15 = vunpack.i.h.bf16 %v7840_v59  ;;  %v7837_v8 = vunpack.i.h.bf16 %v9828_v62  ;;  %v7836_v9 = vunpack.i.l.bf16 %v9828_v62  ;;  %v7841_v46 = vunpack.i.l.bf16 %v7840_v59 }
 0x272   : > { %v3621_v36 = vmax.f32 %v3428_v40, %v3544_v33  ;;  %v3622_v51 = vmax.f32 %v3429_v48, %v3545_v35 }
 0x273   : > { %v3359_v63 = vsel %vm3330_vm5, %v7842_v15, %v7836_v9  ;;  %v3360_v33 = vsel %vm3330_vm5, %v7836_v9, %v7837_v8 }
 0x274   : > { %v9836_v6 = vpop.permute.xlu1 %7854  ;;  %v9838_v31 = vpop.permute.xlu0 %7844  ;;  %v6972_v61 = vpack.c.bf16 %v3622_v51, %v3617_v47  ;;  %v6974_v18 = vpack.c.bf16 %v3621_v36, %v3616_v3  ;;  %v3438_v51 = vmax.f32 %v9622_v44, %v3359_v63 }
 0x275   : > { %v11860_v21 = vunpack.i.h.bf16 %v9838_v31  ;;  %v7846_v20 = vunpack.i.l.bf16 %v9838_v31  ;;  %v7857_v14 = vunpack.i.h.bf16 %v9836_v6  ;;  %v7856_v37 = vunpack.i.l.bf16 %v9836_v6 }
 0x276   : > { %6973 = vmatprep.subr.bf16.mxu1 %v6972_v61  ;;  %v3439_v61 = vmax.f32 %v9625_v24, %v3360_v33 }
 0x277   : > { %v3355_v40 = vsel %vm3330_vm5, %v7841_v46, %v7846_v20  ;;  %v3356_v36 = vsel %vm3330_vm5, %v7846_v20, %v11860_v21  ;;  %6975 = vmatpush1.bf16.msra.mxu1 %v6974_v18 }
 0x278   : > { %v3434_v3 = vmax.f32 %v9650_v7, %v3356_v36  ;;  %v7860_v59 = vpop.permute.xlu1 %7859  ;;  %v9853_v47 = vpop.permute.xlu0 %7849  ;;  %v3433_v46 = vmax.f32 %v9634_v5, %v3355_v40  ;;  %v3549_v7 = vsel %vm3523_vm6, %v7856_v37, %v7857_v14 }
 0x279   : > { %v7862_v48 = vunpack.i.h.bf16 %v7860_v59  ;;  %v7861_v35 = vunpack.i.l.bf16 %v7860_v59  ;;  %v7852_v15 = vunpack.i.h.bf16 %v9853_v47  ;;  %v7851_v9 = vunpack.i.l.bf16 %v9853_v47 }
 0x27a   : > { %v3627_v59 = vmax.f32 %v3434_v3, %v3549_v7  ;;  %v9907_v7 = vld [vmem:[%s11818_s3] sm:$0xff]  ;;  %v452_v3 = vld [vmem:[%s11819_s4 + $0x58] sm:$0xff] }
 0x27b   : > { %v3548_v18 = vsel %vm3523_vm6, %v7861_v35, %v7856_v37  ;;  %v3552_v20 = vsel %vm3523_vm6, %v7862_v48, %v7851_v9  ;;  %v3553_v36 = vsel %vm3523_vm6, %v7851_v9, %v7852_v15 }
 0x27c   : > { %v3626_v23 = vmax.f32 %v3433_v46, %v3548_v18  ;;  %v3631_v21 = vmax.f32 %v3438_v51, %v3552_v20  ;;  %v3632_v44 = vmax.f32 %v3439_v61, %v3553_v36  ;;  %v9868_v63 = vpop.permute.xlu0 %7864  ;;  %v9870_v24 = vpop.permute.xlu1 %7874 }
 0x27d   : > { %v11866_v5 = vunpack.i.h.bf16 %v9868_v63  ;;  %v7866_v33 = vunpack.i.l.bf16 %v9868_v63  ;;  %v11864_v37 = vunpack.i.h.bf16 %v9870_v24  ;;  %v7876_v40 = vunpack.i.l.bf16 %v9870_v24 }
 0x27e   : > { %v6979_v48 = vpack.c.bf16 %v3631_v21, %v3626_v23  ;;  %v6976_v35 = vpack.c.bf16 %v3632_v44, %v3627_v59  ;;  %v11904_v44 = vld [vmem:[#allocation10_spill] sm:$0xff]  ;;  %v11918_v6 = vunpack.i.h.bf16 %v9868_v63 }
 0x27f   : > { %v3333_v9 = vsel %vm3330_vm5, %v7747_v16, %v7866_v33  ;;  %v3334_v51 = vsel %vm3330_vm5, %v7866_v33, %v11866_v5  ;;  %v3337_v23 = vsel %vm3330_vm5, %v7767_v38, %v7876_v40  ;;  %v3338_v29 = vsel %vm3330_vm5, %v7876_v40, %v11864_v37 }
 0x280   : > { %6978 = vmatprep.subr.msk.bf16.mxu1 %vm9878_vm9, %v6976_v35  ;;  %v9890_v61 = vpop.permute.xlu0 %7869  ;;  %v9892_v46 = vpop.permute.xlu1 %7879  ;;  %v3405_v18 = vmax.f32 %v9262_v19, %v3333_v9  ;;  %v3406_v20 = vmax.f32 %v9266_v58, %v3334_v51  ;;  %v3410_v33 = vmax.f32 %v11904_v44, %v3337_v23  ;;  %v3411_v40 = vmax.f32 %v9276_v50, %v3338_v29  ;;  %v9940_v23 = vld [vmem:[%s11818_s3 + $0x8] sm:$0xff] }
 0x281   : > { %v11862_v16 = vunpack.i.h.bf16 %v9890_v61  ;;  %v7871_v21 = vunpack.i.l.bf16 %v9890_v61  ;;  %6981 = vmatpush1.bf16.msk.msra.mxu1 %vm9878_vm9, %v6979_v48  ;;  %v11861_v12 = vunpack.i.h.bf16 %v9892_v46  ;;  %v7881_v38 = vunpack.i.l.bf16 %v9892_v46 }
 0x282   : > { %v11905_v48 = vunpack.i.h.bf16 %v9747_v60  ;;  %v11906_v51 = vmov 0.0   ;;  %v11910_v37 = vunpack.i.h.bf16 %v9751_v0 }
 0x283   : > { %v3526_v36 = vsel %vm3523_vm6, %v7752_v1, %v7871_v21  ;;  %v3527_v59 = vsel %vm3523_vm6, %v7871_v21, %v11862_v16  ;;  %v3531_v19 = vsel %vm3523_vm6, %v7881_v38, %v11861_v12 }
 0x284   : > { %v3530_v35 = vsel %vm3523_vm6, %v11905_v48, %v7881_v38  ;;  %6024 = vmatmul.mubr.msk.f32.vlgmr.msra.gmra.mrb[16].mxu1 %vm3636_vm10, %v9907_v7  ;;  %v9929_v58 = vpop.permute.xlu0 %7884  ;;  %v9931_v11 = vpop.permute.xlu1 %7894  ;;  %v3598_v1 = vmax.f32 %v3405_v18, %v3526_v36  ;;  %v3599_v38 = vmax.f32 %v3406_v20, %v3527_v59  ;;  %v3604_v44 = vmax.f32 %v3411_v40, %v3531_v19 }
 0x285   : > { %v11863_v9 = vunpack.i.h.bf16 %v9929_v58  ;;  %v7886_v50 = vunpack.i.l.bf16 %v9929_v58  ;;  %v11865_v60 = vunpack.i.h.bf16 %v9931_v11  ;;  %3732 = vmatprep.mubr.f32.mxu1 %v11906_v51  ;;  %v3603_v29 = vmax.f32 %v3410_v33, %v3530_v35 }
 0x286   : > { %v7896_v21 = vunpack.i.l.bf16 %v9931_v11  ;;  %v11907_v18 = vunpack.i.h.bf16 %v9762_v45  ;;  %v11908_v33 = vunpack.i.h.bf16 %v9769_v55  ;;  %v6982_v35 = vpack.c.bf16 %v3604_v44, %v3599_v38  ;;  %v9977_v38 = vld [vmem:[%s11818_s3 + $0x10] sm:$0xf]  ;;  %v11911_v44 = vld [vmem:[#allocation12_spill] sm:$0xff] }
 0x287   : > { %v3342_v48 = vsel %vm3330_vm5, %v7886_v50, %v11863_v9  ;;  %v11909_v9 = vld [vmem:[#allocation11_spill] sm:$0xff]  ;;  %v11922_v63 = vunpack.i.h.bf16 %v9929_v58 }
 0x288   : > { %v3341_v36 = vsel %vm3330_vm5, %v11907_v18, %v7886_v50  ;;  %v9949_v12 = vpop.permute.xlu0 %7889  ;;  %v9951_v16 = vpop.permute.xlu1 %7899  ;;  %6025 = vmatmul.mubr.msk.f32.gmra.mrb[18].mxu1 %vm3636_vm10, %v9940_v23  ;;  %v3345_v20 = vsel %vm3330_vm5, %v11908_v33, %v7896_v21  ;;  %v3346_v45 = vsel %vm3330_vm5, %v7896_v21, %v11865_v60  ;;  %v6984_v18 = vpack.c.bf16 %v3603_v29, %v3598_v1 }
 0x289   : > { %v7892_v59 = vunpack.i.h.bf16 %v9949_v12  ;;  %v7891_v40 = vunpack.i.l.bf16 %v9949_v12  ;;  %3738 = vmatprep.mubr.f32.mxu1 %v11906_v51  ;;  %v7902_v19 = vunpack.i.h.bf16 %v9951_v16  ;;  %v7901_v50 = vunpack.i.l.bf16 %v9951_v16  ;;  %6983 = vmatprep.subr.bf16.mxu1 %v6982_v35 }
 0x28a   : > { %v3415_v55 = vmax.f32 %v11909_v9, %v3341_v36  ;;  %v3416_v33 = vmax.f32 %v9286_v56, %v3342_v48  ;;  %v3420_v5 = vmax.f32 %v11911_v44, %v3345_v20  ;;  %v3421_v1 = vmax.f32 %v9296_v43, %v3346_v45  ;;  %6985 = vmatpush1.bf16.msra.mxu1 %v6984_v18 }
 0x28b   : > { %v3534_v21 = vsel %vm3523_vm6, %v11910_v37, %v7891_v40  ;;  %v3535_v60 = vsel %vm3523_vm6, %v7891_v40, %v7892_v59  ;;  %v11912_v56 = vunpack.i.h.bf16 %v9778_v27  ;;  %v3539_v37 = vsel %vm3523_vm6, %v7901_v50, %v7902_v19 }
 0x28c   : > { %v9987_v9 = vpop.permute.xlu0 %7904  ;;  %v9989_v29 = vpop.permute.xlu1 %7914  ;;  %v3608_v20 = vmax.f32 %v3415_v55, %v3534_v21  ;;  %v3609_v45 = vmax.f32 %v3416_v33, %v3535_v60  ;;  %v3614_v40 = vmax.f32 %v3421_v1, %v3539_v37  ;;  %6026 = vmatmul.mubr.msk.f32.gmra.mrb[20].mxu1 %vm3636_vm10, %v9977_v38  ;;  %v11913_v18 = vunpack.i.h.bf16 %v9798_v10 }
 0x28d   : > { %v3538_v0 = vsel %vm3523_vm6, %v11912_v56, %v7901_v50  ;;  %v11868_v36 = vunpack.i.h.bf16 %v9987_v9  ;;  %v7906_v48 = vunpack.i.l.bf16 %v9987_v9  ;;  %v7916_v27 = vunpack.i.l.bf16 %v9989_v29  ;;  %3809 = vmatprep.mubr.f32.mxu1 %v11906_v51 }
 0x28e   : > { %v3613_v43 = vmax.f32 %v3420_v5, %v3538_v0  ;;  %v11867_v60 = vunpack.i.h.bf16 %v9989_v29  ;;  %v6986_v55 = vpack.c.bf16 %v3614_v40, %v3609_v45  ;;  %v11914_v0 = vld [vmem:[#allocation13_spill] sm:$0xff]  ;;  %v11926_v16 = vunpack.i.h.bf16 %v9989_v29 }
 0x28f   : > { %v3349_v44 = vsel %vm3330_vm5, %v11913_v18, %v7906_v48  ;;  %v3350_v5 = vsel %vm3330_vm5, %v7906_v48, %v11868_v36  ;;  %v3361_v56 = vsel %vm3330_vm5, %v7837_v8, %v7916_v27  ;;  %v442_v29 = vld [vmem:[%s11819_s4 + $0x8] sm:$0xff] }
 0x290   : > { %v9997_v35 = vpop.permute.xlu0 %7909  ;;  %v9999_v50 = vpop.permute.xlu1 %7919  ;;  %v6988_v1 = vpack.c.bf16 %v3613_v43, %v3608_v20  ;;  %v3425_v37 = vmax.f32 %v11914_v0, %v3349_v44  ;;  %6987 = vmatprep.subr.bf16.mxu1 %v6986_v55  ;;  %v3426_v20 = vmax.f32 %v9308_v17, %v3350_v5  ;;  %v3362_v26 = vsel %vm3330_vm5, %v7916_v27, %v11867_v60 }
 0x291   : > { %v11870_v33 = vunpack.i.h.bf16 %v9999_v50  ;;  %v7921_v21 = vunpack.i.l.bf16 %v9999_v50  ;;  %v7911_v10 = vunpack.i.l.bf16 %v9997_v35  ;;  %v11871_v18 = vunpack.i.h.bf16 %v9997_v35 }
 0x292   : > { %6989 = vmatpush1.bf16.msra.mxu1 %v6988_v1  ;;  %v11915_v17 = vunpack.i.h.bf16 %v9796_v34  ;;  %v11916_v1 = vunpack.i.h.bf16 %v9838_v31  ;;  %v11917_v34 = vunpack.i.h.bf16 %v9810_v25 }
 0x293   : > { %v3353_v48 = vsel %vm3330_vm5, %v7827_v28, %v7921_v21  ;;  %v3354_v62 = vsel %vm3330_vm5, %v7921_v21, %v11870_v33  ;;  %v3440_v28 = vmax.f32 %v9646_v49, %v3361_v56  ;;  %v3543_v49 = vsel %vm3523_vm6, %v7911_v10, %v11871_v18 }
 0x294   : > { %v10019_v45 = vpop.permute.xlu0 %7929  ;;  %v10021_v40 = vpop.permute.xlu1 %7924  ;;  %v3542_v5 = vsel %vm3523_vm6, %v11915_v17, %v7911_v10  ;;  %v3430_v21 = vmax.f32 %v9318_v39, %v3353_v48  ;;  %v3431_v56 = vmax.f32 %v9326_v41, %v3354_v62  ;;  %v3619_v62 = vmax.f32 %v3426_v20, %v3543_v49 }
 0x295   : > { %v11869_v8 = vunpack.i.h.bf16 %v10019_v45  ;;  %v7931_v43 = vunpack.i.l.bf16 %v10019_v45  ;;  %v7927_v44 = vunpack.i.h.bf16 %v10021_v40  ;;  %v7926_v55 = vunpack.i.l.bf16 %v10021_v40 }
 0x296   : > { %v3618_v18 = vmax.f32 %v3425_v37, %v3542_v5 }
 0x297   : > { %v3357_v0 = vsel %vm3330_vm5, %v11916_v1, %v7931_v43  ;;  %v3358_v27 = vsel %vm3330_vm5, %v7931_v43, %v11869_v8  ;;  %v3546_v40 = vsel %vm3523_vm6, %v11917_v34, %v7926_v55  ;;  %v3547_v39 = vsel %vm3523_vm6, %v7926_v55, %v7927_v44 }
 0x298   : > { %v7935_v48 = vpop.permute.xlu0 %7934  ;;  %v7940_v31 = vpop.permute.xlu1 %7939  ;;  %v3435_v17 = vmax.f32 %v9334_v53, %v3357_v0  ;;  %v3623_v1 = vmax.f32 %v3430_v21, %v3546_v40  ;;  %v3436_v43 = vmax.f32 %v9336_v54, %v3358_v27  ;;  %v3624_v10 = vmax.f32 %v3431_v56, %v3547_v39  ;;  %v448_v39 = vld [vmem:[%s11819_s4 + $0x38] sm:$0xff] }
 0x299   : > { %v7937_v60 = vunpack.i.h.bf16 %v7935_v48  ;;  %v7936_v36 = vunpack.i.l.bf16 %v7935_v48  ;;  %v7942_v8 = vunpack.i.h.bf16 %v7940_v31  ;;  %v7941_v33 = vunpack.i.l.bf16 %v7940_v31 }
 0x29a   : > { %v3441_v55 = vmax.f32 %v9704_v22, %v3362_v26  ;;  %v6990_v27 = vpack.c.bf16 %v3624_v10, %v3619_v62  ;;  %v6992_v37 = vpack.c.bf16 %v3623_v1, %v3618_v18  ;;  %v8031_v18 = vmov 0.0|0.0   ;;  %v447_v1 = vld [vmem:[%s11819_s4 + $0x30] sm:$0xff] }
 0x29b   : > { %v3550_v41 = vsel %vm3523_vm6, %v7857_v14, %v7936_v36  ;;  %v3551_v25 = vsel %vm3523_vm6, %v7936_v36, %v7937_v60  ;;  %v3554_v21 = vsel %vm3523_vm6, %v7852_v15, %v7941_v33  ;;  %v3555_v54 = vsel %vm3523_vm6, %v7941_v33, %v7942_v8  ;;  %v451_v62 = vld [vmem:[%s11819_s4 + $0x50] sm:$0xff] }
 0x29c   : > { %v3628_v34 = vmax.f32 %v3435_v17, %v3550_v41  ;;  %v3629_v53 = vmax.f32 %v3436_v43, %v3551_v25  ;;  %v3633_v0 = vmax.f32 %v3440_v28, %v3554_v21  ;;  %v3634_v5 = vmax.f32 %v3441_v55, %v3555_v54  ;;  %6991 = vmatprep.subr.bf16.mxu1 %v6990_v27  ;;  %v445_v17 = vld [vmem:[%s11819_s4 + $0x20] sm:$0xff]  ;;  %v450_v43 = vld [vmem:[%s11819_s4 + $0x48] sm:$0xff]  ;;  %v455_v54 = vld [vmem:[%s11819_s4 + $0x70] sm:$0xff] }
 0x29d   : > { %v3407_v14 = vmax.f32 %v9557_v13, %v11918_v6  ;;  %v11919_v36 = vunpack.i.h.bf16 %v9870_v24  ;;  %6993 = vmatpush1.bf16.msra.mxu1 %v6992_v37  ;;  %v11920_v15 = vunpack.i.h.bf16 %v9890_v61  ;;  %v11921_v33 = vunpack.i.h.bf16 %v9892_v46  ;;  %v449_v25 = vld [vmem:[%s11819_s4 + $0x40] sm:$0xff]  ;;  %v454_v55 = vld [vmem:[%s11819_s4 + $0x68] sm:$0xff]  ;;  %v459_v6 = vld [vmem:[%s11819_s4 + $0x90] sm:$0xff] }
 0x29e   : > { %v6997_v20 = vpack.c.bf16 %v3633_v0, %v3628_v34  ;;  %v6994_v47 = vpack.c.bf16 %v3634_v5, %v3629_v53  ;;  %v3417_v13 = vmax.f32 %v9585_v30, %v11922_v63  ;;  %v11923_v24 = vunpack.i.h.bf16 %v9931_v11  ;;  %v453_v21 = vld [vmem:[%s11819_s4 + $0x60] sm:$0xff]  ;;  %v458_v0 = vld [vmem:[%s11819_s4 + $0x88] sm:$0xff] }
 0x29f   : > { %v3412_v22 = vmax.f32 %v9666_v32, %v11919_v36  ;;  %v3600_v26 = vmax.f32 %v3407_v14, %v11920_v15  ;;  %v11924_v30 = vunpack.i.h.bf16 %v9999_v50  ;;  %v11925_v11 = vunpack.i.h.bf16 %v9987_v9  ;;  %v457_v5 = vld [vmem:[%s11819_s4 + $0x80] sm:$0xff]  ;;  %v462_v14 = vld [vmem:[%s11819_s4 + $0xa8] sm:$0xff] }
 0x2a0   : > { %6996 = vmatprep.subr.msk.bf16.mxu1 %vm9878_vm9, %v6994_v47  ;;  %v3422_v32 = vmax.f32 %v9670_v57, %v11923_v24  ;;  %v3610_v46 = vmax.f32 %v3417_v13, %v7892_v59  ;;  %v11928_v56 = vunpack.i.h.bf16 %v10019_v45  ;;  %v7019_v10 = vpack.c.bf16 %v447_v1, %v445_v17  ;;  %v463_v47 = vld [vmem:[%s11819_s4 + $0xb0] sm:$0xff]  ;;  %v466_v15 = vld [vmem:[%s11819_s4 + $0xc8] sm:$0xff]  ;;  %v465_v63 = vld [vmem:[%s11819_s4 + $0xc0] sm:$0xff] }
 0x2a1   : > { %v3605_v28 = vmax.f32 %v3412_v22, %v11921_v33  ;;  %6999 = vmatpush1.bf16.msk.msra.mxu1 %vm9878_vm9, %v6997_v20  ;;  %v3432_v57 = vmax.f32 %v9676_v52, %v11924_v30  ;;  %v3427_v12 = vmax.f32 %v9603_v2, %v11925_v11  ;;  %v11927_v52 = vunpack.i.h.bf16 %v9997_v35  ;;  %v441_v35 = vld [vmem:[%s11819_s4] sm:$0xff]  ;;  %v467_v13 = vld [vmem:[%s11819_s4 + $0xd0] sm:$0xff]  ;;  %v470_v24 = vld [vmem:[%s11819_s4 + $0xe8] sm:$0xff] }
 0x2a2   : > { %7000 = vmatprep.subr.bf16.mxu1 %v8031_v18  ;;  %v3615_v49 = vmax.f32 %v3422_v32, %v7902_v19  ;;  %v3442_v19 = vmax.f32 %v9700_v4, %v11926_v16  ;;  %v3437_v40 = vmax.f32 %v9638_v42, %v11928_v56  ;;  %v444_v4 = vld [vmem:[%s11819_s4 + $0x18] sm:$0xff]  ;;  %v7021_v41 = vpack.c.bf16 %v452_v3, %v450_v43  ;;  %v461_v20 = vld [vmem:[%s11819_s4 + $0xa0] sm:$0xff]  ;;  %v471_v30 = vld [vmem:[%s11819_s4 + $0xf0] sm:$0xff] }
 0x2a3   : > { %v7001_v61 = vpack.c.bf16 %v3605_v28, %v3600_v26  ;;  %v3625_v59 = vmax.f32 %v3432_v57, %v7927_v44  ;;  %v3620_v50 = vmax.f32 %v3427_v12, %v11927_v52  ;;  %v7013_v42 = vpack.c.bf16 %v444_v4, %v442_v29  ;;  %v468_v26 = vld [vmem:[%s11819_s4 + $0xd8] sm:$0xff]  ;;  %v474_v57 = vld [vmem:[%s11819_s4 + $0x108] sm:$0xff]  ;;  %v475_v16 = vld [vmem:[%s11819_s4 + $0x110] sm:$0xff] }
 0x2a4   : > { %6029 = vmatmul.mubr.msk.f32.vlgmr.msra.gmra.mrb[22].mxu1 %vm3636_vm10, %v9907_v7  ;;  %v7004_v58 = vpack.c.bf16 %v3615_v49, %v3610_v46  ;;  %v3630_v9 = vmax.f32 %v3437_v40, %v7937_v60  ;;  %v3635_v44 = vmax.f32 %v3442_v19, %v7942_v8  ;;  %v443_v60 = vld [vmem:[%s11819_s4 + $0x10] sm:$0xff]  ;;  %v446_v8 = vld [vmem:[%s11819_s4 + $0x28] sm:$0xff]  ;;  %v7023_v34 = vpack.c.bf16 %v451_v62, %v449_v25  ;;  %v472_v32 = vld [vmem:[%s11819_s4 + $0xf8] sm:$0xff] }
 0x2a5   : > { %7002 = vmatpush3.bf16.msra.mxu1 %v7001_v61  ;;  %3815 = vmatprep.mubr.f32.mxu1 %v11906_v51  ;;  %v7007_v2 = vpack.c.bf16 %v3625_v59, %v3620_v50  ;;  %v7015_v48 = vpack.c.bf16 %v443_v60, %v441_v35  ;;  %v7017_v31 = vpack.c.bf16 %v448_v39, %v446_v8  ;;  %v469_v49 = vld [vmem:[%s11819_s4 + $0xe0] sm:$0xff]  ;;  %v478_v19 = vld [vmem:[%s11819_s4 + $0x128] sm:$0xff]  ;;  %v480_v52 = vld [vmem:[%s11819_s4 + $0x138] sm:$0xff] }
 0x2a6   : > { %7003 = vmatprep.subr.bf16.mxu1 %v8031_v18  ;;  %v7010_v45 = vpack.c.bf16 %v3635_v44, %v3630_v9  ;;  %v7027_v27 = vpack.c.bf16 %v455_v54, %v453_v21  ;;  %v7031_v36 = vpack.c.bf16 %v459_v6, %v457_v5  ;;  %v7035_v33 = vpack.c.bf16 %v463_v47, %v461_v20  ;;  %v473_v59 = vld [vmem:[%s11819_s4 + $0x100] sm:$0xff]  ;;  %v482_v9 = vld [vmem:[%s11819_s4 + $0x148] sm:$0xff]  ;;  %v484_v44 = vld [vmem:[%s11819_s4 + $0x158] sm:$0xff] }
 0x2a7   : > { %v7037_v28 = vpack.c.bf16 %v468_v26, %v466_v15  ;;  %v7039_v61 = vpack.c.bf16 %v467_v13, %v465_v63  ;;  %v7041_v46 = vpack.c.bf16 %v472_v32, %v470_v24  ;;  %v7043_v11 = vpack.c.bf16 %v471_v30, %v469_v49  ;;  %v477_v40 = vld [vmem:[%s11819_s4 + $0x120] sm:$0xff]  ;;  %v483_v35 = vld [vmem:[%s11819_s4 + $0x150] sm:$0xff]  ;;  %v486_v60 = vld [vmem:[%s11819_s4 + $0x168] sm:$0xff] }
 0x2a8   : > { %6030 = vmatmul.mubr.msk.f32.gmra.mrb[24].mxu1 %vm3636_vm10, %v9940_v23  ;;  %v7047_v50 = vpack.c.bf16 %v475_v16, %v473_v59  ;;  %v7049_v56 = vpack.c.bf16 %v480_v52, %v478_v19  ;;  %v7053_v4 = vpack.c.bf16 %v484_v44, %v482_v9  ;;  %v490_v17 = vld [vmem:[%s11819_s4 + $0x188] sm:$0xff]  ;;  %v492_v1 = vld [vmem:[%s11819_s4 + $0x198] sm:$0xff]  ;;  %v6041_v63 = vld [vmem:[%s11820_s5 + $0x190] sm:$0xff] }
 0x2a9   : > { %7005 = vmatpush3.bf16.msra.mxu1 %v7004_v58  ;;  %3821 = vmatprep.mubr.f32.mxu1 %v11906_v51  ;;  %v476_v58 = vld [vmem:[%s11819_s4 + $0x118] sm:$0xff]  ;;  %v7061_v3 = vpack.c.bf16 %v492_v1, %v490_v17  ;;  %v494_v25 = vld [vmem:[%s11819_s4 + $0x1a8] sm:$0xff]  ;;  %v6043_v24 = vld [vmem:[%s11820_s5 + $0x1a0] sm:$0xff] }
 0x2aa   : > { %7006 = vmatprep.subr.bf16.mxu1 %v8031_v18  ;;  %v7045_v12 = vpack.c.bf16 %v476_v58, %v474_v57  ;;  %v496_v62 = vld [vmem:[%s11819_s4 + $0x1b8] sm:$0xff]  ;;  %v498_v21 = vld [vmem:[%s11819_s4 + $0x1c8] sm:$0xff]  ;;  %v6045_v30 = vld [vmem:[%s11820_s5 + $0x1b0] sm:$0xff] }
 0x2ab   : > { %v500_v54 = vld [vmem:[%s11819_s4 + $0x1d8] sm:$0xff]  ;;  %v502_v5 = vld [vmem:[%s11819_s4 + $0x1e8] sm:$0xff]  ;;  %v6047_v57 = vld [vmem:[%s11820_s5 + $0x1c0] sm:$0xff] }
 0x2ac   : > { %6031 = vmatmul.mubr.msk.f32.gmra.mrb[26].mxu1 %vm3636_vm10, %v9977_v38  ;;  %v504_v6 = vld [vmem:[%s11819_s4 + $0x1f8] sm:$0xff]  ;;  %v506_v20 = vld [vmem:[%s11819_s4 + $0x208] sm:$0xff]  ;;  %v6049_v16 = vld [vmem:[%s11820_s5 + $0x1d0] sm:$0xff] }
 0x2ad   : > { %7008 = vmatpush3.bf16.msra.mxu1 %v7007_v2  ;;  %6601 = vmatprep.mubr.msk.f32.mxu1 %vm8032_vm11, %v11906_v51  ;;  %v479_v2 = vld [vmem:[%s11819_s4 + $0x130] sm:$0xff]  ;;  %v508_v47 = vld [vmem:[%s11819_s4 + $0x218] sm:$0xff]  ;;  %v6051_v19 = vld [vmem:[%s11820_s5 + $0x1e0] sm:$0xff] }
 0x2ae   : > { %7009 = vmatprep.subr.bf16.mxu1 %v8031_v18  ;;  %v7051_v29 = vpack.c.bf16 %v479_v2, %v477_v40  ;;  %v7077_v26 = vpack.c.bf16 %v508_v47, %v506_v20  ;;  %v6046_v32 = vld [vmem:[%s11820_s5 + $0x1b8] sm:$0xff]  ;;  %v6053_v2 = vld [vmem:[%s11820_s5 + $0x1f0] sm:$0xff]  ;;  %v6055_v9 = vld [vmem:[%s11820_s5 + $0x200] sm:$0xff] }
 0x2af   : > { %v6050_v58 = vld [vmem:[%s11820_s5 + $0x1d8] sm:$0xff]  ;;  %v6063_v17 = vld [vmem:[%s11820_s5 + $0x240] sm:$0xff]  ;;  %v6080_v20 = vld [vmem:[%s11820_s5 + $0x2c8] sm:$0xff] }
 0x2b0   : > { %v6054_v52 = vld [vmem:[%s11820_s5 + $0x1f8] sm:$0xff] }
 0x2b1   : > { %7012 = vmatpush3.bf16.msk.msra.mxu1 %vm9878_vm9, %v7010_v45  ;;  %v488_v45 = vld [vmem:[%s11819_s4 + $0x178] sm:$0xff] }
 0x2b2   : > { %7014 = vmatprep.subr.bf16.mxu1 %v7013_v42  ;;  %v481_v42 = vld [vmem:[%s11819_s4 + $0x140] sm:$0xff]  ;;  %v7057_v39 = vpack.c.bf16 %v488_v45, %v486_v60  ;;  %v6058_v44 = vld [vmem:[%s11820_s5 + $0x218] sm:$0xff] }
 0x2b3   : > { %v7055_v8 = vpack.c.bf16 %v483_v35, %v481_v42  ;;  %v6057_v35 = vld [vmem:[%s11820_s5 + $0x210] sm:$0xff]  ;;  %v6059_v60 = vld [vmem:[%s11820_s5 + $0x220] sm:$0xff]  ;;  %v6062_v45 = vld [vmem:[%s11820_s5 + $0x238] sm:$0xff] }
 0x2b4   : > { %6602 = vmatmul.mubr.msk.f32.vlgmr.msra.gmra.mrb[28].mxu1 %vm3636_vm10, %v9907_v7  ;;  %v456_v7 = vld [vmem:[%s11819_s4 + $0x78] sm:$0xff] }
 0x2b5   : > { %6604 = vmatprep.mubr.msk.f32.mxu1 %vm8032_vm11, %v11906_v51  ;;  %7016 = vmatpush1.bf16.msra.mxu1 %v7015_v48  ;;  %v7025_v53 = vpack.c.bf16 %v456_v7, %v454_v55  ;;  %v485_v48 = vld [vmem:[%s11819_s4 + $0x160] sm:$0xff]  ;;  %v7065_v7 = vpack.c.bf16 %v496_v62, %v494_v25  ;;  %v6066_v1 = vld [vmem:[%s11820_s5 + $0x258] sm:$0xff] }
 0x2b6   : > { %7018 = vmatprep.subr.bf16.mxu1 %v7017_v31  ;;  %v487_v31 = vld [vmem:[%s11819_s4 + $0x170] sm:$0xff]  ;;  %v6067_v25 = vld [vmem:[%s11820_s5 + $0x260] sm:$0xff]  ;;  %v6070_v62 = vld [vmem:[%s11820_s5 + $0x278] sm:$0xff] }
 0x2b7   : > { %v7059_v43 = vpack.c.bf16 %v487_v31, %v485_v48  ;;  %v6061_v31 = vld [vmem:[%s11820_s5 + $0x230] sm:$0xff] }
 0x2b8   : > { %6605 = vmatmul.mubr.msk.f32.gmra.mrb[30].mxu1 %vm3636_vm10, %v9940_v23  ;;  %v460_v23 = vld [vmem:[%s11819_s4 + $0x98] sm:$0xff] }
 0x2b9   : > { %6607 = vmatprep.mubr.msk.f32.mxu1 %vm8032_vm11, %v11906_v51  ;;  %7020 = vmatpush1.bf16.msra.mxu1 %v7019_v10  ;;  %v7029_v37 = vpack.c.bf16 %v460_v23, %v458_v0  ;;  %v489_v10 = vld [vmem:[%s11819_s4 + $0x180] sm:$0xff]  ;;  %v7069_v23 = vpack.c.bf16 %v500_v54, %v498_v21  ;;  %v6074_v54 = vld [vmem:[%s11820_s5 + $0x298] sm:$0xff] }
 0x2ba   : > { %7022 = vmatprep.subr.bf16.mxu1 %v7021_v41  ;;  %v491_v41 = vld [vmem:[%s11819_s4 + $0x190] sm:$0xff]  ;;  %v6071_v21 = vld [vmem:[%s11820_s5 + $0x280] sm:$0xff] }
 0x2bb   : > { %v7063_v55 = vpack.c.bf16 %v491_v41, %v489_v10  ;;  %v6065_v41 = vld [vmem:[%s11820_s5 + $0x250] sm:$0xff] }
 0x2bc   : > { %6608 = vmatmul.mubr.msk.f32.gmra.mrb[32].mxu1 %vm3636_vm10, %v9977_v38  ;;  %v464_v38 = vld [vmem:[%s11819_s4 + $0xb8] sm:$0xff] }
 0x2bd   : > { %7024 = vmatpush1.bf16.msra.mxu1 %v7023_v34  ;;  %v7033_v22 = vpack.c.bf16 %v464_v38, %v462_v14  ;;  %v493_v34 = vld [vmem:[%s11819_s4 + $0x1a0] sm:$0xff]  ;;  %v7073_v38 = vpack.c.bf16 %v504_v6, %v502_v5  ;;  %v512_v6 = vld [vmem:[%s11819_s4 + $0x238] sm:$0xff] }
 0x2be   : > { %7026 = vmatprep.subr.bf16.mxu1 %v7025_v53  ;;  %v495_v53 = vld [vmem:[%s11819_s4 + $0x1b0] sm:$0xff] }
 0x2bf   : > { %v7067_v0 = vpack.c.bf16 %v495_v53, %v493_v34  ;;  %v6069_v53 = vld [vmem:[%s11820_s5 + $0x270] sm:$0xff] }
 0x2c0   : > { %v7191_v5 = vpack.c.bf16 %v6071_v21, %v6069_v53  ;;  %v534_v53 = vld [vmem:[%s11819_s4 + $0x2e8] sm:$0xff]  ;;  %v536_v21 = vld [vmem:[%s11819_s4 + $0x2f8] sm:$0xff] }
 0x2c1   : > { %7028 = vmatpush1.bf16.msra.mxu1 %v7027_v27  ;;  %v497_v27 = vld [vmem:[%s11819_s4 + $0x1c0] sm:$0xff] }
 0x2c2   : > { %7030 = vmatprep.subr.bf16.mxu1 %v7029_v37  ;;  %v499_v37 = vld [vmem:[%s11819_s4 + $0x1d0] sm:$0xff] }
 0x2c3   : > { %v7071_v14 = vpack.c.bf16 %v499_v37, %v497_v27  ;;  %v507_v27 = vld [vmem:[%s11819_s4 + $0x210] sm:$0xff]  ;;  %v510_v37 = vld [vmem:[%s11819_s4 + $0x228] sm:$0xff] }
 0x2c5   : > { %7032 = vmatpush1.bf16.msra.mxu1 %v7031_v36  ;;  %v501_v36 = vld [vmem:[%s11819_s4 + $0x1e0] sm:$0xff] }
 0x2c6   : > { %7034 = vmatprep.subr.bf16.mxu1 %v7033_v22  ;;  %v503_v22 = vld [vmem:[%s11819_s4 + $0x1f0] sm:$0xff] }
 0x2c7   : > { %v7075_v15 = vpack.c.bf16 %v503_v22, %v501_v36  ;;  %v6075_v36 = vld [vmem:[%s11820_s5 + $0x2a0] sm:$0xff]  ;;  %v6078_v22 = vld [vmem:[%s11820_s5 + $0x2b8] sm:$0xff] }
 0x2c9   : > { %7036 = vmatpush1.bf16.msra.mxu1 %v7035_v33  ;;  %v6042_v33 = vld [vmem:[%s11820_s5 + $0x198] sm:$0xff] }
 0x2ca   : > { %7038 = vmatprep.subr.bf16.mxu1 %v7037_v28  ;;  %v6044_v28 = vld [vmem:[%s11820_s5 + $0x1a8] sm:$0xff] }
 0x2cb   : > { %v7161_v13 = vpack.c.bf16 %v6044_v28, %v6042_v33  ;;  %v7081_v33 = vpack.c.bf16 %v512_v6, %v510_v37  ;;  %v509_v28 = vld [vmem:[%s11819_s4 + $0x220] sm:$0xff]  ;;  %v538_v37 = vld [vmem:[%s11819_s4 + $0x308] sm:$0xff] }
 0x2cd   : > { %7040 = vmatpush1.bf16.msra.mxu1 %v7039_v61  ;;  %v6048_v61 = vld [vmem:[%s11820_s5 + $0x1c8] sm:$0xff]  ;;  %7162 = vmatprep.subr.bf16.mxu0 %v7161_v13 }
 0x2ce   : > { %7042 = vmatprep.subr.bf16.mxu1 %v7041_v46  ;;  %v7163_v46 = vpack.c.bf16 %v6043_v24, %v6041_v63  ;;  %v7165_v49 = vpack.c.bf16 %v6048_v61, %v6046_v32  ;;  %v511_v63 = vld [vmem:[%s11819_s4 + $0x230] sm:$0xff]  ;;  %v514_v13 = vld [vmem:[%s11819_s4 + $0x248] sm:$0xff]  ;;  %v516_v32 = vld [vmem:[%s11819_s4 + $0x258] sm:$0xff]  ;;  %v7197_v61 = vpack.c.bf16 %v6080_v20, %v6078_v22 }
 0x2cf   : > { %v542_v22 = vld [vmem:[%s11819_s4 + $0x328] sm:$0xff]  ;;  %v544_v20 = vld [vmem:[%s11819_s4 + $0x338] sm:$0xff] }
 0x2d0   : > { %7164 = vmatpush1.bf16.msra.mxu0 %v7163_v46  ;;  %v6077_v46 = vld [vmem:[%s11820_s5 + $0x2b0] sm:$0xff] }
 0x2d1   : > { %7044 = vmatpush1.bf16.msra.mxu1 %v7043_v11  ;;  %v6052_v11 = vld [vmem:[%s11820_s5 + $0x1e8] sm:$0xff]  ;;  %7166 = vmatprep.subr.bf16.mxu0 %v7165_v49  ;;  %v6079_v49 = vld [vmem:[%s11820_s5 + $0x2c0] sm:$0xff] }
 0x2d2   : > { %7046 = vmatprep.subr.bf16.mxu1 %v7045_v12  ;;  %v7167_v12 = vpack.c.bf16 %v6047_v57, %v6045_v30  ;;  %v7169_v59 = vpack.c.bf16 %v6052_v11, %v6050_v58  ;;  %v6082_v30 = vld [vmem:[%s11820_s5 + $0x2d8] sm:$0xff]  ;;  %v6084_v57 = vld [vmem:[%s11820_s5 + $0x2e8] sm:$0xff]  ;;  %v7083_v58 = vpack.c.bf16 %v511_v63, %v509_v28 }
 0x2d3   : > { %v546_v28 = vld [vmem:[%s11819_s4 + $0x348] sm:$0xff]  ;;  %v548_v63 = vld [vmem:[%s11819_s4 + $0x358] sm:$0xff] }
 0x2d4   : > { %7168 = vmatpush1.bf16.msra.mxu0 %v7167_v12  ;;  %v7085_v12 = vpack.c.bf16 %v516_v32, %v514_v13 }
 0x2d5   : > { %7048 = vmatpush1.bf16.msra.mxu1 %v7047_v50  ;;  %v6056_v50 = vld [vmem:[%s11820_s5 + $0x208] sm:$0xff]  ;;  %7170 = vmatprep.subr.bf16.mxu0 %v7169_v59  ;;  %v513_v59 = vld [vmem:[%s11819_s4 + $0x240] sm:$0xff] }
 0x2d6   : > { %7050 = vmatprep.subr.bf16.mxu1 %v7049_v56  ;;  %v7171_v56 = vpack.c.bf16 %v6051_v19, %v6049_v16  ;;  %v7173_v40 = vpack.c.bf16 %v6056_v50, %v6054_v52  ;;  %v515_v16 = vld [vmem:[%s11819_s4 + $0x250] sm:$0xff]  ;;  %v7199_v52 = vpack.c.bf16 %v6079_v49, %v6077_v46  ;;  %v518_v50 = vld [vmem:[%s11819_s4 + $0x268] sm:$0xff]  ;;  %v545_v46 = vld [vmem:[%s11819_s4 + $0x340] sm:$0xff] }
 0x2d7   : > { %v547_v49 = vld [vmem:[%s11819_s4 + $0x350] sm:$0xff] }
 0x2d8   : > { %7172 = vmatpush1.bf16.msra.mxu0 %v7171_v56  ;;  %v520_v56 = vld [vmem:[%s11819_s4 + $0x278] sm:$0xff] }
 0x2d9   : > { %7052 = vmatpush1.bf16.msra.mxu1 %v7051_v29  ;;  %v6060_v29 = vld [vmem:[%s11820_s5 + $0x228] sm:$0xff]  ;;  %7174 = vmatprep.subr.bf16.mxu0 %v7173_v40  ;;  %v7201_v40 = vpack.c.bf16 %v6084_v57, %v6082_v30  ;;  %v552_v57 = vld [vmem:[%s11819_s4 + $0x378] sm:$0xff] }
 0x2da   : > { %7054 = vmatprep.subr.bf16.mxu1 %v7053_v4  ;;  %v7175_v4 = vpack.c.bf16 %v6055_v9, %v6053_v2  ;;  %v7177_v42 = vpack.c.bf16 %v6060_v29, %v6058_v44  ;;  %v7087_v2 = vpack.c.bf16 %v515_v16, %v513_v59  ;;  %v7089_v9 = vpack.c.bf16 %v520_v56, %v518_v50  ;;  %v517_v44 = vld [vmem:[%s11819_s4 + $0x260] sm:$0xff]  ;;  %v519_v29 = vld [vmem:[%s11819_s4 + $0x270] sm:$0xff]  ;;  %v550_v30 = vld [vmem:[%s11819_s4 + $0x368] sm:$0xff] }
 0x2db   : > { %v7121_v59 = vpack.c.bf16 %v552_v57, %v550_v30  ;;  %v549_v16 = vld [vmem:[%s11819_s4 + $0x360] sm:$0xff]  ;;  %v556_v50 = vld [vmem:[%s11819_s4 + $0x398] sm:$0xff]  ;;  %v583_v57 = vld [vmem:[%s11819_s4 + $0x470] sm:$0xff] }
 0x2dc   : > { %7176 = vmatpush1.bf16.msra.mxu0 %v7175_v4  ;;  %v522_v4 = vld [vmem:[%s11819_s4 + $0x288] sm:$0xff]  ;;  %v581_v30 = vld [vmem:[%s11819_s4 + $0x460] sm:$0xff] }
 0x2dd   : > { %7056 = vmatpush1.bf16.msra.mxu1 %v7055_v8  ;;  %v6064_v8 = vld [vmem:[%s11820_s5 + $0x248] sm:$0xff]  ;;  %7178 = vmatprep.subr.bf16.mxu0 %v7177_v42  ;;  %v524_v42 = vld [vmem:[%s11819_s4 + $0x298] sm:$0xff] }
 0x2de   : > { %7058 = vmatprep.subr.bf16.mxu1 %v7057_v39  ;;  %v7179_v39 = vpack.c.bf16 %v6059_v60, %v6057_v35  ;;  %v7181_v48 = vpack.c.bf16 %v6064_v8, %v6062_v45  ;;  %v7091_v45 = vpack.c.bf16 %v519_v29, %v517_v44  ;;  %v7093_v8 = vpack.c.bf16 %v524_v42, %v522_v4  ;;  %v553_v44 = vld [vmem:[%s11819_s4 + $0x380] sm:$0xff]  ;;  %v555_v29 = vld [vmem:[%s11819_s4 + $0x390] sm:$0xff]  ;;  %v558_v4 = vld [vmem:[%s11819_s4 + $0x3a8] sm:$0xff] }
 0x2df   : > { %v560_v42 = vld [vmem:[%s11819_s4 + $0x3b8] sm:$0xff] }
 0x2e0   : > { %7180 = vmatpush1.bf16.msra.mxu0 %v7179_v39  ;;  %v521_v39 = vld [vmem:[%s11819_s4 + $0x280] sm:$0xff] }
 0x2e1   : > { %7060 = vmatpush1.bf16.msra.mxu1 %v7059_v43  ;;  %v6068_v43 = vld [vmem:[%s11820_s5 + $0x268] sm:$0xff]  ;;  %7182 = vmatprep.subr.bf16.mxu0 %v7181_v48  ;;  %v523_v48 = vld [vmem:[%s11819_s4 + $0x290] sm:$0xff] }
 0x2e2   : > { %7062 = vmatprep.subr.bf16.mxu1 %v7061_v3  ;;  %v7183_v3 = vpack.c.bf16 %v6063_v17, %v6061_v31  ;;  %v7185_v10 = vpack.c.bf16 %v6068_v43, %v6066_v1  ;;  %v526_v31 = vld [vmem:[%s11819_s4 + $0x2a8] sm:$0xff]  ;;  %v528_v17 = vld [vmem:[%s11819_s4 + $0x2b8] sm:$0xff]  ;;  %v7095_v1 = vpack.c.bf16 %v523_v48, %v521_v39 }
 0x2e3   : > { %v7097_v43 = vpack.c.bf16 %v528_v17, %v526_v31  ;;  %v562_v39 = vld [vmem:[%s11819_s4 + $0x3c8] sm:$0xff]  ;;  %v564_v48 = vld [vmem:[%s11819_s4 + $0x3d8] sm:$0xff] }
 0x2e4   : > { %7184 = vmatpush1.bf16.msra.mxu0 %v7183_v3  ;;  %v525_v3 = vld [vmem:[%s11819_s4 + $0x2a0] sm:$0xff] }
 0x2e5   : > { %7064 = vmatpush1.bf16.msra.mxu1 %v7063_v55  ;;  %v6072_v55 = vld [vmem:[%s11820_s5 + $0x288] sm:$0xff]  ;;  %7186 = vmatprep.subr.bf16.mxu0 %v7185_v10  ;;  %v527_v10 = vld [vmem:[%s11819_s4 + $0x2b0] sm:$0xff] }
 0x2e6   : > { %7066 = vmatprep.subr.bf16.mxu1 %v7065_v7  ;;  %v7187_v7 = vpack.c.bf16 %v6067_v25, %v6065_v41  ;;  %v7189_v34 = vpack.c.bf16 %v6072_v55, %v6070_v62  ;;  %v530_v41 = vld [vmem:[%s11819_s4 + $0x2c8] sm:$0xff]  ;;  %v532_v25 = vld [vmem:[%s11819_s4 + $0x2d8] sm:$0xff]  ;;  %v7099_v62 = vpack.c.bf16 %v527_v10, %v525_v3  ;;  %v561_v3 = vld [vmem:[%s11819_s4 + $0x3c0] sm:$0xff] }
 0x2e7   : > { %v7101_v55 = vpack.c.bf16 %v532_v25, %v530_v41  ;;  %v563_v10 = vld [vmem:[%s11819_s4 + $0x3d0] sm:$0xff]  ;;  %v566_v41 = vld [vmem:[%s11819_s4 + $0x3e8] sm:$0xff]  ;;  %v568_v25 = vld [vmem:[%s11819_s4 + $0x3f8] sm:$0xff] }
 0x2e8   : > { %7188 = vmatpush1.bf16.msra.mxu0 %v7187_v7  ;;  %v529_v7 = vld [vmem:[%s11819_s4 + $0x2c0] sm:$0xff] }
 0x2e9   : > { %7068 = vmatpush1.bf16.msra.mxu1 %v7067_v0  ;;  %v6076_v0 = vld [vmem:[%s11820_s5 + $0x2a8] sm:$0xff]  ;;  %7190 = vmatprep.subr.bf16.mxu0 %v7189_v34  ;;  %v531_v34 = vld [vmem:[%s11819_s4 + $0x2d0] sm:$0xff] }
 0x2ea   : > { %7070 = vmatprep.subr.bf16.mxu1 %v7069_v23  ;;  %v505_v23 = vld [vmem:[%s11819_s4 + $0x200] sm:$0xff] }
 0x2ec   : > { %7192 = vmatpush1.bf16.msra.mxu0 %v7191_v5  ;;  %v540_v5 = vld [vmem:[%s11819_s4 + $0x318] sm:$0xff] }
 0x2ed   : > { %7072 = vmatpush1.bf16.msra.mxu1 %v7071_v14  ;;  %v7193_v14 = vpack.c.bf16 %v6076_v0, %v6074_v54  ;;  %v7103_v54 = vpack.c.bf16 %v531_v34, %v529_v7  ;;  %v7105_v0 = vpack.c.bf16 %v536_v21, %v534_v53  ;;  %v7137_v34 = vpack.c.bf16 %v568_v25, %v566_v41  ;;  %v565_v53 = vld [vmem:[%s11819_s4 + $0x3e0] sm:$0xff]  ;;  %v567_v21 = vld [vmem:[%s11819_s4 + $0x3f0] sm:$0xff] }
 0x2ee   : > { %7074 = vmatprep.subr.bf16.mxu1 %v7073_v38  ;;  %v6073_v38 = vld [vmem:[%s11820_s5 + $0x290] sm:$0xff]  ;;  %v10778_v41 = vld [vmem:[%s11820_s5 + $0x20] sm:$0xff] }
 0x2ef   : > { %v7195_v24 = vpack.c.bf16 %v6075_v36, %v6073_v38  ;;  %7194 = vmatprep.subr.bf16.mxu0 %v7193_v14  ;;  %v7109_v14 = vpack.c.bf16 %v540_v5, %v538_v37  ;;  %v537_v38 = vld [vmem:[%s11819_s4 + $0x300] sm:$0xff]  ;;  %v539_v36 = vld [vmem:[%s11819_s4 + $0x310] sm:$0xff] }
 0x2f0   : > { %v10783_v25 = vld [vmem:[%s11820_s5 + $0x30] sm:$0xff] }
 0x2f1   : > { %7076 = vmatpush1.bf16.msra.mxu1 %v7075_v15  ;;  %v7079_v15 = vpack.c.bf16 %v507_v27, %v505_v23  ;;  %7196 = vmatpush1.bf16.msra.mxu0 %v7195_v24  ;;  %v533_v23 = vld [vmem:[%s11819_s4 + $0x2e0] sm:$0xff]  ;;  %v535_v27 = vld [vmem:[%s11819_s4 + $0x2f0] sm:$0xff] }
 0x2f2   : > { %7078 = vmatprep.subr.bf16.mxu1 %v7077_v26  ;;  %7198 = vmatprep.subr.bf16.mxu0 %v7197_v61  ;;  %v7107_v6 = vpack.c.bf16 %v535_v27, %v533_v23  ;;  %v7117_v61 = vpack.c.bf16 %v548_v63, %v546_v28  ;;  %v7139_v27 = vpack.c.bf16 %v567_v21, %v565_v53 }
 0x2f3   : > { %v7215_v53 = vpack.c.bf16 %v10783_v25, %v10778_v41  ;;  %v4190_v41 = vld [vmem:[%s11820_s5 + $0x88] sm:$0xff]  ;;  %v4192_v25 = vld [vmem:[%s11820_s5 + $0x98] sm:$0xff] }
 0x2f5   : > { %7200 = vmatpush1.bf16.msra.mxu0 %v7199_v52  ;;  %v554_v52 = vld [vmem:[%s11819_s4 + $0x388] sm:$0xff] }
 0x2f6   : > { %7202 = vmatprep.subr.bf16.mxu0 %v7201_v40 }
 0x357   : > { %v3728_v47 = vpop.f32.mrb[16].mxu1 }
 0x358   : > { %v3730_v26 = vpop.f32.mrb[17].mxu1 }
 0x359   : > { %3988 = vmatprep.mubr.f32.mxu1 %v3730_v26  ;;  %v541_v26 = vld [vmem:[%s11819_s4 + $0x320] sm:$0xff] }
 0x35a   : > { %3989 = vmatmul.mubr.f32.vlgmr.msra.gmra.mrb[34].mxu1 %v3728_v47  ;;  %v7111_v47 = vpack.c.bf16 %v539_v36, %v537_v38  ;;  %v574_v38 = vld [vmem:[%s11819_s4 + $0x428] sm:$0xff]  ;;  %v576_v36 = vld [vmem:[%s11819_s4 + $0x438] sm:$0xff] }
 0x35b   : > { %7080 = vmatpush1.bf16.msra.mxu1 %v7079_v15  ;;  %v3734_v11 = vpop.f32.mrb[18].mxu1  ;;  %v7113_v15 = vpack.c.bf16 %v544_v20, %v542_v22  ;;  %v7145_v20 = vpack.c.bf16 %v576_v36, %v574_v38 }
 0x35c   : > { %7082 = vmatprep.subr.bf16.mxu1 %v7081_v33  ;;  %v3736_v19 = vpop.f32.mrb[19].mxu1  ;;  %v543_v33 = vld [vmem:[%s11819_s4 + $0x330] sm:$0xff] }
 0x35d   : > { %3994 = vmatprep.mubr.f32.mxu1 %v3736_v19  ;;  %v7115_v24 = vpack.c.bf16 %v543_v33, %v541_v26  ;;  %v551_v19 = vld [vmem:[%s11819_s4 + $0x370] sm:$0xff]  ;;  %v578_v26 = vld [vmem:[%s11819_s4 + $0x448] sm:$0xff]  ;;  %v580_v33 = vld [vmem:[%s11819_s4 + $0x458] sm:$0xff] }
 0x35e   : > { %3995 = vmatmul.mubr.f32.gmra.mrb[36].mxu1 %v3734_v11  ;;  %v7119_v11 = vpack.c.bf16 %v547_v49, %v545_v46  ;;  %v7123_v40 = vpack.c.bf16 %v551_v19, %v549_v16  ;;  %v7149_v63 = vpack.c.bf16 %v580_v33, %v578_v26  ;;  %v585_v16 = vld [vmem:[%s11819_s4 + $0x480] sm:$0xff]  ;;  %v587_v19 = vld [vmem:[%s11819_s4 + $0x490] sm:$0xff] }
 0x35f   : > { %7084 = vmatpush1.bf16.msra.mxu1 %v7083_v58  ;;  %v3740_v35 = vpop.f32.mrb[20].mxu1 }
 0x360   : > { %7086 = vmatprep.subr.bf16.mxu1 %v7085_v12  ;;  %v3742_v60 = vpop.f32.mrb[21].mxu1 }
 0x361   : > { %4000 = vmatprep.mubr.f32.mxu1 %v3742_v60  ;;  %v7129_v60 = vpack.c.bf16 %v560_v42, %v558_v4  ;;  %v6085_v42 = vld [vmem:[%s11820_s5 + $0x2f0] sm:$0xff] }
 0x362   : > { %4001 = vmatmul.mubr.f32.gmra.mrb[38].mxu1 %v3740_v35  ;;  %v7127_v35 = vpack.c.bf16 %v555_v29, %v553_v44  ;;  %v6088_v29 = vld [vmem:[%s11820_s5 + $0x308] sm:$0xff] }
 0x363   : > { %7088 = vmatpush1.bf16.msra.mxu1 %v7087_v2 }
 0x364   : > { %7090 = vmatprep.subr.bf16.mxu1 %v7089_v9  ;;  %v7125_v9 = vpack.c.bf16 %v556_v50, %v554_v52  ;;  %v7159_v52 = vpack.c.bf16 %v587_v19, %v585_v16  ;;  %v590_v50 = vld [vmem:[%s11819_s4 + $0x4a8] sm:$0x3f] }
 0x367   : > { %7092 = vmatpush1.bf16.msra.mxu1 %v7091_v45  ;;  %v557_v45 = vld [vmem:[%s11819_s4 + $0x3a0] sm:$0xff] }
 0x368   : > { %7094 = vmatprep.subr.bf16.mxu1 %v7093_v8  ;;  %v559_v8 = vld [vmem:[%s11819_s4 + $0x3b0] sm:$0xff] }
 0x369   : > { %v7131_v17 = vpack.c.bf16 %v559_v8, %v557_v45  ;;  %v6090_v45 = vld [vmem:[%s11820_s5 + $0x318] sm:$0xff]  ;;  %v6089_v8 = vld [vmem:[%s11820_s5 + $0x310] sm:$0xff] }
 0x36b   : > { %7096 = vmatpush1.bf16.msra.mxu1 %v7095_v1 }
 0x36c   : > { %7098 = vmatprep.subr.bf16.mxu1 %v7097_v43  ;;  %v7133_v43 = vpack.c.bf16 %v564_v48, %v562_v39  ;;  %v4174_v39 = vld [vmem:[%s11820_s5 + $0x8] sm:$0xff]  ;;  %v4176_v48 = vld [vmem:[%s11820_s5 + $0x18] sm:$0xff] }
 0x36f   : > { %7100 = vmatpush1.bf16.msra.mxu1 %v7099_v62 }
 0x370   : > { %7102 = vmatprep.subr.bf16.mxu1 %v7101_v55  ;;  %v7135_v55 = vpack.c.bf16 %v563_v10, %v561_v3  ;;  %v4180_v10 = vld [vmem:[%s11820_s5 + $0x38] sm:$0xff] }
 0x373   : > { %7104 = vmatpush1.bf16.msra.mxu1 %v7103_v54  ;;  %v570_v54 = vld [vmem:[%s11819_s4 + $0x408] sm:$0xff] }
 0x374   : > { %7106 = vmatprep.subr.bf16.mxu1 %v7105_v0  ;;  %v572_v0 = vld [vmem:[%s11819_s4 + $0x418] sm:$0xff] }
 0x375   : > { %v7141_v5 = vpack.c.bf16 %v572_v0, %v570_v54 }
 0x377   : > { %7108 = vmatpush1.bf16.msra.mxu1 %v7107_v6  ;;  %v10572_v13 = vpop.f32.mrb[22].mxu1  ;;  %v569_v6 = vld [vmem:[%s11819_s4 + $0x400] sm:$0xff] }
 0x378   : > { %7110 = vmatprep.subr.bf16.mxu1 %v7109_v14  ;;  %v3813_v32 = vpop.f32.mrb[23].mxu1  ;;  %v571_v14 = vld [vmem:[%s11819_s4 + $0x410] sm:$0xff] }
 0x379   : > { %4071 = vmatprep.mubr.f32.mxu1 %v3813_v32  ;;  %v7143_v22 = vpack.c.bf16 %v571_v14, %v569_v6  ;;  %v579_v32 = vld [vmem:[%s11819_s4 + $0x450] sm:$0xff] }
 0x37b   : > { %7112 = vmatpush1.bf16.msra.mxu1 %v7111_v47  ;;  %v10586_v58 = vpop.f32.mrb[24].mxu1  ;;  %v573_v47 = vld [vmem:[%s11819_s4 + $0x420] sm:$0xff] }
 0x37c   : > { %7114 = vmatprep.subr.bf16.mxu1 %v7113_v15  ;;  %v10588_v12 = vpop.f32.mrb[25].mxu1  ;;  %v575_v15 = vld [vmem:[%s11819_s4 + $0x430] sm:$0xff] }
 0x37d   : > { %v7147_v28 = vpack.c.bf16 %v575_v15, %v573_v47 }
 0x37f   : > { %7116 = vmatpush1.bf16.msra.mxu1 %v7115_v24  ;;  %v10602_v56 = vpop.f32.mrb[26].mxu1  ;;  %v577_v24 = vld [vmem:[%s11819_s4 + $0x440] sm:$0xff] }
 0x380   : > { %7118 = vmatprep.subr.bf16.mxu1 %v7117_v61  ;;  %v10604_v2 = vpop.f32.mrb[27].mxu1  ;;  %v582_v61 = vld [vmem:[%s11819_s4 + $0x468] sm:$0xff]  ;;  %v7151_v46 = vpack.c.bf16 %v579_v32, %v577_v24 }
 0x381   : > { %v4182_v32 = vld [vmem:[%s11820_s5 + $0x48] sm:$0xff] }
 0x383   : > { %7120 = vmatpush1.bf16.msra.mxu1 %v7119_v11  ;;  %v586_v11 = vld [vmem:[%s11819_s4 + $0x488] sm:$0xff] }
 0x384   : > { %7122 = vmatprep.subr.bf16.mxu1 %v7121_v59 }
 0x387   : > { %7124 = vmatpush1.bf16.msra.mxu1 %v7123_v40  ;;  %v10630_v31 = vpop.f32.mrb[28].mxu1  ;;  %v6081_v40 = vld [vmem:[%s11820_s5 + $0x2d0] sm:$0xff] }
 0x388   : > { %7126 = vmatprep.subr.bf16.mxu1 %v7125_v9  ;;  %v6603_v1 = vpop.f32.mrb[29].mxu1  ;;  %v6086_v9 = vld [vmem:[%s11820_s5 + $0x2f8] sm:$0xff] }
 0x389   : > { %v7205_v4 = vpack.c.bf16 %v6088_v29, %v6086_v9  ;;  %v4175_v1 = vld [vmem:[%s11820_s5 + $0x10] sm:$0xff]  ;;  %v4181_v29 = vld [vmem:[%s11820_s5 + $0x40] sm:$0xff] }
 0x38b   : > { %7128 = vmatpush1.bf16.msra.mxu1 %v7127_v35  ;;  %v10644_v62 = vpop.f32.mrb[30].mxu1  ;;  %v6087_v35 = vld [vmem:[%s11820_s5 + $0x300] sm:$0xff] }
 0x38c   : > { %7130 = vmatprep.subr.bf16.mxu1 %v7129_v60  ;;  %v6606_v7 = vpop.f32.mrb[31].mxu1  ;;  %v7207_v60 = vpack.c.bf16 %v6087_v35, %v6085_v42 }
 0x38f   : > { %7132 = vmatpush1.bf16.msra.mxu1 %v7131_v17  ;;  %v3904_v23 = vpop.f32.mrb[32].mxu1  ;;  %v4173_v17 = vld [vmem:[%s11820_s5] sm:$0xff] }
 0x390   : > { %7134 = vmatprep.subr.bf16.mxu1 %v7133_v43  ;;  %v6609_v37 = vpop.f32.mrb[33].mxu1  ;;  %v4178_v43 = vld [vmem:[%s11820_s5 + $0x28] sm:$0xff]  ;;  %v7211_v7 = vpack.c.bf16 %v4175_v1, %v4173_v17 }
 0x393   : > { %7136 = vmatpush1.bf16.msra.mxu1 %v7135_v55 }
 0x394   : > { %7138 = vmatprep.subr.bf16.mxu1 %v7137_v34  ;;  %v7213_v34 = vpack.c.bf16 %v4180_v10, %v4178_v43  ;;  %v4185_v43 = vld [vmem:[%s11820_s5 + $0x60] sm:$0xff]  ;;  %v4187_v10 = vld [vmem:[%s11820_s5 + $0x70] sm:$0xff] }
 0x397   : > { %7140 = vmatpush1.bf16.msra.mxu1 %v7139_v27 }
 0x398   : > { %7142 = vmatprep.subr.bf16.mxu1 %v7141_v5 }
 0x39a   : > { %4072 = vmatmul.mubr.f32.vlgmr.msra.gmra.mrb[34].mxu1 %v10572_v13  ;;  %v584_v13 = vld [vmem:[%s11819_s4 + $0x478] sm:$0xff] }
 0x39b   : > { %7144 = vmatpush1.bf16.msra.mxu1 %v7143_v22  ;;  %4077 = vmatprep.mubr.f32.mxu1 %v10588_v12  ;;  %v7153_v49 = vpack.c.bf16 %v584_v13, %v582_v61  ;;  %v7155_v12 = vpack.c.bf16 %v583_v57, %v581_v30 }
 0x39c   : > { %7146 = vmatprep.subr.bf16.mxu1 %v7145_v20 }
 0x39e   : > { %4078 = vmatmul.mubr.f32.gmra.mrb[36].mxu1 %v10586_v58  ;;  %v588_v58 = vld [vmem:[%s11819_s4 + $0x498] sm:$0xff] }
 0x39f   : > { %7148 = vmatpush1.bf16.msra.mxu1 %v7147_v28  ;;  %4083 = vmatprep.mubr.f32.mxu1 %v10604_v2  ;;  %v7157_v59 = vpack.c.bf16 %v588_v58, %v586_v11  ;;  %v6083_v2 = vld [vmem:[%s11820_s5 + $0x2e0] sm:$0xff] }
 0x3a0   : > { %7150 = vmatprep.subr.bf16.mxu1 %v7149_v63  ;;  %v7203_v44 = vpack.c.bf16 %v6083_v2, %v6081_v40 }
 0x3a2   : > { %4084 = vmatmul.mubr.f32.gmra.mrb[38].mxu1 %v10602_v56  ;;  %v589_v56 = vld [vmem:[%s11819_s4 + $0x4a0] sm:$0x3f]  ;;  %7204 = vmatpush1.bf16.msra.mxu0 %v7203_v44 }
 0x3a3   : > { %7152 = vmatpush1.bf16.msra.mxu1 %v7151_v46  ;;  %4154 = vmatprep.mubr.f32.mxu1 %v11906_v51 }
 0x3a4   : > { %7154 = vmatprep.subr.bf16.mxu1 %v7153_v49  ;;  %7206 = vmatprep.subr.bf16.mxu0 %v7205_v4  ;;  %v4183_v4 = vld [vmem:[%s11820_s5 + $0x50] sm:$0xff] }
 0x3a5   : > { %v7219_v17 = vpack.c.bf16 %v4183_v4, %v4181_v29  ;;  %v4213_v4 = vld [vmem:[%s11820_s5 + $0x140] sm:$0xff] }
 0x3a6   : > { %7208 = vmatpush1.bf16.msra.mxu0 %v7207_v60  ;;  %v4186_v60 = vld [vmem:[%s11820_s5 + $0x68] sm:$0xff] }
 0x3a7   : > { %7156 = vmatpush1.bf16.msra.mxu1 %v7155_v12  ;;  %4345 = vmatprep.subr.mxu0 %v6090_v45  ;;  %v4184_v12 = vld [vmem:[%s11820_s5 + $0x58] sm:$0xff] }
 0x3a8   : > { %7158 = vmatprep.subr.bf16.mxu1 %v7157_v59  ;;  %v7217_v44 = vpack.c.bf16 %v4184_v12, %v4182_v32  ;;  %v4188_v45 = vld [vmem:[%s11820_s5 + $0x78] sm:$0xff]  ;;  %v4203_v32 = vld [vmem:[%s11820_s5 + $0xf0] sm:$0xff]  ;;  %v4210_v12 = vld [vmem:[%s11820_s5 + $0x128] sm:$0xff] }
 0x3a9   : > { %v7221_v1 = vpack.c.bf16 %v4188_v45, %v4186_v60  ;;  %v4215_v60 = vld [vmem:[%s11820_s5 + $0x150] sm:$0xff]  ;;  %v4218_v45 = vld [vmem:[%s11820_s5 + $0x168] sm:$0xff] }
 0x3aa   : > { %4346 = vmatpush1.msra.mxu0 %v6089_v8 }
 0x3ab   : > { %7160 = vmatpush1.bf16.msra.mxu1 %v7159_v52 }
 0x3ac   : > { %6036 = vmatprep.subr.msk.mxu1 %vm1463_vm2, %v590_v50 }
 0x3af   : > { %6037 = vmatpush1.msk.msra.mxu1 %vm1463_vm2, %v589_v56 }
 0x3b0   : > { %6038 = vmatmul.mubr.msk.f32.vlgmr.msra.gmra.mrb[34].mxu1 %vm3908_vm12, %v10630_v31  ;;  %7407 = vmatprep.subr.bf16.mxu1 %v8031_v18  ;;  %v7209_v31 = vpack.c.bf16 %v4176_v48, %v4174_v39 }
 0x3b1   : > { %4160 = vmatprep.mubr.f32.mxu1 %v11906_v51 }
 0x3b2   : > { %7210 = vmatprep.subr.bf16.mxu0 %v7209_v31 }
 0x3b4   : > { %6039 = vmatmul.mubr.msk.f32.gmra.mrb[36].mxu1 %vm3908_vm12, %v10644_v62 }
 0x3b5   : > { %4166 = vmatprep.mubr.f32.mxu1 %v11906_v51 }
 0x3b8   : > { %6040 = vmatmul.mubr.msk.f32.gmra.mrb[38].mxu1 %vm3908_vm12, %v3904_v23 }
 0x483   : > { %v10770_v3 = vpop.f32.mrb[34].mxu1 }
 0x484   : > { %v10785_v62 = vpop.f32.mrb[35].mxu1  ;;  %v4280_v55 = vrot.slane %v10770_v3, 1  ;;  %v4506_v21 = vrot.slane %v10770_v3, 2  ;;  %v4654_v54 = vrot.slane %v10770_v3, 3  ;;  %v4802_v0 = vrot.slane %v10770_v3, 4 }
 0x485   : > { %v4283_v27 = vrot.slane %v10785_v62, 1  ;;  %v4509_v38 = vrot.slane %v10785_v62, 2  ;;  %v4657_v20 = vrot.slane %v10785_v62, 3  ;;  %v4805_v2 = vrot.slane %v10785_v62, 4 }
 0x487   : > { %v10793_v23 = vpop.f32.mrb[36].mxu1 }
 0x488   : > { %v4281_v37 = vrot.slane %v10793_v23, 1  ;;  %v4507_v5 = vrot.slane %v10793_v23, 2  ;;  %v4655_v6 = vrot.slane %v10793_v23, 3  ;;  %v10799_v14 = vpop.f32.mrb[37].mxu1  ;;  %v4803_v15 = vrot.slane %v10793_v23, 4 }
 0x489   : > { %v4284_v36 = vrot.slane %v10799_v14, 1  ;;  %v4510_v22 = vrot.slane %v10799_v14, 2  ;;  %v4658_v47 = vrot.slane %v10799_v14, 3  ;;  %v4806_v46 = vrot.slane %v10799_v14, 4 }
 0x48a   : > { %v4282_v26 = vsel %vm711_vm0, %v4280_v55, %v4281_v37  ;;  %v10809_v33 = vsel %vm1463_vm2, %v4506_v21, %v4507_v5  ;;  %v10812_v28 = vsel %vm1907_vm3, %v4654_v54, %v4655_v6  ;;  %v10861_v39 = vsel %vm2351_vm4, %v4802_v0, %v4803_v15  ;;  %v4196_v21 = vld [vmem:[%s11820_s5 + $0xb8] sm:$0xff] }
 0x48b   : > { %v4168_v63 = vpop.f32.mrb[38].mxu1  ;;  %v4285_v24 = vsel %vm711_vm0, %v4283_v27, %v4284_v36  ;;  %v10819_v61 = vsel %vm1463_vm2, %v4509_v38, %v4510_v22  ;;  %v10822_v13 = vsel %vm1907_vm3, %v4657_v20, %v4658_v47  ;;  %v10858_v8 = vsel %vm2351_vm4, %v4805_v2, %v4806_v46  ;;  %v4193_v27 = vld [vmem:[%s11820_s5 + $0xa0] sm:$0xff]  ;;  %v4199_v20 = vld [vmem:[%s11820_s5 + $0xd0] sm:$0xff]  ;;  %v4214_v2 = vld [vmem:[%s11820_s5 + $0x148] sm:$0xff] }
 0x48c   : > { %v4286_v49 = vrot.slane %v4168_v63, 1  ;;  %v4512_v30 = vrot.slane %v4168_v63, 2  ;;  %v4660_v57 = vrot.slane %v4168_v63, 3  ;;  %v4808_v11 = vrot.slane %v4168_v63, 4  ;;  %v4170_v58 = vpop.f32.mrb[39].mxu1  ;;  %6091 = vmatprep.mubr.msk.f32.mxu0 %vm4292_vm13, %v4285_v24  ;;  %v4201_v24 = vld [vmem:[%s11820_s5 + $0xe0] sm:$0xff] }
 0x48d   : > { %v4288_v59 = vrot.slane %v4170_v58, 1  ;;  %v4514_v16 = vrot.slane %v4170_v58, 2  ;;  %v4662_v19 = vrot.slane %v4170_v58, 3  ;;  %v4810_v52 = vrot.slane %v4170_v58, 4  ;;  %4362 = vmatmul.mubr.f32.vlgmr.msra.gmra.mrb[24].mxu0 %v4282_v26  ;;  %v4207_v58 = vld [vmem:[%s11820_s5 + $0x110] sm:$0xff] }
 0x48e   : > { %7212 = vmatpush1.bf16.msra.mxu0 %v7211_v7  ;;  %v4287_v50 = vsel %vm711_vm0, %v4281_v37, %v4286_v49  ;;  %v10831_v56 = vsel %vm1463_vm2, %v4507_v5, %v4512_v30  ;;  %v10834_v40 = vsel %vm1907_vm3, %v4655_v6, %v4660_v57  ;;  %v10867_v31 = vsel %vm2351_vm4, %v4803_v15, %v4808_v11  ;;  %v4189_v7 = vld [vmem:[%s11820_s5 + $0x80] sm:$0xff]  ;;  %v4195_v37 = vld [vmem:[%s11820_s5 + $0xb0] sm:$0xff]  ;;  %v4198_v5 = vld [vmem:[%s11820_s5 + $0xc8] sm:$0xff] }
 0x48f   : > { %v4289_v9 = vsel %vm711_vm0, %v4284_v36, %v4288_v59  ;;  %7214 = vmatprep.subr.bf16.mxu0 %v7213_v34  ;;  %v10845_v42 = vsel %vm1463_vm2, %v4510_v22, %v4514_v16  ;;  %v10848_v35 = vsel %vm1907_vm3, %v4658_v47, %v4662_v19  ;;  %v10864_v48 = vsel %vm2351_vm4, %v4806_v46, %v4810_v52  ;;  %v4191_v34 = vld [vmem:[%s11820_s5 + $0x90] sm:$0xff]  ;;  %v4200_v6 = vld [vmem:[%s11820_s5 + $0xd8] sm:$0xff]  ;;  %v4197_v22 = vld [vmem:[%s11820_s5 + $0xc0] sm:$0xff] }
 0x490   : > { %6092 = vmatprep.mubr.msk.f32.mxu0 %vm4292_vm13, %v4289_v9  ;;  %v7225_v55 = vpack.c.bf16 %v4192_v25, %v4190_v41  ;;  %v7227_v54 = vpack.c.bf16 %v4191_v34, %v4189_v7  ;;  %v7231_v38 = vpack.c.bf16 %v4195_v37, %v4193_v27  ;;  %v7233_v36 = vpack.c.bf16 %v4200_v6, %v4198_v5  ;;  %v4202_v47 = vld [vmem:[%s11820_s5 + $0xe8] sm:$0xff]  ;;  %v4204_v15 = vld [vmem:[%s11820_s5 + $0xf8] sm:$0xff]  ;;  %v4205_v11 = vld [vmem:[%s11820_s5 + $0x100] sm:$0xff] }
 0x491   : > { %4368 = vmatmul.mubr.f32.gmra.mrb[26].mxu0 %v4287_v50  ;;  %v7235_v26 = vpack.c.bf16 %v4199_v20, %v4197_v22  ;;  %v7237_v63 = vpack.c.bf16 %v4204_v15, %v4202_v47  ;;  %v4206_v46 = vld [vmem:[%s11820_s5 + $0x108] sm:$0xff]  ;;  %v4208_v49 = vld [vmem:[%s11820_s5 + $0x118] sm:$0xff]  ;;  %v7239_v30 = vpack.c.bf16 %v4203_v32, %v4201_v24  ;;  %v7243_v16 = vpack.c.bf16 %v4207_v58, %v4205_v11  ;;  %v4209_v52 = vld [vmem:[%s11820_s5 + $0x120] sm:$0xff] }
 0x492   : > { %7216 = vmatpush1.bf16.msra.mxu0 %v7215_v53  ;;  %6093 = vmatprep.mubr.msk.f32.mxu0 %vm4292_vm13, %v10785_v62  ;;  %v7223_v62 = vpack.c.bf16 %v4187_v10, %v4185_v43  ;;  %v4194_v53 = vld [vmem:[%s11820_s5 + $0xa8] sm:$0xff]  ;;  %v7241_v57 = vpack.c.bf16 %v4208_v49, %v4206_v46  ;;  %v4212_v59 = vld [vmem:[%s11820_s5 + $0x138] sm:$0xff]  ;;  %v4211_v50 = vld [vmem:[%s11820_s5 + $0x130] sm:$0xff]  ;;  %vm5666_vm3 = vcmask 114688  }
 0x493   : > { %7218 = vmatprep.subr.bf16.mxu0 %v7217_v44  ;;  %v7229_v0 = vpack.c.bf16 %v4196_v21, %v4194_v53  ;;  %v7245_v19 = vpack.c.bf16 %v4212_v59, %v4210_v12  ;;  %v4216_v9 = vld [vmem:[%s11820_s5 + $0x158] sm:$0xff]  ;;  %v7247_v44 = vpack.c.bf16 %v4211_v50, %v4209_v52  ;;  %v4217_v10 = vld [vmem:[%s11820_s5 + $0x160] sm:$0xff]  ;;  %v4219_v41 = vld [vmem:[%s11820_s5 + $0x170] sm:$0xff] }
 0x494   : > { %v7249_v29 = vpack.c.bf16 %v4216_v9, %v4214_v2  ;;  %v7255_v25 = vpack.c.bf16 %v4219_v41, %v4217_v10  ;;  %v6098_v7 = vld [vmem:[%s11820_s5 + $0x338] sm:$0xff]  ;;  %v6095_v34 = vld [vmem:[%s11820_s5 + $0x320] sm:$0xff]  ;;  %v6097_v53 = vld [vmem:[%s11820_s5 + $0x330] sm:$0xff] }
 0x495   : > { %v6100_v21 = vld [vmem:[%s11820_s5 + $0x348] sm:$0xff]  ;;  %v7259_v37 = vpack.c.bf16 %v6097_v53, %v6095_v34  ;;  %v6099_v6 = vld [vmem:[%s11820_s5 + $0x340] sm:$0xff]  ;;  %v6106_v22 = vld [vmem:[%s11820_s5 + $0x378] sm:$0xff] }
 0x496   : > { %7220 = vmatpush1.bf16.msra.mxu0 %v7219_v17  ;;  %v4220_v17 = vld [vmem:[%s11820_s5 + $0x178] sm:$0xff]  ;;  %v6103_v15 = vld [vmem:[%s11820_s5 + $0x360] sm:$0xff]  ;;  %v6109_v46 = vld [vmem:[%s11820_s5 + $0x390] sm:$0xff] }
 0x497   : > { %7222 = vmatprep.subr.bf16.mxu0 %v7221_v1  ;;  %v7251_v1 = vpack.c.bf16 %v4215_v60, %v4213_v4  ;;  %v7253_v43 = vpack.c.bf16 %v4220_v17, %v4218_v45  ;;  %v6107_v32 = vld [vmem:[%s11820_s5 + $0x380] sm:$0xff]  ;;  %v6112_v49 = vld [vmem:[%s11820_s5 + $0x3a8] sm:$0xff]  ;;  %v6113_v11 = vld [vmem:[%s11820_s5 + $0x3b0] sm:$0xff] }
 0x498   : > { %v6116_v58 = vld [vmem:[%s11820_s5 + $0x3c8] sm:$0xff]  ;;  %v6118_v12 = vld [vmem:[%s11820_s5 + $0x3d8] sm:$0xff]  ;;  %v6117_v52 = vld [vmem:[%s11820_s5 + $0x3d0] sm:$0xff] }
 0x499   : > { %v6120_v50 = vld [vmem:[%s11820_s5 + $0x3e8] sm:$0xff]  ;;  %v6122_v2 = vld [vmem:[%s11820_s5 + $0x3f8] sm:$0xff]  ;;  %v6121_v4 = vld [vmem:[%s11820_s5 + $0x3f0] sm:$0xff] }
 0x49a   : > { %7224 = vmatpush1.bf16.msra.mxu0 %v7223_v62  ;;  %v4222_v62 = vld [vmem:[%s11820_s5 + $0x188] sm:$0xff]  ;;  %v6126_v45 = vld [vmem:[%s11820_s5 + $0x418] sm:$0xff]  ;;  %v6125_v10 = vld [vmem:[%s11820_s5 + $0x410] sm:$0xff] }
 0x49b   : > { %7226 = vmatprep.subr.bf16.mxu0 %v7225_v55  ;;  %v6096_v55 = vld [vmem:[%s11820_s5 + $0x328] sm:$0xff]  ;;  %v6129_v34 = vld [vmem:[%s11820_s5 + $0x430] sm:$0xff] }
 0x49c   : > { %v7257_v27 = vpack.c.bf16 %v6098_v7, %v6096_v55  ;;  %v6124_v60 = vld [vmem:[%s11820_s5 + $0x408] sm:$0xff]  ;;  %v6127_v7 = vld [vmem:[%s11820_s5 + $0x420] sm:$0xff] }
 0x49d   : > { %v6128_v41 = vld [vmem:[%s11820_s5 + $0x428] sm:$0xff] }
 0x49e   : > { %7228 = vmatpush1.bf16.msra.mxu0 %v7227_v54  ;;  %v6102_v54 = vld [vmem:[%s11820_s5 + $0x358] sm:$0xff]  ;;  %v6132_v53 = vld [vmem:[%s11820_s5 + $0x448] sm:$0xff] }
 0x49f   : > { %7230 = vmatprep.subr.bf16.mxu0 %v7229_v0  ;;  %v4221_v0 = vld [vmem:[%s11820_s5 + $0x180] sm:$0xff]  ;;  %v7261_v5 = vpack.c.bf16 %v6102_v54, %v6100_v21  ;;  %v6134_v21 = vld [vmem:[%s11820_s5 + $0x458] sm:$0xff]  ;;  %v7291_v54 = vpack.c.bf16 %v6129_v34, %v6127_v7  ;;  %v6167_v34 = vld [vmem:[%s11820_s5 + $0x550] sm:$0xff] }
 0x4a2   : > { %7232 = vmatpush1.bf16.msra.mxu0 %v7231_v38  ;;  %v6101_v38 = vld [vmem:[%s11820_s5 + $0x350] sm:$0xff] }
 0x4a3   : > { %7234 = vmatprep.subr.bf16.mxu0 %v7233_v36  ;;  %v6104_v36 = vld [vmem:[%s11820_s5 + $0x368] sm:$0xff]  ;;  %v7263_v20 = vpack.c.bf16 %v6101_v38, %v6099_v6  ;;  %v6138_v6 = vld [vmem:[%s11820_s5 + $0x478] sm:$0xff] }
 0x4a4   : > { %v7265_v47 = vpack.c.bf16 %v6106_v22, %v6104_v36  ;;  %v6135_v22 = vld [vmem:[%s11820_s5 + $0x460] sm:$0xff] }
 0x4a6   : > { %7236 = vmatpush1.bf16.msra.mxu0 %v7235_v26  ;;  %v6105_v26 = vld [vmem:[%s11820_s5 + $0x370] sm:$0xff] }
 0x4a7   : > { %7238 = vmatprep.subr.bf16.mxu0 %v7237_v63  ;;  %v7267_v63 = vpack.c.bf16 %v6105_v26, %v6103_v15  ;;  %v6142_v15 = vld [vmem:[%s11820_s5 + $0x498] sm:$0xff] }
 0x4aa   : > { %7240 = vmatpush1.bf16.msra.mxu0 %v7239_v30 }
 0x4ab   : > { %7242 = vmatprep.subr.bf16.mxu0 %v7241_v57  ;;  %v6111_v57 = vld [vmem:[%s11820_s5 + $0x3a0] sm:$0xff] }
 0x4ac   : > { %v7275_v59 = vpack.c.bf16 %v6113_v11, %v6111_v57  ;;  %v6154_v57 = vld [vmem:[%s11820_s5 + $0x4e8] sm:$0xff]  ;;  %v6143_v11 = vld [vmem:[%s11820_s5 + $0x4a0] sm:$0xff] }
 0x4ae   : > { %7244 = vmatpush1.bf16.msra.mxu0 %v7243_v16  ;;  %v7277_v16 = vpack.c.bf16 %v6118_v12, %v6116_v58 }
 0x4af   : > { %7246 = vmatprep.subr.bf16.mxu0 %v7245_v19  ;;  %v6115_v19 = vld [vmem:[%s11820_s5 + $0x3c0] sm:$0xff] }
 0x4b0   : > { %v7279_v9 = vpack.c.bf16 %v6117_v52, %v6115_v19  ;;  %v6153_v19 = vld [vmem:[%s11820_s5 + $0x4e0] sm:$0xff]  ;;  %v6156_v52 = vld [vmem:[%s11820_s5 + $0x4f8] sm:$0xff] }
 0x4b2   : > { %7248 = vmatpush1.bf16.msra.mxu0 %v7247_v44  ;;  %v7281_v44 = vpack.c.bf16 %v6122_v2, %v6120_v50  ;;  %v6158_v50 = vld [vmem:[%s11820_s5 + $0x508] sm:$0xff] }
 0x4b3   : > { %7250 = vmatprep.subr.bf16.mxu0 %v7249_v29  ;;  %v6119_v29 = vld [vmem:[%s11820_s5 + $0x3e0] sm:$0xff] }
 0x4b4   : > { %v7283_v17 = vpack.c.bf16 %v6121_v4, %v6119_v29  ;;  %v6157_v29 = vld [vmem:[%s11820_s5 + $0x500] sm:$0xff] }
 0x4b6   : > { %7252 = vmatpush1.bf16.msra.mxu0 %v7251_v1  ;;  %v7285_v1 = vpack.c.bf16 %v6126_v45, %v6124_v60  ;;  %v6159_v45 = vld [vmem:[%s11820_s5 + $0x510] sm:$0xff] }
 0x4b7   : > { %7254 = vmatprep.subr.bf16.mxu0 %v7253_v43  ;;  %v6123_v43 = vld [vmem:[%s11820_s5 + $0x400] sm:$0xff] }
 0x4ba   : > { %7256 = vmatpush1.bf16.msra.mxu0 %v7255_v25  ;;  %v6130_v25 = vld [vmem:[%s11820_s5 + $0x438] sm:$0xff] }
 0x4bb   : > { %4426 = vmatprep.subr.mxu0 %v4222_v62  ;;  %v7287_v62 = vpack.c.bf16 %v6125_v10, %v6123_v43  ;;  %v7289_v55 = vpack.c.bf16 %v6130_v25, %v6128_v41  ;;  %v6163_v10 = vld [vmem:[%s11820_s5 + $0x530] sm:$0xff]  ;;  %v6165_v41 = vld [vmem:[%s11820_s5 + $0x540] sm:$0xff]  ;;  %v6168_v25 = vld [vmem:[%s11820_s5 + $0x558] sm:$0xff] }
 0x4be   : > { %4427 = vmatpush1.msra.mxu0 %v4221_v0  ;;  %v7293_v0 = vpack.c.bf16 %v6134_v21, %v6132_v53  ;;  %v6169_v53 = vld [vmem:[%s11820_s5 + $0x560] sm:$0xff]  ;;  %v6172_v21 = vld [vmem:[%s11820_s5 + $0x578] sm:$0xff] }
 0x4bf   : > { %4443 = vmatmul.mubr.f32.vlgmr.msra.gmra.mrb[24].mxu0 %v10770_v3  ;;  %7258 = vmatprep.subr.bf16.mxu0 %v7257_v27  ;;  %v6108_v3 = vld [vmem:[%s11820_s5 + $0x388] sm:$0xff]  ;;  %v6131_v27 = vld [vmem:[%s11820_s5 + $0x440] sm:$0xff] }
 0x4c0   : > { %6094 = vmatprep.mubr.msk.f32.mxu0 %vm4292_vm13, %v10799_v14  ;;  %7260 = vmatpush1.bf16.msra.mxu0 %v7259_v37  ;;  %v6110_v14 = vld [vmem:[%s11820_s5 + $0x398] sm:$0xff]  ;;  %v6133_v37 = vld [vmem:[%s11820_s5 + $0x450] sm:$0xff] }
 0x4c1   : > { %7262 = vmatprep.subr.bf16.mxu0 %v7261_v5  ;;  %v7269_v24 = vpack.c.bf16 %v6110_v14, %v6108_v3  ;;  %v6136_v5 = vld [vmem:[%s11820_s5 + $0x468] sm:$0xff]  ;;  %v7295_v38 = vpack.c.bf16 %v6133_v37, %v6131_v27  ;;  %v6139_v14 = vld [vmem:[%s11820_s5 + $0x480] sm:$0xff]  ;;  %v6171_v37 = vld [vmem:[%s11820_s5 + $0x570] sm:$0xff] }
 0x4c2   : > { %v7297_v36 = vpack.c.bf16 %v6138_v6, %v6136_v5  ;;  %v6173_v5 = vld [vmem:[%s11820_s5 + $0x580] sm:$0xff]  ;;  %v6176_v6 = vld [vmem:[%s11820_s5 + $0x598] sm:$0xff] }
 0x4c3   : > { %4449 = vmatmul.mubr.f32.gmra.mrb[26].mxu0 %v10793_v23  ;;  %v6114_v23 = vld [vmem:[%s11820_s5 + $0x3b8] sm:$0xff] }
 0x4c4   : > { %7264 = vmatpush1.bf16.msra.mxu0 %v7263_v20  ;;  %6145 = vmatprep.mubr.msk.f32.mxu0 %vm4292_vm13, %v10819_v61  ;;  %v7271_v61 = vpack.c.bf16 %v6109_v46, %v6107_v32  ;;  %v7273_v30 = vpack.c.bf16 %v6114_v23, %v6112_v49  ;;  %v6137_v20 = vld [vmem:[%s11820_s5 + $0x470] sm:$0xff]  ;;  %v6144_v32 = vld [vmem:[%s11820_s5 + $0x4a8] sm:$0xff]  ;;  %v6148_v46 = vld [vmem:[%s11820_s5 + $0x4b8] sm:$0xff] }
 0x4c5   : > { %7266 = vmatprep.subr.bf16.mxu0 %v7265_v47  ;;  %v6140_v47 = vld [vmem:[%s11820_s5 + $0x488] sm:$0xff]  ;;  %v7299_v26 = vpack.c.bf16 %v6137_v20, %v6135_v22  ;;  %v6147_v23 = vld [vmem:[%s11820_s5 + $0x4b0] sm:$0xff] }
 0x4c6   : > { %v7301_v3 = vpack.c.bf16 %v6142_v15, %v6140_v47  ;;  %v6150_v49 = vld [vmem:[%s11820_s5 + $0x4c8] sm:$0xff]  ;;  %v6175_v20 = vld [vmem:[%s11820_s5 + $0x590] sm:$0xff]  ;;  %v6177_v47 = vld [vmem:[%s11820_s5 + $0x5a0] sm:$0xff] }
 0x4c7   : > { %v7305_v58 = vpack.c.bf16 %v6150_v49, %v6148_v46  ;;  %v6180_v15 = vld [vmem:[%s11820_s5 + $0x5b8] sm:$0xff]  ;;  %v6186_v46 = vld [vmem:[%s11820_s5 + $0x5e8] sm:$0xff] }
 0x4c8   : > { %7268 = vmatpush1.bf16.msra.mxu0 %v7267_v63  ;;  %v6141_v63 = vld [vmem:[%s11820_s5 + $0x490] sm:$0xff] }
 0x4c9   : > { %7270 = vmatprep.subr.bf16.mxu0 %v7269_v24  ;;  %v7303_v24 = vpack.c.bf16 %v6141_v63, %v6139_v14  ;;  %v6179_v63 = vld [vmem:[%s11820_s5 + $0x5b0] sm:$0xff] }
 0x4cc   : > { %7272 = vmatpush1.bf16.msra.mxu0 %v7271_v61  ;;  %v6149_v61 = vld [vmem:[%s11820_s5 + $0x4c0] sm:$0xff] }
 0x4cd   : > { %7274 = vmatprep.subr.bf16.mxu0 %v7273_v30  ;;  %v6152_v30 = vld [vmem:[%s11820_s5 + $0x4d8] sm:$0xff]  ;;  %v7307_v12 = vpack.c.bf16 %v6149_v61, %v6147_v23  ;;  %v6183_v61 = vld [vmem:[%s11820_s5 + $0x5d0] sm:$0xff] }
 0x4d0   : > { %7276 = vmatpush1.bf16.msra.mxu0 %v7275_v59  ;;  %v7309_v59 = vpack.c.bf16 %v6154_v57, %v6152_v30  ;;  %v6185_v30 = vld [vmem:[%s11820_s5 + $0x5e0] sm:$0xff]  ;;  %v6188_v57 = vld [vmem:[%s11820_s5 + $0x5f8] sm:$0xff] }
 0x4d1   : > { %7278 = vmatprep.subr.bf16.mxu0 %v7277_v16  ;;  %v6151_v16 = vld [vmem:[%s11820_s5 + $0x4d0] sm:$0xff] }
 0x4d2   : > { %v7311_v2 = vpack.c.bf16 %v6153_v19, %v6151_v16  ;;  %v6189_v16 = vld [vmem:[%s11820_s5 + $0x600] sm:$0xff]  ;;  %v6192_v19 = vld [vmem:[%s11820_s5 + $0x618] sm:$0xff] }
 0x4d4   : > { %7280 = vmatpush1.bf16.msra.mxu0 %v7279_v9  ;;  %v7313_v9 = vpack.c.bf16 %v6158_v50, %v6156_v52  ;;  %v6194_v52 = vld [vmem:[%s11820_s5 + $0x628] sm:$0xff] }
 0x4d5   : > { %7282 = vmatprep.subr.bf16.mxu0 %v7281_v44  ;;  %v6155_v44 = vld [vmem:[%s11820_s5 + $0x4f0] sm:$0xff] }
 0x4d6   : > { %v7315_v4 = vpack.c.bf16 %v6157_v29, %v6155_v44  ;;  %v6193_v44 = vld [vmem:[%s11820_s5 + $0x620] sm:$0xff] }
 0x4d8   : > { %7284 = vmatpush1.bf16.msra.mxu0 %v7283_v17  ;;  %v6161_v17 = vld [vmem:[%s11820_s5 + $0x520] sm:$0xff] }
 0x4d9   : > { %7286 = vmatprep.subr.bf16.mxu0 %v7285_v1  ;;  %v6164_v1 = vld [vmem:[%s11820_s5 + $0x538] sm:$0xff] }
 0x4dc   : > { %7288 = vmatpush1.bf16.msra.mxu0 %v7287_v62  ;;  %v6170_v62 = vld [vmem:[%s11820_s5 + $0x568] sm:$0xff] }
 0x4dd   : > { %7290 = vmatprep.subr.bf16.mxu0 %v7289_v55  ;;  %v7323_v55 = vpack.c.bf16 %v6165_v41, %v6163_v10  ;;  %v7325_v7 = vpack.c.bf16 %v6170_v62, %v6168_v25  ;;  %v6203_v41 = vld [vmem:[%s11820_s5 + $0x660] sm:$0xff]  ;;  %v6205_v25 = vld [vmem:[%s11820_s5 + $0x670] sm:$0xff]  ;;  %v6208_v62 = vld [vmem:[%s11820_s5 + $0x688] sm:$0xff] }
 0x4e0   : > { %7292 = vmatpush1.bf16.msra.mxu0 %v7291_v54  ;;  %v6174_v54 = vld [vmem:[%s11820_s5 + $0x588] sm:$0xff] }
 0x4e1   : > { %7294 = vmatprep.subr.bf16.mxu0 %v7293_v0  ;;  %v7327_v0 = vpack.c.bf16 %v6169_v53, %v6167_v34  ;;  %v7329_v27 = vpack.c.bf16 %v6174_v54, %v6172_v21  ;;  %v6207_v53 = vld [vmem:[%s11820_s5 + $0x680] sm:$0xff]  ;;  %v6209_v21 = vld [vmem:[%s11820_s5 + $0x690] sm:$0xff] }
 0x4e2   : > { %v7363_v54 = vpack.c.bf16 %v6209_v21, %v6207_v53  ;;  %v613_v53 = vld [vmem:[%s11821_s6] sm:$0x3]  ;;  %v11929_v21 = vld [vmem:[#allocation9_spill] sm:$0xff] }
 0x4e4   : > { %7296 = vmatpush1.bf16.msra.mxu0 %v7295_v38  ;;  %v6178_v38 = vld [vmem:[%s11820_s5 + $0x5a8] sm:$0xff] }
 0x4e5   : > { %7298 = vmatprep.subr.bf16.mxu0 %v7297_v36  ;;  %v7331_v36 = vpack.c.bf16 %v6173_v5, %v6171_v37  ;;  %v7333_v22 = vpack.c.bf16 %v6178_v38, %v6176_v6  ;;  %v6213_v37 = vld [vmem:[%s11820_s5 + $0x6b0] sm:$0xff]  ;;  %v6216_v5 = vld [vmem:[%s11820_s5 + $0x6c8] sm:$0xff]  ;;  %v6215_v38 = vld [vmem:[%s11820_s5 + $0x6c0] sm:$0xff] }
 0x4e8   : > { %7300 = vmatpush1.bf16.msra.mxu0 %v7299_v26  ;;  %v6182_v26 = vld [vmem:[%s11820_s5 + $0x5c8] sm:$0xff] }
 0x4e9   : > { %7302 = vmatprep.subr.bf16.mxu0 %v7301_v3  ;;  %v7335_v3 = vpack.c.bf16 %v6177_v47, %v6175_v20  ;;  %v7337_v14 = vpack.c.bf16 %v6182_v26, %v6180_v15  ;;  %v6222_v20 = vld [vmem:[%s11820_s5 + $0x6f8] sm:$0xff]  ;;  %v6219_v26 = vld [vmem:[%s11820_s5 + $0x6e0] sm:$0xff] }
 0x4ec   : > { %7304 = vmatpush1.bf16.msra.mxu0 %v7303_v24  ;;  %v6181_v24 = vld [vmem:[%s11820_s5 + $0x5c0] sm:$0xff] }
 0x4ed   : > { %4570 = vmatprep.subr.mxu0 %v6144_v32  ;;  %v6184_v32 = vld [vmem:[%s11820_s5 + $0x5d8] sm:$0xff]  ;;  %v7339_v49 = vpack.c.bf16 %v6181_v24, %v6179_v63 }
 0x4ee   : > { %v7341_v23 = vpack.c.bf16 %v6186_v46, %v6184_v32  ;;  %v6226_v63 = vld [vmem:[%s11820_s5 + $0x718] sm:$0xff]  ;;  %v6223_v46 = vld [vmem:[%s11820_s5 + $0x700] sm:$0xff] }
 0x4f0   : > { %4571 = vmatpush1.msra.mxu0 %v6143_v11  ;;  %v6190_v11 = vld [vmem:[%s11820_s5 + $0x608] sm:$0xff] }
 0x4f1   : > { %4587 = vmatmul.mubr.f32.vlgmr.msra.gmra.mrb[24].mxu0 %v10809_v33  ;;  %7306 = vmatprep.subr.bf16.mxu0 %v7305_v58  ;;  %v6160_v33 = vld [vmem:[%s11820_s5 + $0x518] sm:$0xff]  ;;  %v7343_v58 = vpack.c.bf16 %v6185_v30, %v6183_v61 }
 0x4f2   : > { %6146 = vmatprep.mubr.msk.f32.mxu0 %vm4292_vm13, %v10845_v42  ;;  %7308 = vmatpush1.bf16.msra.mxu0 %v7307_v12  ;;  %v6162_v42 = vld [vmem:[%s11820_s5 + $0x528] sm:$0xff]  ;;  %v7345_v12 = vpack.c.bf16 %v6190_v11, %v6188_v57  ;;  %v6230_v61 = vld [vmem:[%s11820_s5 + $0x738] sm:$0xff]  ;;  %v6227_v11 = vld [vmem:[%s11820_s5 + $0x720] sm:$0xff] }
 0x4f3   : > { %7310 = vmatprep.subr.bf16.mxu0 %v7309_v59  ;;  %v7317_v60 = vpack.c.bf16 %v6162_v42, %v6160_v33  ;;  %v6187_v59 = vld [vmem:[%s11820_s5 + $0x5f0] sm:$0xff]  ;;  %v6196_v33 = vld [vmem:[%s11820_s5 + $0x638] sm:$0xff]  ;;  %v6200_v42 = vld [vmem:[%s11820_s5 + $0x648] sm:$0xff] }
 0x4f4   : > { %v7347_v50 = vpack.c.bf16 %v6189_v16, %v6187_v59  ;;  %v6234_v59 = vld [vmem:[%s11820_s5 + $0x758] sm:$0xff] }
 0x4f5   : > { %4593 = vmatmul.mubr.f32.gmra.mrb[26].mxu0 %v10831_v56  ;;  %v6166_v56 = vld [vmem:[%s11820_s5 + $0x548] sm:$0xff] }
 0x4f6   : > { %7312 = vmatpush1.bf16.msra.mxu0 %v7311_v2  ;;  %6197 = vmatprep.mubr.msk.f32.mxu0 %vm4292_vm13, %v10822_v13  ;;  %v7319_v13 = vpack.c.bf16 %v6161_v17, %v6159_v45  ;;  %v7321_v43 = vpack.c.bf16 %v6166_v56, %v6164_v1  ;;  %v7349_v2 = vpack.c.bf16 %v6194_v52, %v6192_v19  ;;  %v6201_v45 = vld [vmem:[%s11820_s5 + $0x650] sm:$0xff]  ;;  %v6204_v17 = vld [vmem:[%s11820_s5 + $0x668] sm:$0xff]  ;;  %v6206_v1 = vld [vmem:[%s11820_s5 + $0x678] sm:$0xff] }
 0x4f7   : > { %7314 = vmatprep.subr.bf16.mxu0 %v7313_v9  ;;  %v6191_v9 = vld [vmem:[%s11820_s5 + $0x610] sm:$0xff]  ;;  %v7357_v10 = vpack.c.bf16 %v6206_v1, %v6204_v17  ;;  %v6231_v52 = vld [vmem:[%s11820_s5 + $0x740] sm:$0xff] }
 0x4f8   : > { %v7351_v29 = vpack.c.bf16 %v6193_v44, %v6191_v9  ;;  %v6195_v56 = vld [vmem:[%s11820_s5 + $0x630] sm:$0xff]  ;;  %v6238_v9 = vld [vmem:[%s11820_s5 + $0x778] sm:$0xff]  ;;  %v6239_v1 = vld [vmem:[%s11820_s5 + $0x780] sm:$0xff] }
 0x4fa   : > { %7316 = vmatpush1.bf16.msra.mxu0 %v7315_v4  ;;  %v6202_v4 = vld [vmem:[%s11820_s5 + $0x658] sm:$0xff] }
 0x4fb   : > { %7318 = vmatprep.subr.bf16.mxu0 %v7317_v60  ;;  %v6199_v60 = vld [vmem:[%s11820_s5 + $0x640] sm:$0xff] }
 0x4fe   : > { %7320 = vmatpush1.bf16.msra.mxu0 %v7319_v13  ;;  %v7353_v13 = vpack.c.bf16 %v6202_v4, %v6200_v42  ;;  %v6237_v42 = vld [vmem:[%s11820_s5 + $0x770] sm:$0xff]  ;;  %v6240_v4 = vld [vmem:[%s11820_s5 + $0x788] sm:$0xff] }
 0x4ff   : > { %7322 = vmatprep.subr.bf16.mxu0 %v7321_v43  ;;  %v7355_v43 = vpack.c.bf16 %v6201_v45, %v6199_v60  ;;  %v6242_v60 = vld [vmem:[%s11820_s5 + $0x798] sm:$0xff] }
 0x500   : > { %v7393_v17 = vpack.c.bf16 %v6242_v60, %v6240_v4  ;;  %v597_v4 = vld [vmem:[%s11823_s8 + $0x28] sm:$0xff] }
 0x502   : > { %7324 = vmatpush1.bf16.msra.mxu0 %v7323_v55  ;;  %v6210_v55 = vld [vmem:[%s11820_s5 + $0x698] sm:$0xff] }
 0x503   : > { %7326 = vmatprep.subr.bf16.mxu0 %v7325_v7  ;;  %v7359_v7 = vpack.c.bf16 %v6205_v25, %v6203_v41  ;;  %v7361_v34 = vpack.c.bf16 %v6210_v55, %v6208_v62  ;;  %v6243_v25 = vld [vmem:[%s11820_s5 + $0x7a0] sm:$0xff]  ;;  %v6245_v62 = vld [vmem:[%s11820_s5 + $0x7b0] sm:$0xff] }
 0x504   : > { %v7399_v55 = vpack.c.bf16 %v6245_v62, %v6243_v25  ;;  %v604_v62 = vld [vmem:[%s11823_s8 + $0x60] sm:$0xff] }
 0x506   : > { %7328 = vmatpush1.bf16.msra.mxu0 %v7327_v0 }
 0x507   : > { %7330 = vmatprep.subr.bf16.mxu0 %v7329_v27  ;;  %v6211_v27 = vld [vmem:[%s11820_s5 + $0x6a0] sm:$0xff] }
 0x50a   : > { %7332 = vmatpush1.bf16.msra.mxu0 %v7331_v36  ;;  %v6217_v36 = vld [vmem:[%s11820_s5 + $0x6d0] sm:$0xff] }
 0x50b   : > { %7334 = vmatprep.subr.bf16.mxu0 %v7333_v22  ;;  %v6220_v22 = vld [vmem:[%s11820_s5 + $0x6e8] sm:$0xff]  ;;  %v7371_v47 = vpack.c.bf16 %v6217_v36, %v6215_v38 }
 0x50c   : > { %v7373_v15 = vpack.c.bf16 %v6222_v20, %v6220_v22 }
 0x50e   : > { %7336 = vmatpush1.bf16.msra.mxu0 %v7335_v3  ;;  %v6221_v3 = vld [vmem:[%s11820_s5 + $0x6f0] sm:$0xff] }
 0x50f   : > { %7338 = vmatprep.subr.bf16.mxu0 %v7337_v14  ;;  %v6224_v14 = vld [vmem:[%s11820_s5 + $0x708] sm:$0xff]  ;;  %v7375_v24 = vpack.c.bf16 %v6221_v3, %v6219_v26 }
 0x510   : > { %v7377_v32 = vpack.c.bf16 %v6226_v63, %v6224_v14 }
 0x512   : > { %7340 = vmatpush1.bf16.msra.mxu0 %v7339_v49  ;;  %v6225_v49 = vld [vmem:[%s11820_s5 + $0x710] sm:$0xff] }
 0x513   : > { %7342 = vmatprep.subr.bf16.mxu0 %v7341_v23  ;;  %v6228_v23 = vld [vmem:[%s11820_s5 + $0x728] sm:$0xff]  ;;  %v7379_v30 = vpack.c.bf16 %v6225_v49, %v6223_v46 }
 0x514   : > { %v7381_v57 = vpack.c.bf16 %v6230_v61, %v6228_v23 }
 0x516   : > { %7344 = vmatpush1.bf16.msra.mxu0 %v7343_v58  ;;  %v6229_v58 = vld [vmem:[%s11820_s5 + $0x730] sm:$0xff] }
 0x517   : > { %7346 = vmatprep.subr.bf16.mxu0 %v7345_v12  ;;  %v6232_v12 = vld [vmem:[%s11820_s5 + $0x748] sm:$0xff]  ;;  %v7383_v16 = vpack.c.bf16 %v6229_v58, %v6227_v11 }
 0x518   : > { %v7385_v19 = vpack.c.bf16 %v6234_v59, %v6232_v12 }
 0x51a   : > { %7348 = vmatpush1.bf16.msra.mxu0 %v7347_v50  ;;  %v6233_v50 = vld [vmem:[%s11820_s5 + $0x750] sm:$0xff] }
 0x51b   : > { %7350 = vmatprep.subr.bf16.mxu0 %v7349_v2  ;;  %v6236_v2 = vld [vmem:[%s11820_s5 + $0x768] sm:$0xff]  ;;  %v7387_v44 = vpack.c.bf16 %v6233_v50, %v6231_v52  ;;  %v592_v50 = vld [vmem:[%s11823_s8] sm:$0xff] }
 0x51e   : > { %7352 = vmatpush1.bf16.msra.mxu0 %v7351_v29  ;;  %v7389_v29 = vpack.c.bf16 %v6238_v9, %v6236_v2  ;;  %v593_v2 = vld [vmem:[%s11823_s8 + $0x8] sm:$0xff]  ;;  %v594_v9 = vld [vmem:[%s11823_s8 + $0x10] sm:$0xff] }
 0x51f   : > { %4718 = vmatprep.subr.mxu0 %v6196_v33  ;;  %v6235_v33 = vld [vmem:[%s11820_s5 + $0x760] sm:$0xff] }
 0x520   : > { %v7391_v45 = vpack.c.bf16 %v6237_v42, %v6235_v33  ;;  %v596_v42 = vld [vmem:[%s11823_s8 + $0x20] sm:$0xff] }
 0x521   : > { %v7414_v60 = vpack.c.bf16 %v597_v4, %v596_v42  ;;  %v5155_v42 = vld [vmem:[%s11824_s9 + $0x30] sm:$0x3]  ;;  %v6258_v4 = vld [vmem:[%s11824_s9 + $0x38] sm:$0xff] }
 0x522   : > { %4719 = vmatpush1.msra.mxu0 %v6195_v56  ;;  %v6241_v56 = vld [vmem:[%s11820_s5 + $0x790] sm:$0xff] }
 0x523   : > { %4735 = vmatmul.mubr.f32.vlgmr.msra.gmra.mrb[24].mxu0 %v10812_v28  ;;  %7354 = vmatprep.subr.bf16.mxu0 %v7353_v13  ;;  %v6212_v28 = vld [vmem:[%s11820_s5 + $0x6a8] sm:$0xff] }
 0x524   : > { %6198 = vmatprep.mubr.msk.f32.mxu0 %vm4292_vm13, %v10848_v35  ;;  %7356 = vmatpush1.bf16.msra.mxu0 %v7355_v43  ;;  %v6214_v35 = vld [vmem:[%s11820_s5 + $0x6b8] sm:$0xff]  ;;  %v6244_v13 = vld [vmem:[%s11820_s5 + $0x7a8] sm:$0xff] }
 0x525   : > { %7358 = vmatprep.subr.bf16.mxu0 %v7357_v10  ;;  %v7365_v0 = vpack.c.bf16 %v6214_v35, %v6212_v28  ;;  %v6246_v43 = vld [vmem:[%s11820_s5 + $0x7b8] sm:$0xff]  ;;  %v7395_v10 = vpack.c.bf16 %v6241_v56, %v6239_v1  ;;  %v11930_v28 = vsub.s32 0, %v11929_v21  ;;  %v600_v56 = vld [vmem:[%s11823_s8 + $0x40] sm:$0xff] }
 0x526   : > { %v7397_v41 = vpack.c.bf16 %v6246_v43, %v6244_v13  ;;  %v601_v13 = vld [vmem:[%s11823_s8 + $0x48] sm:$0xff] }
 0x527   : > { %4741 = vmatmul.mubr.f32.gmra.mrb[26].mxu0 %v10834_v40  ;;  %v6218_v40 = vld [vmem:[%s11820_s5 + $0x6d8] sm:$0xff]  ;;  %v4903_v35 = vrot.slane %v613_v53, %v11930_v28  ;;  %v7420_v43 = vpack.c.bf16 %v601_v13, %v600_v56  ;;  %v608_v28 = vld [vmem:[%s11823_s8 + $0x80] sm:$0xff] }
 0x528   : > { %7360 = vmatpush1.bf16.msra.mxu0 %v7359_v7  ;;  %6249 = vmatprep.mubr.msk.f32.mxu0 %vm4292_vm13, %v10858_v8  ;;  %v7367_v8 = vpack.c.bf16 %v6213_v37, %v6211_v27  ;;  %v7369_v6 = vpack.c.bf16 %v6218_v40, %v6216_v5  ;;  %v6248_v7 = vld [vmem:[%s11820_s5 + $0x7c8] sm:$0xff] }
 0x529   : > { %7362 = vmatprep.subr.bf16.mxu0 %v7361_v34  ;;  %v6247_v34 = vld [vmem:[%s11820_s5 + $0x7c0] sm:$0xff] }
 0x52c   : > { %7364 = vmatpush1.bf16.msra.mxu0 %v7363_v54  ;;  %v11931_v54 = vsub.s32 1, %v11929_v21 }
 0x52d   : > { %7366 = vmatprep.subr.bf16.mxu0 %v7365_v0 }
 0x52e   : > { %v4907_v0 = vrot.slane %v613_v53, %v11931_v54  ;;  %v607_v53 = vld [vmem:[%s11823_s8 + $0x78] sm:$0xff] }
 0x530   : > { %7368 = vmatpush1.bf16.msra.mxu0 %v7367_v8 }
 0x531   : > { %7370 = vmatprep.subr.bf16.mxu0 %v7369_v6 }
 0x534   : > { %7372 = vmatpush1.bf16.msra.mxu0 %v7371_v47 }
 0x535   : > { %7374 = vmatprep.subr.bf16.mxu0 %v7373_v15 }
 0x538   : > { %7376 = vmatpush1.bf16.msra.mxu0 %v7375_v24 }
 0x539   : > { %7378 = vmatprep.subr.bf16.mxu0 %v7377_v32 }
 0x53c   : > { %7380 = vmatpush1.bf16.msra.mxu0 %v7379_v30 }
 0x53d   : > { %7382 = vmatprep.subr.bf16.mxu0 %v7381_v57 }
 0x540   : > { %7384 = vmatpush1.bf16.msra.mxu0 %v7383_v16 }
 0x541   : > { %7386 = vmatprep.subr.bf16.mxu0 %v7385_v19 }
 0x544   : > { %7388 = vmatpush1.bf16.msra.mxu0 %v7387_v44  ;;  %v7408_v44 = vpack.c.bf16 %v593_v2, %v592_v50  ;;  %v5151_v50 = vld [vmem:[%s11824_s9 + $0x10] sm:$0xff]  ;;  %v5152_v2 = vld [vmem:[%s11824_s9 + $0x18] sm:$0xff] }
 0x545   : > { %7390 = vmatprep.subr.bf16.mxu0 %v7389_v29  ;;  %v595_v29 = vld [vmem:[%s11823_s8 + $0x18] sm:$0xff] }
 0x546   : > { %7409 = vmatpush1.bf16.msra.mxu1 %v7408_v44  ;;  %v7411_v33 = vpack.c.bf16 %v595_v29, %v594_v9  ;;  %v7442_v9 = vpack.c.bf16 %v5152_v2, %v5151_v50  ;;  %v5153_v44 = vld [vmem:[%s11824_s9 + $0x20] sm:$0xff]  ;;  %v5154_v29 = vld [vmem:[%s11824_s9 + $0x28] sm:$0xff]  ;;  %v5581_v50 = vld [vmem:[%s11826_s11 + $0x30] sm:$0xff] }
 0x547   : > { %7410 = vmatprep.subr.bf16.mxu1 %v8031_v18  ;;  %v5582_v2 = vld [vmem:[%s11826_s11 + $0x38] sm:$0xff] }
 0x548   : > { %7392 = vmatpush1.bf16.msra.mxu0 %v7391_v45  ;;  %v598_v45 = vld [vmem:[%s11823_s8 + $0x30] sm:$0xff] }
 0x549   : > { %7394 = vmatprep.subr.bf16.mxu0 %v7393_v17  ;;  %v599_v17 = vld [vmem:[%s11823_s8 + $0x38] sm:$0xff] }
 0x54a   : > { %7412 = vmatpush1.bf16.msra.mxu1 %v7411_v33  ;;  %v7417_v1 = vpack.c.bf16 %v599_v17, %v598_v45  ;;  %v7445_v33 = vpack.c.bf16 %v5154_v29, %v5153_v44  ;;  %v6260_v17 = vld [vmem:[%s11824_s9 + $0x48] sm:$0xff]  ;;  %v5583_v44 = vld [vmem:[%s11826_s11 + $0x40] sm:$0xff] }
 0x54b   : > { %7413 = vmatprep.subr.bf16.mxu1 %v8031_v18  ;;  %v5584_v29 = vld [vmem:[%s11826_s11 + $0x48] sm:$0xff] }
 0x54c   : > { %7396 = vmatpush1.bf16.msra.mxu0 %v7395_v10  ;;  %v602_v10 = vld [vmem:[%s11823_s8 + $0x50] sm:$0xff] }
 0x54d   : > { %7398 = vmatprep.subr.bf16.mxu0 %v7397_v41  ;;  %v603_v41 = vld [vmem:[%s11823_s8 + $0x58] sm:$0xff] }
 0x54e   : > { %7415 = vmatpush1.bf16.msra.mxu1 %v7414_v60  ;;  %v7423_v25 = vpack.c.bf16 %v603_v41, %v602_v10  ;;  %v6259_v60 = vld [vmem:[%s11824_s9 + $0x40] sm:$0xff]  ;;  %v6262_v10 = vld [vmem:[%s11824_s9 + $0x58] sm:$0xff] }
 0x54f   : > { %7416 = vmatprep.subr.bf16.mxu1 %v8031_v18  ;;  %v7448_v45 = vpack.c.bf16 %v6259_v60, %v6258_v4  ;;  %v6263_v41 = vld [vmem:[%s11824_s9 + $0x60] sm:$0xff]  ;;  %v5586_v4 = vld [vmem:[%s11826_s11 + $0x58] sm:$0xff] }
 0x550   : > { %7400 = vmatpush1.bf16.msra.mxu0 %v7399_v55  ;;  %v605_v55 = vld [vmem:[%s11823_s8 + $0x68] sm:$0xff] }
 0x551   : > { %4866 = vmatprep.subr.mxu0 %v6248_v7  ;;  %v7426_v7 = vpack.c.bf16 %v605_v55, %v604_v62  ;;  %v6267_v62 = vld [vmem:[%s11824_s9 + $0x70] sm:$0xff]  ;;  %v6268_v55 = vld [vmem:[%s11824_s9 + $0x78] sm:$0xff] }
 0x552   : > { %7418 = vmatpush1.bf16.msra.mxu1 %v7417_v1  ;;  %v6261_v1 = vld [vmem:[%s11824_s9 + $0x50] sm:$0xff] }
 0x553   : > { %7419 = vmatprep.subr.bf16.mxu1 %v8031_v18 }
 0x554   : > { %4867 = vmatpush1.msra.mxu0 %v6247_v34  ;;  %v606_v34 = vld [vmem:[%s11823_s8 + $0x70] sm:$0xff] }
 0x555   : > { %4883 = vmatmul.mubr.f32.vlgmr.msra.gmra.mrb[24].mxu0 %v10861_v39  ;;  %v7429_v21 = vpack.c.bf16 %v607_v53, %v606_v34  ;;  %v7457_v34 = vpack.c.bf16 %v6268_v55, %v6267_v62 }
 0x556   : > { %6250 = vmatprep.mubr.msk.f32.mxu0 %vm4292_vm13, %v10864_v48  ;;  %7421 = vmatpush1.bf16.msra.mxu1 %v7420_v43  ;;  %v7451_v43 = vpack.c.bf16 %v6261_v1, %v6260_v17 }
 0x557   : > { %7422 = vmatprep.subr.bf16.mxu1 %v8031_v18 }
 0x559   : > { %4889 = vmatmul.mubr.f32.gmra.mrb[26].mxu0 %v10867_v31 }
 0x55a   : > { %5064 = vmatprep.mubr.f32.mxu0 %v11906_v51  ;;  %7424 = vmatpush1.bf16.msra.mxu1 %v7423_v25  ;;  %v7454_v25 = vpack.c.bf16 %v6263_v41, %v6262_v10 }
 0x55b   : > { %7425 = vmatprep.subr.bf16.mxu1 %v8031_v18 }
 0x55e   : > { %7427 = vmatpush1.bf16.msra.mxu1 %v7426_v7  ;;  %v6264_v7 = vld [vmem:[%s11824_s9 + $0x68] sm:$0x3] }
 0x55f   : > { %7428 = vmatprep.subr.bf16.mxu1 %v8031_v18 }
 0x562   : > { %7430 = vmatpush1.bf16.msra.mxu1 %v7429_v21  ;;  %v6269_v21 = vld [vmem:[%s11824_s9 + $0x80] sm:$0xff] }
 0x563   : > { %7431 = vmatprep.subr.bf16.mxu1 %v8031_v18 }
 0x628   : > { %v4884_v27 = vpop.f32.mrb[24].mxu0 }
 0x629   : > { %v4910_v37 = vadd.f32 %v4903_v35, %v4884_v27  ;;  %v4886_v39 = vpop.f32.mrb[25].mxu0 }
 0x62a   : > { %v4911_v5 = vadd.f32 %v4907_v0, %v4886_v39 }
 0x62b   : > { %v4914_v48 = vmax.f32 %v4910_v37, 0.0 }
 0x62c   : > { %v4890_v40 = vpop.f32.mrb[26].mxu0  ;;  %v4915_v6 = vmax.f32 %v4911_v5, 0.0 }
 0x62d   : > { %v4912_v8 = vadd.f32 %v4903_v35, %v4890_v40  ;;  %v4892_v31 = vpop.f32.mrb[27].mxu0  ;;  %v4922_v20 = vrot.slane %v4914_v48, 1  ;;  %v4936_v47 = vrot.slane %v4914_v48, 2  ;;  %v609_v35 = vld [vmem:[%s11823_s8 + $0x88] sm:$0xff] }
 0x62e   : > { %v4913_v38 = vadd.f32 %v4907_v0, %v4892_v31  ;;  %v4925_v3 = vrot.slane %v4915_v6, 1  ;;  %v4939_v14 = vrot.slane %v4915_v6, 2  ;;  %v7432_v54 = vpack.c.bf16 %v609_v35, %v608_v28  ;;  %v6270_v28 = vld [vmem:[%s11824_s9 + $0x88] sm:$0xff] }
 0x62f   : > { %v4916_v36 = vmax.f32 %v4912_v8, 0.0  ;;  %v7460_v35 = vpack.c.bf16 %v6270_v28, %v6269_v21 }
 0x630   : > { %v4917_v22 = vmax.f32 %v4913_v38, 0.0  ;;  %7433 = vmatpush1.bf16.msra.mxu1 %v7432_v54  ;;  %v6271_v54 = vld [vmem:[%s11824_s9 + $0x90] sm:$0xff] }
 0x631   : > { %v4923_v15 = vrot.slane %v4916_v36, 1  ;;  %v4937_v26 = vrot.slane %v4916_v36, 2  ;;  %7434 = vmatprep.subr.bf16.mxu1 %v8031_v18 }
 0x632   : > { %v4926_v63 = vrot.slane %v4917_v22, 1  ;;  %v4940_v24 = vrot.slane %v4917_v22, 2 }
 0x633   : > { %v4924_v32 = vsel %vm711_vm0, %v4922_v20, %v4923_v15  ;;  %v4934_v46 = vmax.f32 %v4916_v36, %v4923_v15  ;;  %v4938_v49 = vsel %vm1463_vm2, %v4936_v47, %v4937_v26 }
 0x634   : > { %v4927_v23 = vsel %vm711_vm0, %v4925_v3, %v4926_v63  ;;  %v4935_v61 = vmax.f32 %v4917_v22, %v4926_v63  ;;  %v4932_v30 = vmax.f32 %v4914_v48, %v4924_v32  ;;  %v4941_v57 = vsel %vm1463_vm2, %v4939_v14, %v4940_v24 }
 0x635   : > { %v11463_v11 = vmax.f32 %v4934_v46, %v4937_v26  ;;  %v4933_v58 = vmax.f32 %v4915_v6, %v4927_v23  ;;  %vm5071_vm0 = vcmask 244736   ;;  %vm5589_vm2 = vcmask 818176  }
 0x636   : > { %v11465_v12 = vmax.f32 %v4935_v61, %v4940_v24  ;;  %v11467_v59 = vmax.f32 %v4932_v30, %v4938_v49  ;;  %v591_v30 = vld [vmem:[%s11822_s7] sm:$0x1f] }
 0x637   : > { %v11469_v16 = vmax.f32 %v4933_v58, %v4941_v57  ;;  %v610_v57 = vld [vmem:[%s11823_s8 + $0x90] sm:$0xff] }
 0x638   : > { %v7943_v19 = vpack.i.bf16 %v11465_v12, %v11463_v11 }
 0x639   : > { %v7948_v52 = vpack.i.bf16 %v11469_v16, %v11467_v59 }
 0x63a   : > { %7944 = vrot.lane.b32.xlu1 %v7943_v19, %s11932_s23 }
 0x63b   : > { %7949 = vrot.lane.b32.xlu0 %v7948_v52, %s11932_s23 }
 0x63e   : > { %7959 = vrot.lane.b32.xlu1 %v7943_v19, %s11933_s17 }
 0x63f   : > { %7954 = vrot.lane.b32.xlu0 %v7948_v52, %s11933_s17  ;;  %s7967_s17 = sshll.u32 %s8033_s29, 4  ;;  %s7968_s17 = int_to_ptr.vmem [resolvable:$false] %s7967_s17 }
 0x640   : > { %s7969_s19 = scalar_lea.vmem %s7968_s17, 32  ;;  %p7970_p0 = scmp.lt.s32.totalorder %s11775_s16, %s7968_s17 }
 0x641   : > { %p7971_p1 = scmp.lt.s32.totalorder %s7969_s19, %s7963_s15 }
 0x643   : > { %p7972_p2 = por %p7971_p1, %p7970_p0 }
 0x645   : > { %p7973_p3 = pnand %p7972_p2, %p7966_p13 }
 0x6ac   : > { %v7945_v0 = vpop.permute.xlu1 %7944 }
 0x6ad   : > { %v7947_v27 = vunpack.i.h.bf16 %v7945_v0  ;;  %v7946_v37 = vunpack.i.l.bf16 %v7945_v0  ;;  %v7950_v39 = vpop.permute.xlu0 %7949  ;;  %v6272_v0 = vld [vmem:[%s11824_s9 + $0x98] sm:$0xff] }
 0x6ae   : > { %v7952_v5 = vunpack.i.h.bf16 %v7950_v39  ;;  %v7951_v40 = vunpack.i.l.bf16 %v7950_v39  ;;  %v6277_v39 = vld [vmem:[%s11824_s9 + $0xb0] sm:$0xff] }
 0x6af   : > { %v4963_v48 = vsel %vm3330_vm5, %v7946_v37, %v7947_v27  ;;  %v4971_v6 = vmax.f32 %v11465_v12, %v7947_v27  ;;  %v5149_v12 = vld [vmem:[%s11824_s9] sm:$0xff]  ;;  %v7463_v27 = vpack.c.bf16 %v6272_v0, %v6271_v54  ;;  %v6276_v37 = vld [vmem:[%s11824_s9 + $0xa8] sm:$0xff] }
 0x6b0   : > { %v4962_v8 = vsel %vm3330_vm5, %v7951_v40, %v7952_v5  ;;  %v7960_v31 = vpop.permute.xlu1 %7959  ;;  %v4970_v20 = vmax.f32 %v11463_v11, %v4963_v48  ;;  %v4969_v47 = vmax.f32 %v11469_v16, %v7952_v5  ;;  %v611_v11 = vld [vmem:[%s11823_s8 + $0x98] sm:$0x3f]  ;;  %v6273_v5 = vld [vmem:[%s11824_s9 + $0xa0] sm:$0x3]  ;;  %v7466_v40 = vpack.c.bf16 %v6277_v39, %v6276_v37 }
 0x6b1   : > { %v7962_v38 = vunpack.i.h.bf16 %v7960_v31  ;;  %v7961_v36 = vunpack.i.l.bf16 %v7960_v31  ;;  %v7955_v22 = vpop.permute.xlu0 %7954  ;;  %v4968_v3 = vmax.f32 %v11467_v59, %v4962_v8  ;;  %v7435_v58 = vpack.c.bf16 %v611_v11, %v610_v57  ;;  %v5150_v59 = vld [vmem:[%s11824_s9 + $0x8] sm:$0xff]  ;;  %v6278_v8 = vld [vmem:[%s11824_s9 + $0xb8] sm:$0xff]  ;;  %v6279_v31 = vld [vmem:[%s11824_s9 + $0xc0] sm:$0xff] }
 0x6b2   : > { %v7957_v15 = vunpack.i.h.bf16 %v7955_v22  ;;  %v7956_v26 = vunpack.i.l.bf16 %v7955_v22  ;;  %v7439_v19 = vpack.c.bf16 %v5150_v59, %v5149_v12  ;;  %v5578_v12 = vld [vmem:[%s11826_s11 + $0x18] sm:$0xff] }
 0x6b3   : > { %v4981_v14 = vsel %vm3523_vm6, %v7961_v36, %v7962_v38  ;;  %v4989_v63 = vmax.f32 %v4971_v6, %v7962_v38  ;;  %7437 = vmatpush1.bf16.msk.msra.mxu1 %vm7402_vm14, %v7435_v58  ;;  %v7469_v6 = vpack.c.bf16 %v6279_v31, %v6278_v8  ;;  %v6280_v38 = vld [vmem:[%s11824_s9 + $0xc8] sm:$0xff]  ;;  %v6281_v36 = vld [vmem:[%s11824_s9 + $0xd0] sm:$0xff] }
 0x6b4   : > { %v4988_v24 = vmax.f32 %v4970_v20, %v4981_v14  ;;  %v4980_v32 = vsel %vm3523_vm6, %v7956_v26, %v7957_v15  ;;  %v4987_v46 = vmax.f32 %v4969_v47, %v7957_v15  ;;  %7438 = vmatprep.subr.bf16.mxu1 %v8031_v18  ;;  %v7472_v22 = vpack.c.bf16 %v6281_v36, %v6280_v38  ;;  %v6285_v20 = vld [vmem:[%s11824_s9 + $0xe0] sm:$0xff]  ;;  %v6286_v47 = vld [vmem:[%s11824_s9 + $0xe8] sm:$0xff]  ;;  %v6282_v15 = vld [vmem:[%s11824_s9 + $0xd8] sm:$0x3] }
 0x6b5   : > { %v4986_v49 = vmax.f32 %v4968_v3, %v4980_v32  ;;  %v7475_v26 = vpack.c.bf16 %v6286_v47, %v6285_v20  ;;  %v6287_v14 = vld [vmem:[%s11824_s9 + $0xf0] sm:$0xff]  ;;  %v6289_v32 = vld [vmem:[%s11824_s9 + $0x100] sm:$0xff] }
 0x6b6   : > { %v7401_v23 = vpack.c.bf16 %v4989_v63, %v4987_v46  ;;  %v6288_v63 = vld [vmem:[%s11824_s9 + $0xf8] sm:$0xff]  ;;  %v6290_v46 = vld [vmem:[%s11824_s9 + $0x108] sm:$0xff]  ;;  %v5577_v58 = vld [vmem:[%s11826_s11 + $0x10] sm:$0xff] }
 0x6b7   : > { %v7404_v61 = vpack.c.bf16 %v4988_v24, %v4986_v49  ;;  %v7478_v24 = vpack.c.bf16 %v6288_v63, %v6287_v14  ;;  %v7481_v49 = vpack.c.bf16 %v6290_v46, %v6289_v32  ;;  %v7487_v59 = vpack.c.bf16 %v5578_v12, %v5577_v58 }
 0x6b8   : > { %7403 = vmatprep.subr.msk.bf16.mxu0 %vm7402_vm14, %v7401_v23  ;;  %v5575_v23 = vld [vmem:[%s11826_s11] sm:$0xff] }
 0x6b9   : > { %7406 = vmatpush1.bf16.msk.msra.mxu0 %vm7402_vm14, %v7404_v61  ;;  %v5576_v61 = vld [vmem:[%s11826_s11 + $0x8] sm:$0xff] }
 0x6ba   : > { %v7484_v57 = vpack.c.bf16 %v5576_v61, %v5575_v23 }
 0x6bc   : > { %6253 = vmatmul.mubr.msk.f32.vlgmr.msra.gmra.mrb[28].mxu0 %vm4990_vm15, %v591_v30  ;;  %v6291_v30 = vld [vmem:[%s11824_s9 + $0x110] sm:$0x3] }
 0x78f   : > { %v5066_v16 = vpop.f32.mrb[28].mxu0 }
 0x790   : > { %v5068_v52 = vpop.f32.mrb[29].mxu0 }
 0x791   : > { %6255 = vmatprep.mubr.msk.f32.mxu1 %vm5071_vm0, %v5068_v52 }
 0x792   : > { %5143 = vmatmul.mubr.f32.vlgmr.msra.gmra.mrb[40].mxu1 %v5066_v16  ;;  %v5579_v16 = vld [vmem:[%s11826_s11 + $0x20] sm:$0xff] }
 0x793   : > { %7440 = vmatpush3.bf16.msra.mxu1 %v7439_v19  ;;  %6624 = vmatprep.mubr.msk.f32.mxu1 %vm8032_vm11, %v11906_v51  ;;  %v5580_v19 = vld [vmem:[%s11826_s11 + $0x28] sm:$0xff] }
 0x794   : > { %7441 = vmatprep.subr.bf16.mxu1 %v8031_v18  ;;  %v7490_v52 = vpack.c.bf16 %v5580_v19, %v5579_v16 }
 0x797   : > { %7443 = vmatpush3.bf16.msra.mxu1 %v7442_v9  ;;  %v7493_v9 = vpack.c.bf16 %v5582_v2, %v5581_v50 }
 0x798   : > { %7444 = vmatprep.subr.bf16.mxu1 %v8031_v18 }
 0x79b   : > { %7446 = vmatpush3.bf16.msra.mxu1 %v7445_v33  ;;  %v7496_v33 = vpack.c.bf16 %v5584_v29, %v5583_v44 }
 0x79c   : > { %6622 = vmatprep.subr.mxu1 %v11906_v51 }
 0x79f   : > { %6623 = vmatpush3.msk.msra.mxu1 %vm3646_vm7, %v5155_v42  ;;  %v5585_v42 = vld [vmem:[%s11826_s11 + $0x50] sm:$0xff] }
 0x7a0   : > { %7447 = vmatprep.subr.bf16.mxu1 %v8031_v18  ;;  %v7499_v60 = vpack.c.bf16 %v5586_v4, %v5585_v42 }
 0x865   : > { %v11602_v56 = vpop.f32.mrb[40].mxu1 }
 0x866   : > { %6625 = vmatmul.mubr.msk.f32.vlgmr.msra.gmra.mrb[42].mxu1 %vm5156_vm1, %v11602_v56  ;;  %v5146_v13 = vpop.f32.mrb[41].mxu1  ;;  %v5242_v53 = vrot.slane %v11602_v56, 1  ;;  %v5327_v48 = vrot.slane %v11602_v56, 2  ;;  %v5412_v3 = vrot.slane %v11602_v56, 3  ;;  %v5497_v11 = vrot.slane %v11602_v56, 4 }
 0x867   : > { %7449 = vmatpush3.bf16.msra.mxu1 %v7448_v45  ;;  %6641 = vmatprep.mubr.msk.f32.mxu1 %vm8032_vm11, %v11906_v51  ;;  %v5587_v45 = vld [vmem:[%s11826_s11 + $0x60] sm:$0xf] }
 0x868   : > { %7450 = vmatprep.subr.bf16.mxu1 %v8031_v18 }
 0x86b   : > { %7452 = vmatpush3.bf16.msra.mxu1 %v7451_v43 }
 0x86c   : > { %7453 = vmatprep.subr.bf16.mxu1 %v8031_v18 }
 0x86f   : > { %7455 = vmatpush3.bf16.msra.mxu1 %v7454_v25 }
 0x870   : > { %6639 = vmatprep.subr.mxu1 %v11906_v51 }
 0x873   : > { %6640 = vmatpush3.msk.msra.mxu1 %vm3646_vm7, %v6264_v7 }
 0x874   : > { %6642 = vmatmul.mubr.msk.f32.vlgmr.msra.gmra.mrb[42].mxu1 %vm5156_vm1, %v5242_v53  ;;  %7456 = vmatprep.subr.bf16.mxu1 %v8031_v18 }
 0x875   : > { %7458 = vmatpush3.bf16.msra.mxu1 %v7457_v34  ;;  %6658 = vmatprep.mubr.msk.f32.mxu1 %vm8032_vm11, %v11906_v51 }
 0x876   : > { %7459 = vmatprep.subr.bf16.mxu1 %v8031_v18 }
 0x879   : > { %7461 = vmatpush3.bf16.msra.mxu1 %v7460_v35 }
 0x87a   : > { %7462 = vmatprep.subr.bf16.mxu1 %v8031_v18 }
 0x87d   : > { %7464 = vmatpush3.bf16.msra.mxu1 %v7463_v27 }
 0x87e   : > { %6656 = vmatprep.subr.mxu1 %v11906_v51 }
 0x881   : > { %6657 = vmatpush3.msk.msra.mxu1 %vm3646_vm7, %v6273_v5 }
 0x882   : > { %6659 = vmatmul.mubr.msk.f32.vlgmr.msra.gmra.mrb[42].mxu1 %vm5156_vm1, %v5327_v48  ;;  %7465 = vmatprep.subr.bf16.mxu1 %v8031_v18 }
 0x883   : > { %7467 = vmatpush3.bf16.msra.mxu1 %v7466_v40  ;;  %6675 = vmatprep.mubr.msk.f32.mxu1 %vm8032_vm11, %v11906_v51 }
 0x884   : > { %7468 = vmatprep.subr.bf16.mxu1 %v8031_v18 }
 0x887   : > { %7470 = vmatpush3.bf16.msra.mxu1 %v7469_v6 }
 0x888   : > { %7471 = vmatprep.subr.bf16.mxu1 %v8031_v18 }
 0x88b   : > { %7473 = vmatpush3.bf16.msra.mxu1 %v7472_v22 }
 0x88c   : > { %6673 = vmatprep.subr.mxu1 %v11906_v51 }
 0x88f   : > { %6674 = vmatpush3.msk.msra.mxu1 %vm3646_vm7, %v6282_v15 }
 0x890   : > { %6676 = vmatmul.mubr.msk.f32.vlgmr.msra.gmra.mrb[42].mxu1 %vm5156_vm1, %v5412_v3  ;;  %7474 = vmatprep.subr.bf16.mxu1 %v8031_v18 }
 0x891   : > { %7476 = vmatpush3.bf16.msra.mxu1 %v7475_v26  ;;  %6692 = vmatprep.mubr.msk.f32.mxu1 %vm8032_vm11, %v11906_v51 }
 0x892   : > { %7477 = vmatprep.subr.bf16.mxu1 %v8031_v18 }
 0x895   : > { %7479 = vmatpush3.bf16.msra.mxu1 %v7478_v24 }
 0x896   : > { %7480 = vmatprep.subr.bf16.mxu1 %v8031_v18 }
 0x899   : > { %7482 = vmatpush3.bf16.msra.mxu1 %v7481_v49 }
 0x89a   : > { %6690 = vmatprep.subr.mxu1 %v11906_v51 }
 0x89d   : > { %6691 = vmatpush3.msk.msra.mxu1 %vm3646_vm7, %v6291_v30 }
 0x89e   : > { %6693 = vmatmul.mubr.msk.f32.vlgmr.msra.gmra.mrb[42].mxu1 %vm5156_vm1, %v5497_v11  ;;  %7483 = vmatprep.subr.bf16.mxu1 %v8031_v18 }
 0x89f   : > { %7485 = vmatpush3.bf16.msra.mxu1 %v7484_v57  ;;  %6721 = vmatprep.mubr.msk.f32.mxu1 %vm8032_vm11, %v11906_v51 }
 0x8a0   : > { %7486 = vmatprep.subr.bf16.mxu1 %v8031_v18 }
 0x8a3   : > { %7488 = vmatpush3.bf16.msra.mxu1 %v7487_v59 }
 0x8a4   : > { %7489 = vmatprep.subr.bf16.mxu1 %v8031_v18 }
 0x8a7   : > { %7491 = vmatpush3.bf16.msra.mxu1 %v7490_v52 }
 0x8a8   : > { %7492 = vmatprep.subr.bf16.mxu1 %v8031_v18 }
 0x8ab   : > { %7494 = vmatpush3.bf16.msra.mxu1 %v7493_v9 }
 0x8ac   : > { %7495 = vmatprep.subr.bf16.mxu1 %v8031_v18 }
 0x8af   : > { %7497 = vmatpush3.bf16.msra.mxu1 %v7496_v33 }
 0x8b0   : > { %7498 = vmatprep.subr.bf16.mxu1 %v8031_v18  ;;  %v5148_v18 = vld [vmem:[%s11825_s10] sm:$0x1] }
 0x8b3   : > { %7500 = vmatpush3.bf16.msra.mxu1 %v7499_v60 }
 0x8b4   : > { %6719 = vmatprep.subr.mxu1 %v11906_v51  ;;  %v5588_v51 = vld [vmem:[%s11827_s12] sm:$0x1] }
 0x8b7   : > { %6720 = vmatpush3.msk.msra.mxu1 %vm2351_vm4, %v5587_v45 }
 0x971   : > { %v5569_v17 = vpop.f32.mrb[42].mxu1 }
 0x972   : > { %v7501_v1 = vadd.f32 %v5569_v17, %v5148_v18  ;;  %v6694_v56 = vpop.f32.mrb[43].mxu1 }
 0x974   : > { %v5574_v13 = vmax.f32 %v7501_v1, 0.0 }
 0x976   : > { %6722 = vmatmul.mubr.msk.f32.vlgmr.msra.gmra.mrb[44].mxu1 %vm5589_vm2, %v5574_v13 }
 0xa49   : > { %v5662_v43 = vpop.f32.mrb[44].mxu1 }
 0xa4a   : > { %v5663_v10 = vadd.f32 %v5662_v43, %v5588_v51  ;;  %v6723_v41 = vpop.f32.mrb[45].mxu1 }
 0xa4c   : > { %5667 = vst.msk [vmem:[%s432_s30] sm:$0x1] %vm5666_vm3, %v5663_v10 }
 0xa4d   : > { %7976 = shalt.err (!%p7973_p3)
}
 0xa4e   : > { %s7977_s22 = scalar_lea.hbm %s11773_s20, 16  ;;  %s7981_s30 = scalar_lea.hbm %s11828_s13, 32 }
 0xa4f   : > { %p7978_p4 = scmp.ne.s32.totalorder %s11773_s20, %s7977_s22  ;;  %p7982_p9 = scmp.lt.u32.totalorder %s11773_s20, %s11828_s13 }
 0xa50   : > { %p7983_p10 = scmp.lt.u32.totalorder %s7981_s30, %s7977_s22  ;;  %p7985_p12 = scmp.lt.u32.totalorder %s7977_s22, %s11773_s20 }
 0xa51   : > { %p7979_p7 = pnand %p7978_p4, %p8142_p5 }
 0xa52   : > { %p7984_p11 = por %p7983_p10, %p7982_p9 }
 0xa53   : > { %p7980_p8 = pneg %p7979_p7 }
 0xa54   : > { %p7986_p13 = por %p7985_p12, %p7984_p11 }
 0xa56   : > { %p7987_p0 = pnand %p7986_p13, %p7980_p8 }
 0xa58   : > { %7990 = shalt.err (!%p7987_p0)
}
 0xa59   : > { %7698 = dma.vmem_to_hbm [thread:$0]  (%p8142_p5), %s11775_s16, 16, %s11773_s20, %s5669_s14  }
 0xa5a PF: > { %p7704_p1 = scmp.ge.s32.totalorder %s8025_s28, 2  ;;  %s5693_s29 = sand.u32 1, %s8013_s25  }
 0xa5b   : > { %s5694_s17 = scalar_lea.sflag [#allocation3], %s5693_s29 }
 0xa5c   : > { %p7701_p2 = pnand %p7704_p1, %p8146_p6 }
 0xa5e   : > { %8008 = dma.done.wait (!%p7701_p2), %s5694_s17, 16  }
 0xa5f   : > { %8010 = vsyncadd (!%p7701_p2), %s5694_s17, 4294967280  ;;  %s11935_s28 = sld [smem:[#allocation6_spill]]  ;;  %s11936_s19 = sld [smem:[#allocation5_spill]] }
 0xa60   : > { %s11937_s27 = sld [smem:[#allocation7_spill]]  ;;  %s11938_s25 = smov %s8017_s26 }
 0xa65   : > { %p23_p3 = scmp.ge.s32.totalorder %s11935_s28, 4   ;;  %s11939_s26 = smov %s11936_s19 }
 0xa67   :  { %25 = sbr.rel (!%p23_p3) target bundleno = 3 (0x3), region = 119 }
 0xa6e   :  { %5698 = vsyncpa [#allocation3], 1 }
 0xa6f   :  { %5700 = vsyncpa [#allocation3 + $0x1], 1 }

</bundles_post_ra>
